<compile_context>
chip_gen: v6e
topology: v6e:2x2x1
jax: 0.10.0
libtpu: 0.0.40
codegen_flags: <defaults>
</compile_context>

<pallas_src>
import functools
import math

import numpy as np
import jax
import jax.numpy as jnp
from jax.experimental import pallas as pl
from jax.experimental.pallas import tpu as pltpu

NEG_INF = -1e18
LN_EPS = 1e-6


# --------------------------- in-kernel helpers ---------------------------

def _ln(x, g, b, eps):
    """LayerNorm in f32. x: [M, D]; g, b: [1, D]."""
    mu = jnp.mean(x, axis=-1, keepdims=True)
    var = jnp.mean((x - mu) ** 2, axis=-1, keepdims=True)
    return (x - mu) * jax.lax.rsqrt(var + eps) * g + b


def _mm(a_f32, w_bf16):
    """bf16 x bf16 matmul, f32 accumulate (MXU-native)."""
    return jnp.dot(a_f32.astype(jnp.bfloat16), w_bf16,
                   preferred_element_type=jnp.float32)


def _split_heads(x, heads):
    """[S, D] f32 -> [H, S, Dh] bf16 (stack along a new leading axis)."""
    S, D = x.shape
    Dh = D // heads
    return jnp.stack([x[:, h * Dh:(h + 1) * Dh] for h in range(heads)],
                     axis=0).astype(jnp.bfloat16)


def _merge_heads(o):
    """[H, S, Dh] -> [S, H*Dh] (heads contiguous along lanes)."""
    H = o.shape[0]
    return jnp.concatenate([o[h] for h in range(H)], axis=-1)


def _mha(q, k, v, bias, heads):
    """Head-batched attention for one example.

    q: [Sq, D], k/v: [Sk, D] (f32); bias broadcastable to [Sq, Sk] (additive).
    Scores / softmax / PV run as single batched (leading head axis) ops.
    """
    Dh = q.shape[-1] // heads
    scale = 1.0 / math.sqrt(Dh)
    qh = _split_heads(q, heads)                     # [H, Sq, Dh] bf16
    kh = _split_heads(k, heads)                     # [H, Sk, Dh] bf16
    vh = _split_heads(v, heads)                     # [H, Sk, Dh] bf16
    s = jax.lax.dot_general(qh, kh, (((2,), (2,)), ((0,), (0,))),
                            preferred_element_type=jnp.float32) * scale
    s = s + bias[None]                              # [H, Sq, Sk]
    m = jnp.max(s, axis=-1, keepdims=True)
    p = jnp.exp(s - m)
    p = p * pl.reciprocal(jnp.sum(p, axis=-1, keepdims=True), approx=True)
    o = jax.lax.dot_general(p.astype(jnp.bfloat16), vh,
                            (((2,), (1,)), ((0,), (0,))),
                            preferred_element_type=jnp.float32)  # [H, Sq, Dh]
    return _merge_heads(o)                          # [Sq, D] f32


# ----------------------- fused layer-stack kernels -------------------------

def _enc_stack_kernel(x_ref, kbias_ref, ln1g, ln1b, wqkv, bqkv, wo, bo,
                      ln2g, ln2b, w1, b1, w2, b2, lnfg, lnfb,
                      o_ref, act_ref, *, heads, eps):
    """All encoder layers + final LN for one batch chunk.

    grid = (core_split, n_layers); activation persists in `act_ref` across
    the layer axis, weights are streamed per layer.
    """
    layer = pl.program_id(1)
    n_layers = pl.num_programs(1)
    Bc, S, D = x_ref.shape

    @pl.when(layer == 0)
    def _():
        act_ref[...] = x_ref[...].reshape(Bc * S, D).astype(jnp.float32)

    x = act_ref[...]                                       # [Bc*S, D]
    # PreSumm TransformerEncoderLayer skips the input LN on layer 0.
    h = jnp.where(layer == 0, x, _ln(x, ln1g[0], ln1b[0], eps))
    qkv = _mm(h, wqkv[0]) + bqkv[0]                        # [Bc*S, 3D]

    ctxs = []
    for b in range(Bc):                                    # tiny static loop
        r = b * S
        ctxs.append(_mha(qkv[r:r + S, 0:D],
                         qkv[r:r + S, D:2 * D],
                         qkv[r:r + S, 2 * D:3 * D],
                         kbias_ref[b], heads))             # bias [1, S]
    ctx = ctxs[0] if Bc == 1 else jnp.concatenate(ctxs, axis=0)

    attn = _mm(ctx, wo[0]) + bo[0] + x
    h2 = _ln(attn, ln2g[0], ln2b[0], eps)
    inter = jnp.maximum(_mm(h2, w1[0]) + b1[0], 0.0)
    y = _mm(inter, w2[0]) + b2[0] + attn
    act_ref[...] = y

    @pl.when(layer == n_layers - 1)
    def _():
        o_ref[...] = _ln(y, lnfg[...], lnfb[...], eps
                         ).reshape(Bc, S, D).astype(o_ref.dtype)


def _dec_stack_kernel(x_ref, mem_ref, sbias_ref, mbias_ref,
                      ln1g, ln1b, wqkv_s, bqkv_s, wo_s, bo_s,
                      ln2g, ln2b, wq_c, bq_c, wkv_c, bkv_c, wo_c, bo_c,
                      ln3g, ln3b, w1, b1, w2, b2, lnfg, lnfb,
                      o_ref, act_ref, *, heads, eps):
    """All decoder layers + final LN for one batch chunk."""
    layer = pl.program_id(1)
    n_layers = pl.num_programs(1)
    Bc, T, D = x_ref.shape
    Sm = mem_ref.shape[1]

    @pl.when(layer == 0)
    def _():
        act_ref[...] = x_ref[...].reshape(Bc * T, D).astype(jnp.float32)

    x = act_ref[...]                                       # [Bc*T, D]
    mem = mem_ref[...].reshape(Bc * Sm, D).astype(jnp.float32)

    # --- masked self-attention ---
    h = _ln(x, ln1g[0], ln1b[0], eps)
    qkv = _mm(h, wqkv_s[0]) + bqkv_s[0]                    # [Bc*T, 3D]
    ctxs = []
    for b in range(Bc):
        r = b * T
        ctxs.append(_mha(qkv[r:r + T, 0:D],
                         qkv[r:r + T, D:2 * D],
                         qkv[r:r + T, 2 * D:3 * D],
                         sbias_ref[b], heads))             # bias [T, T]
    ctx = ctxs[0] if Bc == 1 else jnp.concatenate(ctxs, axis=0)
    q_out = _mm(ctx, wo_s[0]) + bo_s[0] + x

    # --- cross attention over hierarchical memory ---
    hn = _ln(q_out, ln2g[0], ln2b[0], eps)
    qc = _mm(hn, wq_c[0]) + bq_c[0]                        # [Bc*T, D]
    kvc = _mm(mem, wkv_c[0]) + bkv_c[0]                    # [Bc*Sm, 2D]
    ctxs = []
    for b in range(Bc):
        ctxs.append(_mha(qc[b * T:(b + 1) * T],
                         kvc[b * Sm:(b + 1) * Sm, 0:D],
                         kvc[b * Sm:(b + 1) * Sm, D:2 * D],
                         mbias_ref[b], heads))             # bias [1, Sm]
    ctx_c = ctxs[0] if Bc == 1 else jnp.concatenate(ctxs, axis=0)
    mid = _mm(ctx_c, wo_c[0]) + bo_c[0] + q_out

    # --- feed-forward ---
    h3 = _ln(mid, ln3g[0], ln3b[0], eps)
    inter = jnp.maximum(_mm(h3, w1[0]) + b1[0], 0.0)
    y = _mm(inter, w2[0]) + b2[0] + mid
    act_ref[...] = y

    @pl.when(layer == n_layers - 1)
    def _():
        o_ref[...] = _ln(y, lnfg[...], lnfb[...], eps
                         ).reshape(Bc, T, D).astype(o_ref.dtype)


# ------------------------------ stack wrappers ------------------------------

def _pick_nsplit(B, *seq_dims):
    """2-way core split when possible; keep batch folding sublane-aligned."""
    aligned = all(s % 8 == 0 for s in seq_dims)
    if B % 2 == 0 and (B // 2 == 1 or aligned):
        return 2
    if not aligned:
        return B          # fall back to per-example chunks
    return 1


def _compiler_params():
    return pltpu.CompilerParams(
        dimension_semantics=("parallel", "arbitrary"),
        vmem_limit_bytes=48 * 1024 * 1024)


def transformer_encoder(x, pad_mask, params, pos_table, heads):
    """x: [B, S, D]; pad_mask: [B, S] bool, True = padding (== ~mask_src)."""
    B, S, D = x.shape
    L = params["wqkv"].shape[0]
    FF = params["w1"].shape[-1]
    x = (x + pos_table[:S][None]).astype(jnp.float32)
    kbias = pad_mask.astype(jnp.float32).reshape(B, 1, S) * NEG_INF
    nsplit = _pick_nsplit(B, S)
    Bc = B // nsplit

    bspec = lambda shape: pl.BlockSpec(shape, lambda c, l: (c, 0, 0))
    wspec = lambda shape: pl.BlockSpec(shape, lambda c, l: (l, 0, 0))
    rep2 = lambda shape: pl.BlockSpec(shape, lambda c, l: (0, 0))

    kernel = functools.partial(_enc_stack_kernel, heads=heads, eps=LN_EPS)
    return pl.pallas_call(
        kernel,
        out_shape=jax.ShapeDtypeStruct((B, S, D), jnp.float32),
        grid=(nsplit, L),
        in_specs=[
            bspec((Bc, S, D)),                     # x
            bspec((Bc, 1, S)),                     # additive key-pad bias
            wspec((1, 1, D)), wspec((1, 1, D)),    # ln1
            wspec((1, D, 3 * D)), wspec((1, 1, 3 * D)),   # wqkv, bqkv
            wspec((1, D, D)), wspec((1, 1, D)),    # wo, bo
            wspec((1, 1, D)), wspec((1, 1, D)),    # ln2 (ffn)
            wspec((1, D, FF)), wspec((1, 1, FF)),  # w1, b1
            wspec((1, FF, D)), wspec((1, 1, D)),   # w2, b2
            rep2((1, D)), rep2((1, D)),            # final LN
        ],
        out_specs=bspec((Bc, S, D)),
        scratch_shapes=[pltpu.VMEM((Bc * S, D), jnp.float32)],
        compiler_params=_compiler_params(),
    )(x, kbias,
      params["ln1_g"], params["ln1_b"], params["wqkv"], params["bqkv"],
      params["wo"], params["bo"], params["ln2_g"], params["ln2_b"],
      params["w1"], params["b1"], params["w2"], params["b2"],
      params["lnf_g"], params["lnf_b"])


def transformer_decoder(tgt_in, memory, mem_pad_mask, params, pos_table,
                        heads, pad_token):
    """tgt_in: [B, T] int32; memory: [B, Sm, D]; mem_pad_mask: [B, Sm] (True=pad)."""
    B, T = tgt_in.shape
    Sm, D = memory.shape[1], memory.shape[-1]
    L = params["self_wqkv"].shape[0]
    FF = params["w1"].shape[-1]

    x = params["emb"][tgt_in] * math.sqrt(D) + pos_table[:T][None]
    col = jnp.arange(T)[None, :]
    row = jnp.arange(T)[:, None]
    causal = jnp.where(col > row, NEG_INF, 0.0).astype(jnp.float32)      # [T,T]
    tpad = (tgt_in == pad_token).astype(jnp.float32)                     # [B,T]
    sbias = causal[None, :, :] + tpad[:, None, :] * NEG_INF              # [B,T,T]
    mbias = mem_pad_mask.astype(jnp.float32).reshape(B, 1, Sm) * NEG_INF

    nsplit = _pick_nsplit(B, T, Sm)
    Bc = B // nsplit

    bspec = lambda shape: pl.BlockSpec(shape, lambda c, l: (c, 0, 0))
    wspec = lambda shape: pl.BlockSpec(shape, lambda c, l: (l, 0, 0))
    rep2 = lambda shape: pl.BlockSpec(shape, lambda c, l: (0, 0))

    kernel = functools.partial(_dec_stack_kernel, heads=heads, eps=LN_EPS)
    return pl.pallas_call(
        kernel,
        out_shape=jax.ShapeDtypeStruct((B, T, D), jnp.float32),
        grid=(nsplit, L),
        in_specs=[
            bspec((Bc, T, D)),                     # x (tgt embeddings + pos)
            bspec((Bc, Sm, D)),                    # hierarchical memory
            bspec((Bc, T, T)),                     # causal + tgt-pad bias
            bspec((Bc, 1, Sm)),                    # memory pad bias
            wspec((1, 1, D)), wspec((1, 1, D)),    # ln1
            wspec((1, D, 3 * D)), wspec((1, 1, 3 * D)),   # self wqkv
            wspec((1, D, D)), wspec((1, 1, D)),    # self wo
            wspec((1, 1, D)), wspec((1, 1, D)),    # ln2
            wspec((1, D, D)), wspec((1, 1, D)),    # cross wq
            wspec((1, D, 2 * D)), wspec((1, 1, 2 * D)),   # cross wkv
            wspec((1, D, D)), wspec((1, 1, D)),    # cross wo
            wspec((1, 1, D)), wspec((1, 1, D)),    # ln3 (ffn)
            wspec((1, D, FF)), wspec((1, 1, FF)),  # w1, b1
            wspec((1, FF, D)), wspec((1, 1, D)),   # w2, b2
            rep2((1, D)), rep2((1, D)),            # final LN
        ],
        out_specs=bspec((Bc, T, D)),
        scratch_shapes=[pltpu.VMEM((Bc * T, D), jnp.float32)],
        compiler_params=_compiler_params(),
    )(x, memory, sbias, mbias,
      params["ln1_g"], params["ln1_b"],
      params["self_wqkv"], params["self_bqkv"],
      params["self_wo"], params["self_bo"],
      params["ln2_g"], params["ln2_b"],
      params["cross_wq"], params["cross_bq"],
      params["cross_wkv"], params["cross_bkv"],
      params["cross_wo"], params["cross_bo"],
      params["ln3_g"], params["ln3_b"],
      params["w1"], params["b1"], params["w2"], params["b2"],
      params["lnf_g"], params["lnf_b"])


# ------------------------- parameter construction -------------------------
# Mirrors Model._set_parameter_tf: Linear/Embedding weights ~ N(0, 0.02),
# biases zero, LayerNorm weight=1, bias=0.  Matmul weights stored in bf16
# (MXU operand dtype); biases / LN params / embeddings stay f32.  Per-layer
# weights are stacked with a leading layer axis for weight streaming.

def _w(key, shape):
    return (0.02 * jax.random.normal(key, shape, jnp.float32)
            ).astype(jnp.bfloat16)


def _zeros(n):
    return jnp.zeros((1, n), jnp.float32)


def _ones(n):
    return jnp.ones((1, n), jnp.float32)


def _stack_layers(layer_dicts):
    return {k: jnp.stack([lp[k] for lp in layer_dicts], axis=0)
            for k in layer_dicts[0]}


def init_encoder_params(key, d, dff, n_layers):
    keys = jax.random.split(key, n_layers)

    def one(k):
        k1, k2, k3, k4 = jax.random.split(k, 4)
        return dict(
            ln1_g=_ones(d), ln1_b=_zeros(d),
            wqkv=_w(k1, (d, 3 * d)), bqkv=_zeros(3 * d),
            wo=_w(k2, (d, d)), bo=_zeros(d),
            ln2_g=_ones(d), ln2_b=_zeros(d),
            w1=_w(k3, (d, dff)), b1=_zeros(dff),
            w2=_w(k4, (dff, d)), b2=_zeros(d))

    params = _stack_layers([one(k) for k in keys])
    params["lnf_g"] = _ones(d)
    params["lnf_b"] = _zeros(d)
    return params


def init_decoder_params(key, d, dff, n_layers, vocab_size, pad_token):
    keys = jax.random.split(key, n_layers + 1)
    emb = 0.02 * jax.random.normal(keys[0], (vocab_size, d), jnp.float32)
    emb = emb.at[pad_token].set(0.0)                 # padding_idx = 0

    def one(k):
        k1, k2, k3, k4, k5, k6, k7 = jax.random.split(k, 7)
        return dict(
            ln1_g=_ones(d), ln1_b=_zeros(d),
            self_wqkv=_w(k1, (d, 3 * d)), self_bqkv=_zeros(3 * d),
            self_wo=_w(k2, (d, d)), self_bo=_zeros(d),
            ln2_g=_ones(d), ln2_b=_zeros(d),
            cross_wq=_w(k3, (d, d)), cross_bq=_zeros(d),
            cross_wkv=_w(k4, (d, 2 * d)), cross_bkv=_zeros(2 * d),
            cross_wo=_w(k5, (d, d)), cross_bo=_zeros(d),
            ln3_g=_ones(d), ln3_b=_zeros(d),
            w1=_w(k6, (d, dff)), b1=_zeros(dff),
            w2=_w(k7, (dff, d)), b2=_zeros(d))

    params = _stack_layers([one(k) for k in keys[1:]])
    params["emb"] = emb
    params["lnf_g"] = _ones(d)
    params["lnf_b"] = _zeros(d)
    return params


def sinusoid_pos_encoding(max_len, d):
    """Precomputed with numpy (no in-forward scatters)."""
    pos = np.arange(max_len, dtype=np.float32)[:, None]
    div = np.exp(np.arange(0, d, 2, dtype=np.float32) * (-math.log(10000.0) / d))
    pe = np.zeros((max_len, d), np.float32)
    pe[:, 0::2] = np.sin(pos * div)
    pe[:, 1::2] = np.cos(pos * div)
    return jnp.asarray(pe)


def build_segment_gather(ex_segs):
    """Static indices replacing torch.split + pad_sequence (vectorized gather)."""
    bsz, max_len = len(ex_segs), max(ex_segs)
    idx = np.zeros((bsz, max_len), np.int32)
    pad = np.ones((bsz, max_len), bool)              # True = pad
    off = 0
    for b, L in enumerate(ex_segs):
        idx[b, :L] = np.arange(off, off + L)
        pad[b, :L] = False
        off += L
    return jnp.asarray(idx), jnp.asarray(pad)


# ------------------------------ full forward -------------------------------

def model_forward(params, src, mask_src, tgt, seg_idx, cls_mask, heads,
                  pad_token):
    # 1) token embedding (padding_idx=0 -> zero row baked into the table)
    src_emb = params["src_emb"][src]                               # [N_utt,S,D]
    # 2) utterance-level encoder; mask convention True = pad (== ~mask_src)
    top_vec = transformer_encoder(src_emb, ~mask_src, params["encoder"],
                                  params["pos_enc"], heads)
    # 3) [CLS] (position 0) vector of every utterance
    clss = top_vec[:, 0, :]                                        # [N_utt, D]
    # 4) torch.split + pad_sequence -> single gather + mask
    cls_input = jnp.where(cls_mask[:, :, None], 0.0, clss[seg_idx])
    # 5) hierarchical encoder over per-utterance [CLS] vectors
    hier = transformer_encoder(cls_input, cls_mask, params["hier_encoder"],
                               params["pos_enc"], heads)
    # 6) decoder (training path): decoder(tgt[:, :-1], hier, memory_masks=cls_mask)
    decode_output = transformer_decoder(tgt[:, :-1], hier, cls_mask,
                                        params["decoder"], params["pos_enc"],
                                        heads, pad_token)
    # topic_model disabled -> topic_loss = None ; training -> summary = None
    return decode_output, None, None


# ---------------------------------- main -----------------------------------

if __name__ == "__main__":
    VOCAB = 64
    D = 32          # enc_hidden_size / dec_hidden_size
    FF = 64         # enc_ff_size / hier_ff_size / dec_ff_size
    HEADS = 2
    ENC_LAYERS = 2
    HIER_LAYERS = 2
    DEC_LAYERS = 2
    PAD = 0
    SRC_LEN = 16
    EX_SEGS = (2, 4)          # 2 dialogues, with 2 and 4 utterances
    N_UTT = sum(EX_SEGS)
    TGT_LEN = 8
    MAX_POS = 64

    root = jax.random.PRNGKey(0)
    k_emb, k_enc, k_hier, k_dec, k_src, k_len, k_tgt = jax.random.split(root, 7)

    src_emb_tbl = 0.02 * jax.random.normal(k_emb, (VOCAB, D), jnp.float32)
    src_emb_tbl = src_emb_tbl.at[PAD].set(0.0)      # nn.Embedding(padding_idx=0)

    params = dict(
        src_emb=src_emb_tbl,
        pos_enc=sinusoid_pos_encoding(MAX_POS, D),
        encoder=init_encoder_params(k_enc, D, FF, ENC_LAYERS),
        hier_encoder=init_encoder_params(k_hier, D, FF, HIER_LAYERS),
        decoder=init_decoder_params(k_dec, D, FF, DEC_LAYERS, VOCAB, PAD),
    )

    # synthetic batch: token ids >= 5 (avoid special ids), 0 = [PAD]
    src = jax.random.randint(k_src, (N_UTT, SRC_LEN), 5, VOCAB, dtype=jnp.int32)
    lens = jax.random.randint(k_len, (N_UTT,), 6, SRC_LEN + 1, dtype=jnp.int32)
    pos = jnp.arange(SRC_LEN)[None, :]
    mask_src = pos < lens[:, None]                  # True = real token
    src = jnp.where(mask_src, src, PAD)
    tgt = jax.random.randint(k_tgt, (len(EX_SEGS), TGT_LEN), 5, VOCAB,
                             dtype=jnp.int32)

    seg_idx, cls_mask = build_segment_gather(EX_SEGS)

    forward = jax.jit(model_forward, static_argnums=(6, 7))
    dec_out, summary, topic_loss = forward(params, src, mask_src, tgt,
                                           seg_idx, cls_mask, HEADS, PAD)
    dec_out = jax.block_until_ready(dec_out)

    assert dec_out.shape == (len(EX_SEGS), TGT_LEN - 1, D), dec_out.shape
    assert bool(jnp.all(jnp.isfinite(dec_out)))
    assert summary is None and topic_loss is None
    print("KERNEL_OK")
</pallas_src>

<mosaic_0001>
module attributes {stable_mosaic.version = 11 : i64} {
  func.func @_enc_stack_kernel(%arg0: i32, %arg1: i32, %arg2: memref<1x4x32xf32, #tpu.memory_space<vmem>>, %arg3: memref<1x1x4xf32, #tpu.memory_space<vmem>>, %arg4: memref<1x1x32xf32, #tpu.memory_space<vmem>>, %arg5: memref<1x1x32xf32, #tpu.memory_space<vmem>>, %arg6: memref<1x32x96xbf16, #tpu.memory_space<vmem>>, %arg7: memref<1x1x96xf32, #tpu.memory_space<vmem>>, %arg8: memref<1x32x32xbf16, #tpu.memory_space<vmem>>, %arg9: memref<1x1x32xf32, #tpu.memory_space<vmem>>, %arg10: memref<1x1x32xf32, #tpu.memory_space<vmem>>, %arg11: memref<1x1x32xf32, #tpu.memory_space<vmem>>, %arg12: memref<1x32x64xbf16, #tpu.memory_space<vmem>>, %arg13: memref<1x1x64xf32, #tpu.memory_space<vmem>>, %arg14: memref<1x64x32xbf16, #tpu.memory_space<vmem>>, %arg15: memref<1x1x32xf32, #tpu.memory_space<vmem>>, %arg16: memref<1x32xf32, #tpu.memory_space<vmem>>, %arg17: memref<1x32xf32, #tpu.memory_space<vmem>>, %arg18: memref<1x4x32xf32, #tpu.memory_space<vmem>>, %arg19: memref<4x32xf32, #tpu.memory_space<vmem>>) attributes {dimension_semantics = [#tpu.dimension_semantics<parallel>, #tpu.dimension_semantics<arbitrary>], iteration_bounds = array<i64: 2, 2>, scalar_prefetch = 0 : i64, scratch_operands = 1 : i64, tpu.core_type = #tpu.core_type<tc>, window_params = [{transform_indices = @transform_0, window_bounds = array<i64: 1, 4, 32>}, {transform_indices = @transform_1, window_bounds = array<i64: 1, 1, 4>}, {transform_indices = @transform_2, window_bounds = array<i64: 1, 1, 32>}, {transform_indices = @transform_3, window_bounds = array<i64: 1, 1, 32>}, {transform_indices = @transform_4, window_bounds = array<i64: 1, 32, 96>}, {transform_indices = @transform_5, window_bounds = array<i64: 1, 1, 96>}, {transform_indices = @transform_6, window_bounds = array<i64: 1, 32, 32>}, {transform_indices = @transform_7, window_bounds = array<i64: 1, 1, 32>}, {transform_indices = @transform_8, window_bounds = array<i64: 1, 1, 32>}, {transform_indices = @transform_9, window_bounds = array<i64: 1, 1, 32>}, {transform_indices = @transform_10, window_bounds = array<i64: 1, 32, 64>}, {transform_indices = @transform_11, window_bounds = array<i64: 1, 1, 64>}, {transform_indices = @transform_12, window_bounds = array<i64: 1, 64, 32>}, {transform_indices = @transform_13, window_bounds = array<i64: 1, 1, 32>}, {pipeline_mode = #tpu.pipeline_mode<synchronous>, transform_indices = @transform_14, window_bounds = array<i64: 1, 32>}, {pipeline_mode = #tpu.pipeline_mode<synchronous>, transform_indices = @transform_15, window_bounds = array<i64: 1, 32>}, {transform_indices = @transform_16, window_bounds = array<i64: 1, 4, 32>}]} {
    %c0_i32 = arith.constant 0 : i32
    %0 = arith.cmpi eq, %arg1, %c0_i32 : i32
    %1 = arith.extui %0 : i1 to i32
    %c0_i32_0 = arith.constant 0 : i32
    %2 = arith.cmpi ne, %1, %c0_i32_0 : i32
    scf.if %2 {
      %c0_64 = arith.constant 0 : index
      %c0_65 = arith.constant 0 : index
      %c0_66 = arith.constant 0 : index
      %144 = vector.load %arg2[%c0_64, %c0_65, %c0_66] : memref<1x4x32xf32, #tpu.memory_space<vmem>>, vector<1x4x32xf32>
      %145 = vector.shape_cast %144 : vector<1x4x32xf32> to vector<4x32xf32>
      %c0_67 = arith.constant 0 : index
      %c0_68 = arith.constant 0 : index
      %146 = vector.load %arg19[%c0_67, %c0_68] : memref<4x32xf32, #tpu.memory_space<vmem>>, vector<4x32xf32>
      tpu.vector_store %arg19[%c0_67, %c0_68], %145 {strides = array<i32>} : memref<4x32xf32, #tpu.memory_space<vmem>>, vector<4x32xf32>,
    } else {
    }
    %c0 = arith.constant 0 : index
    %c0_1 = arith.constant 0 : index
    %3 = vector.load %arg19[%c0, %c0_1] : memref<4x32xf32, #tpu.memory_space<vmem>>, vector<4x32xf32>
    %c0_i32_2 = arith.constant 0 : i32
    %4 = arith.cmpi eq, %arg1, %c0_i32_2 : i32
    %c0_3 = arith.constant 0 : index
    %c0_4 = arith.constant 0 : index
    %c0_5 = arith.constant 0 : index
    %5 = vector.load %arg4[%c0_3, %c0_4, %c0_5] : memref<1x1x32xf32, #tpu.memory_space<vmem>>, vector<1x1x32xf32>
    %6 = vector.shape_cast %5 : vector<1x1x32xf32> to vector<1x32xf32>
    %c0_6 = arith.constant 0 : index
    %c0_7 = arith.constant 0 : index
    %c0_8 = arith.constant 0 : index
    %7 = vector.load %arg5[%c0_6, %c0_7, %c0_8] : memref<1x1x32xf32, #tpu.memory_space<vmem>>, vector<1x1x32xf32>
    %8 = vector.shape_cast %7 : vector<1x1x32xf32> to vector<1x32xf32>
    %cst = arith.constant dense<0.000000e+00> : vector<4xf32>
    %9 = vector.multi_reduction <add>, %3, %cst [1] : vector<4x32xf32> to vector<4xf32>
    %10 = vector.shape_cast %9 : vector<4xf32> to vector<4x1xf32>
    %cst_9 = arith.constant 3.200000e+01 : f32
    %11 = vector.broadcast %cst_9 : f32 to vector<4x1xf32>
    %12 = arith.divf %10, %11 : vector<4x1xf32>
    %13 = vector.broadcast %12 : vector<4x1xf32> to vector<4x32xf32>
    %14 = arith.subf %3, %13 : vector<4x32xf32>
    %15 = arith.mulf %14, %14 : vector<4x32xf32>
    %cst_10 = arith.constant dense<0.000000e+00> : vector<4xf32>
    %16 = vector.multi_reduction <add>, %15, %cst_10 [1] : vector<4x32xf32> to vector<4xf32>
    %17 = vector.shape_cast %16 : vector<4xf32> to vector<4x1xf32>
    %cst_11 = arith.constant 3.200000e+01 : f32
    %18 = vector.broadcast %cst_11 : f32 to vector<4x1xf32>
    %19 = arith.divf %17, %18 : vector<4x1xf32>
    %20 = vector.broadcast %12 : vector<4x1xf32> to vector<4x32xf32>
    %21 = arith.subf %3, %20 : vector<4x32xf32>
    %cst_12 = arith.constant 9.99999997E-7 : f32
    %22 = vector.broadcast %cst_12 : f32 to vector<4x1xf32>
    %23 = arith.addf %19, %22 : vector<4x1xf32>
    %24 = math.rsqrt %23 : vector<4x1xf32>
    %25 = vector.broadcast %24 : vector<4x1xf32> to vector<4x32xf32>
    %26 = arith.mulf %21, %25 : vector<4x32xf32>
    %27 = vector.broadcast %6 : vector<1x32xf32> to vector<4x32xf32>
    %28 = arith.mulf %26, %27 : vector<4x32xf32>
    %29 = vector.broadcast %8 : vector<1x32xf32> to vector<4x32xf32>
    %30 = arith.addf %28, %29 : vector<4x32xf32>
    %31 = arith.select %4, %3, %30 : vector<4x32xf32>
    %c0_13 = arith.constant 0 : index
    %c0_14 = arith.constant 0 : index
    %c0_15 = arith.constant 0 : index
    %32 = vector.load %arg6[%c0_13, %c0_14, %c0_15] : memref<1x32x96xbf16, #tpu.memory_space<vmem>>, vector<1x32x96xbf16>
    %33 = vector.shape_cast %32 : vector<1x32x96xbf16> to vector<32x96xbf16>
    %34 = arith.truncf %31 : vector<4x32xf32> to vector<4x32xbf16>
    %cst_16 = arith.constant dense<0.000000e+00> : vector<4x96xf32>
    %35 = tpu.matmul %34, %33, %cst_16 {dimension_numbers = #tpu.dot_dimension_numbers<[1], [0], [0], [1], [0, 0, 1, 1], [], []>} : vector<4x32xbf16>, vector<32x96xbf16>, vector<4x96xf32> -> vector<4x96xf32>
    %c0_17 = arith.constant 0 : index
    %c0_18 = arith.constant 0 : index
    %c0_19 = arith.constant 0 : index
    %36 = vector.load %arg7[%c0_17, %c0_18, %c0_19] : memref<1x1x96xf32, #tpu.memory_space<vmem>>, vector<1x1x96xf32>
    %37 = vector.shape_cast %36 : vector<1x1x96xf32> to vector<1x96xf32>
    %38 = vector.broadcast %37 : vector<1x96xf32> to vector<4x96xf32>
    %39 = arith.addf %35, %38 : vector<4x96xf32>
    %40 = vector.extract_strided_slice %39 {offsets = [0, 0], sizes = [4, 32], strides = [1, 1]} : vector<4x96xf32> to vector<4x32xf32>
    %41 = vector.extract_strided_slice %39 {offsets = [0, 32], sizes = [4, 32], strides = [1, 1]} : vector<4x96xf32> to vector<4x32xf32>
    %42 = vector.extract_strided_slice %39 {offsets = [0, 64], sizes = [4, 32], strides = [1, 1]} : vector<4x96xf32> to vector<4x32xf32>
    %c0_20 = arith.constant 0 : index
    %c0_21 = arith.constant 0 : index
    %c0_22 = arith.constant 0 : index
    %43 = vector.load %arg3[%c0_20, %c0_21, %c0_22] : memref<1x1x4xf32, #tpu.memory_space<vmem>>, vector<1x1x4xf32>
    %44 = vector.shape_cast %43 : vector<1x1x4xf32> to vector<1x4xf32>
    %45 = vector.extract_strided_slice %40 {offsets = [0, 0], sizes = [4, 16], strides = [1, 1]} : vector<4x32xf32> to vector<4x16xf32>
    %46 = vector.extract_strided_slice %40 {offsets = [0, 16], sizes = [4, 16], strides = [1, 1]} : vector<4x32xf32> to vector<4x16xf32>
    %47 = vector.shape_cast %45 : vector<4x16xf32> to vector<1x4x16xf32>
    %48 = vector.shape_cast %46 : vector<4x16xf32> to vector<1x4x16xf32>
    %49 = tpu.concatenate %47, %48 in 0 : vector<1x4x16xf32>, vector<1x4x16xf32> -> vector<2x4x16xf32>
    %50 = arith.truncf %49 : vector<2x4x16xf32> to vector<2x4x16xbf16>
    %51 = vector.extract_strided_slice %41 {offsets = [0, 0], sizes = [4, 16], strides = [1, 1]} : vector<4x32xf32> to vector<4x16xf32>
    %52 = vector.extract_strided_slice %41 {offsets = [0, 16], sizes = [4, 16], strides = [1, 1]} : vector<4x32xf32> to vector<4x16xf32>
    %53 = vector.shape_cast %51 : vector<4x16xf32> to vector<1x4x16xf32>
    %54 = vector.shape_cast %52 : vector<4x16xf32> to vector<1x4x16xf32>
    %55 = tpu.concatenate %53, %54 in 0 : vector<1x4x16xf32>, vector<1x4x16xf32> -> vector<2x4x16xf32>
    %56 = arith.truncf %55 : vector<2x4x16xf32> to vector<2x4x16xbf16>
    %57 = vector.extract_strided_slice %42 {offsets = [0, 0], sizes = [4, 16], strides = [1, 1]} : vector<4x32xf32> to vector<4x16xf32>
    %58 = vector.extract_strided_slice %42 {offsets = [0, 16], sizes = [4, 16], strides = [1, 1]} : vector<4x32xf32> to vector<4x16xf32>
    %59 = vector.shape_cast %57 : vector<4x16xf32> to vector<1x4x16xf32>
    %60 = vector.shape_cast %58 : vector<4x16xf32> to vector<1x4x16xf32>
    %61 = tpu.concatenate %59, %60 in 0 : vector<1x4x16xf32>, vector<1x4x16xf32> -> vector<2x4x16xf32>
    %62 = arith.truncf %61 : vector<2x4x16xf32> to vector<2x4x16xbf16>
    %cst_23 = arith.constant dense<0.000000e+00> : vector<2x4x4xf32>
    %63 = tpu.matmul %50, %56, %cst_23 {dimension_numbers = #tpu.dot_dimension_numbers<[2], [2], [1], [1], [0, 0, 0, 1, 1, 1], [0], [0]>} : vector<2x4x16xbf16>, vector<2x4x16xbf16>, vector<2x4x4xf32> -> vector<2x4x4xf32>
    %cst_24 = arith.constant 2.500000e-01 : f32
    %64 = vector.broadcast %cst_24 : f32 to vector<2x4x4xf32>
    %65 = arith.mulf %63, %64 : vector<2x4x4xf32>
    %66 = vector.shape_cast %44 : vector<1x4xf32> to vector<1x1x4xf32>
    %67 = vector.broadcast %66 : vector<1x1x4xf32> to vector<2x4x4xf32>
    %68 = arith.addf %65, %67 : vector<2x4x4xf32>
    %cst_25 = arith.constant dense<0xFF800000> : vector<2x4xf32>
    %69 = vector.multi_reduction <maximumf>, %68, %cst_25 [2] : vector<2x4x4xf32> to vector<2x4xf32>
    %70 = vector.shape_cast %69 : vector<2x4xf32> to vector<2x4x1xf32>
    %71 = vector.broadcast %70 : vector<2x4x1xf32> to vector<2x4x4xf32>
    %72 = arith.subf %68, %71 : vector<2x4x4xf32>
    %73 = math.exp %72 : vector<2x4x4xf32>
    %cst_26 = arith.constant dense<0.000000e+00> : vector<2x4xf32>
    %74 = vector.multi_reduction <add>, %73, %cst_26 [2] : vector<2x4x4xf32> to vector<2x4xf32>
    %75 = vector.shape_cast %74 : vector<2x4xf32> to vector<2x4x1xf32>
    %76 = tpu.reciprocal %75 {approx = true} : vector<2x4x1xf32> -> vector<2x4x1xf32>
    %77 = vector.broadcast %76 : vector<2x4x1xf32> to vector<2x4x4xf32>
    %78 = arith.mulf %73, %77 : vector<2x4x4xf32>
    %79 = arith.truncf %78 : vector<2x4x4xf32> to vector<2x4x4xbf16>
    %cst_27 = arith.constant dense<0.000000e+00> : vector<2x4x16xf32>
    %80 = tpu.matmul %79, %62, %cst_27 {dimension_numbers = #tpu.dot_dimension_numbers<[2], [1], [1], [2], [0, 0, 0, 1, 1, 2], [0], [0]>} : vector<2x4x4xbf16>, vector<2x4x16xbf16>, vector<2x4x16xf32> -> vector<2x4x16xf32>
    %81 = vector.extract_strided_slice %80 {offsets = [0, 0, 0], sizes = [1, 4, 16], strides = [1, 1, 1]} : vector<2x4x16xf32> to vector<1x4x16xf32>
    %82 = vector.shape_cast %81 : vector<1x4x16xf32> to vector<4x16xf32>
    %83 = vector.extract_strided_slice %80 {offsets = [1, 0, 0], sizes = [1, 4, 16], strides = [1, 1, 1]} : vector<2x4x16xf32> to vector<1x4x16xf32>
    %84 = vector.shape_cast %83 : vector<1x4x16xf32> to vector<4x16xf32>
    %85 = tpu.concatenate %82, %84 in 1 : vector<4x16xf32>, vector<4x16xf32> -> vector<4x32xf32>
    %c0_28 = arith.constant 0 : index
    %c0_29 = arith.constant 0 : index
    %c0_30 = arith.constant 0 : index
    %86 = vector.load %arg8[%c0_28, %c0_29, %c0_30] : memref<1x32x32xbf16, #tpu.memory_space<vmem>>, vector<1x32x32xbf16>
    %87 = vector.shape_cast %86 : vector<1x32x32xbf16> to vector<32x32xbf16>
    %88 = arith.truncf %85 : vector<4x32xf32> to vector<4x32xbf16>
    %cst_31 = arith.constant dense<0.000000e+00> : vector<4x32xf32>
    %89 = tpu.matmul %88, %87, %cst_31 {dimension_numbers = #tpu.dot_dimension_numbers<[1], [0], [0], [1], [0, 0, 1, 1], [], []>} : vector<4x32xbf16>, vector<32x32xbf16>, vector<4x32xf32> -> vector<4x32xf32>
    %c0_32 = arith.constant 0 : index
    %c0_33 = arith.constant 0 : index
    %c0_34 = arith.constant 0 : index
    %90 = vector.load %arg9[%c0_32, %c0_33, %c0_34] : memref<1x1x32xf32, #tpu.memory_space<vmem>>, vector<1x1x32xf32>
    %91 = vector.shape_cast %90 : vector<1x1x32xf32> to vector<1x32xf32>
    %92 = vector.broadcast %91 : vector<1x32xf32> to vector<4x32xf32>
    %93 = arith.addf %89, %92 : vector<4x32xf32>
    %94 = arith.addf %93, %3 : vector<4x32xf32>
    %c0_35 = arith.constant 0 : index
    %c0_36 = arith.constant 0 : index
    %c0_37 = arith.constant 0 : index
    %95 = vector.load %arg10[%c0_35, %c0_36, %c0_37] : memref<1x1x32xf32, #tpu.memory_space<vmem>>, vector<1x1x32xf32>
    %96 = vector.shape_cast %95 : vector<1x1x32xf32> to vector<1x32xf32>
    %c0_38 = arith.constant 0 : index
    %c0_39 = arith.constant 0 : index
    %c0_40 = arith.constant 0 : index
    %97 = vector.load %arg11[%c0_38, %c0_39, %c0_40] : memref<1x1x32xf32, #tpu.memory_space<vmem>>, vector<1x1x32xf32>
    %98 = vector.shape_cast %97 : vector<1x1x32xf32> to vector<1x32xf32>
    %cst_41 = arith.constant dense<0.000000e+00> : vector<4xf32>
    %99 = vector.multi_reduction <add>, %94, %cst_41 [1] : vector<4x32xf32> to vector<4xf32>
    %100 = vector.shape_cast %99 : vector<4xf32> to vector<4x1xf32>
    %cst_42 = arith.constant 3.200000e+01 : f32
    %101 = vector.broadcast %cst_42 : f32 to vector<4x1xf32>
    %102 = arith.divf %100, %101 : vector<4x1xf32>
    %103 = vector.broadcast %102 : vector<4x1xf32> to vector<4x32xf32>
    %104 = arith.subf %94, %103 : vector<4x32xf32>
    %105 = arith.mulf %104, %104 : vector<4x32xf32>
    %cst_43 = arith.constant dense<0.000000e+00> : vector<4xf32>
    %106 = vector.multi_reduction <add>, %105, %cst_43 [1] : vector<4x32xf32> to vector<4xf32>
    %107 = vector.shape_cast %106 : vector<4xf32> to vector<4x1xf32>
    %cst_44 = arith.constant 3.200000e+01 : f32
    %108 = vector.broadcast %cst_44 : f32 to vector<4x1xf32>
    %109 = arith.divf %107, %108 : vector<4x1xf32>
    %110 = vector.broadcast %102 : vector<4x1xf32> to vector<4x32xf32>
    %111 = arith.subf %94, %110 : vector<4x32xf32>
    %cst_45 = arith.constant 9.99999997E-7 : f32
    %112 = vector.broadcast %cst_45 : f32 to vector<4x1xf32>
    %113 = arith.addf %109, %112 : vector<4x1xf32>
    %114 = math.rsqrt %113 : vector<4x1xf32>
    %115 = vector.broadcast %114 : vector<4x1xf32> to vector<4x32xf32>
    %116 = arith.mulf %111, %115 : vector<4x32xf32>
    %117 = vector.broadcast %96 : vector<1x32xf32> to vector<4x32xf32>
    %118 = arith.mulf %116, %117 : vector<4x32xf32>
    %119 = vector.broadcast %98 : vector<1x32xf32> to vector<4x32xf32>
    %120 = arith.addf %118, %119 : vector<4x32xf32>
    %c0_46 = arith.constant 0 : index
    %c0_47 = arith.constant 0 : index
    %c0_48 = arith.constant 0 : index
    %121 = vector.load %arg12[%c0_46, %c0_47, %c0_48] : memref<1x32x64xbf16, #tpu.memory_space<vmem>>, vector<1x32x64xbf16>
    %122 = vector.shape_cast %121 : vector<1x32x64xbf16> to vector<32x64xbf16>
    %123 = arith.truncf %120 : vector<4x32xf32> to vector<4x32xbf16>
    %cst_49 = arith.constant dense<0.000000e+00> : vector<4x64xf32>
    %124 = tpu.matmul %123, %122, %cst_49 {dimension_numbers = #tpu.dot_dimension_numbers<[1], [0], [0], [1], [0, 0, 1, 1], [], []>} : vector<4x32xbf16>, vector<32x64xbf16>, vector<4x64xf32> -> vector<4x64xf32>
    %c0_50 = arith.constant 0 : index
    %c0_51 = arith.constant 0 : index
    %c0_52 = arith.constant 0 : index
    %125 = vector.load %arg13[%c0_50, %c0_51, %c0_52] : memref<1x1x64xf32, #tpu.memory_space<vmem>>, vector<1x1x64xf32>
    %126 = vector.shape_cast %125 : vector<1x1x64xf32> to vector<1x64xf32>
    %127 = vector.broadcast %126 : vector<1x64xf32> to vector<4x64xf32>
    %128 = arith.addf %124, %127 : vector<4x64xf32>
    %cst_53 = arith.constant 0.000000e+00 : f32
    %129 = vector.broadcast %cst_53 : f32 to vector<4x64xf32>
    %130 = arith.maximumf %128, %129 : vector<4x64xf32>
    %c0_54 = arith.constant 0 : index
    %c0_55 = arith.constant 0 : index
    %c0_56 = arith.constant 0 : index
    %131 = vector.load %arg14[%c0_54, %c0_55, %c0_56] : memref<1x64x32xbf16, #tpu.memory_space<vmem>>, vector<1x64x32xbf16>
    %132 = vector.shape_cast %131 : vector<1x64x32xbf16> to vector<64x32xbf16>
    %133 = arith.truncf %130 : vector<4x64xf32> to vector<4x64xbf16>
    %cst_57 = arith.constant dense<0.000000e+00> : vector<4x32xf32>
    %134 = tpu.matmul %133, %132, %cst_57 {dimension_numbers = #tpu.dot_dimension_numbers<[1], [0], [0], [1], [0, 0, 1, 1], [], []>} : vector<4x64xbf16>, vector<64x32xbf16>, vector<4x32xf32> -> vector<4x32xf32>
    %c0_58 = arith.constant 0 : index
    %c0_59 = arith.constant 0 : index
    %c0_60 = arith.constant 0 : index
    %135 = vector.load %arg15[%c0_58, %c0_59, %c0_60] : memref<1x1x32xf32, #tpu.memory_space<vmem>>, vector<1x1x32xf32>
    %136 = vector.shape_cast %135 : vector<1x1x32xf32> to vector<1x32xf32>
    %137 = vector.broadcast %136 : vector<1x32xf32> to vector<4x32xf32>
    %138 = arith.addf %134, %137 : vector<4x32xf32>
    %139 = arith.addf %138, %94 : vector<4x32xf32>
    %c0_61 = arith.constant 0 : index
    %c0_62 = arith.constant 0 : index
    %140 = vector.load %arg19[%c0_61, %c0_62] : memref<4x32xf32, #tpu.memory_space<vmem>>, vector<4x32xf32>
    tpu.vector_store %arg19[%c0_61, %c0_62], %139 {strides = array<i32>} : memref<4x32xf32, #tpu.memory_space<vmem>>, vector<4x32xf32>,
    %c1_i32 = arith.constant 1 : i32
    %141 = arith.cmpi eq, %arg1, %c1_i32 : i32
    %142 = arith.extui %141 : i1 to i32
    %c0_i32_63 = arith.constant 0 : i32
    %143 = arith.cmpi ne, %142, %c0_i32_63 : i32
    scf.if %143 {
      %c0_64 = arith.constant 0 : index
      %c0_65 = arith.constant 0 : index
      %144 = vector.load %arg16[%c0_64, %c0_65] : memref<1x32xf32, #tpu.memory_space<vmem>>, vector<1x32xf32>
      %c0_66 = arith.constant 0 : index
      %c0_67 = arith.constant 0 : index
      %145 = vector.load %arg17[%c0_66, %c0_67] : memref<1x32xf32, #tpu.memory_space<vmem>>, vector<1x32xf32>
      %cst_68 = arith.constant dense<0.000000e+00> : vector<4xf32>
      %146 = vector.multi_reduction <add>, %139, %cst_68 [1] : vector<4x32xf32> to vector<4xf32>
      %147 = vector.shape_cast %146 : vector<4xf32> to vector<4x1xf32>
      %cst_69 = arith.constant 3.200000e+01 : f32
      %148 = vector.broadcast %cst_69 : f32 to vector<4x1xf32>
      %149 = arith.divf %147, %148 : vector<4x1xf32>
      %150 = vector.broadcast %149 : vector<4x1xf32> to vector<4x32xf32>
      %151 = arith.subf %139, %150 : vector<4x32xf32>
      %152 = arith.mulf %151, %151 : vector<4x32xf32>
      %cst_70 = arith.constant dense<0.000000e+00> : vector<4xf32>
      %153 = vector.multi_reduction <add>, %152, %cst_70 [1] : vector<4x32xf32> to vector<4xf32>
      %154 = vector.shape_cast %153 : vector<4xf32> to vector<4x1xf32>
      %cst_71 = arith.constant 3.200000e+01 : f32
      %155 = vector.broadcast %cst_71 : f32 to vector<4x1xf32>
      %156 = arith.divf %154, %155 : vector<4x1xf32>
      %157 = vector.broadcast %149 : vector<4x1xf32> to vector<4x32xf32>
      %158 = arith.subf %139, %157 : vector<4x32xf32>
      %cst_72 = arith.constant 9.99999997E-7 : f32
      %159 = vector.broadcast %cst_72 : f32 to vector<4x1xf32>
      %160 = arith.addf %156, %159 : vector<4x1xf32>
      %161 = math.rsqrt %160 : vector<4x1xf32>
      %162 = vector.broadcast %161 : vector<4x1xf32> to vector<4x32xf32>
      %163 = arith.mulf %158, %162 : vector<4x32xf32>
      %164 = vector.broadcast %144 : vector<1x32xf32> to vector<4x32xf32>
      %165 = arith.mulf %163, %164 : vector<4x32xf32>
      %166 = vector.broadcast %145 : vector<1x32xf32> to vector<4x32xf32>
      %167 = arith.addf %165, %166 : vector<4x32xf32>
      %168 = vector.shape_cast %167 : vector<4x32xf32> to vector<1x4x32xf32>
      %c0_73 = arith.constant 0 : index
      %c0_74 = arith.constant 0 : index
      %c0_75 = arith.constant 0 : index
      %169 = vector.load %arg18[%c0_73, %c0_74, %c0_75] : memref<1x4x32xf32, #tpu.memory_space<vmem>>, vector<1x4x32xf32>
      tpu.vector_store %arg18[%c0_73, %c0_74, %c0_75], %168 {strides = array<i32>} : memref<1x4x32xf32, #tpu.memory_space<vmem>>, vector<1x4x32xf32>,
    } else {
    }
    return
  }
  func.func @transform_0(%arg0: i32, %arg1: i32) -> (i32, i32, i32) {
    %c0_i32 = arith.constant 0 : i32
    %c0_i32_0 = arith.constant 0 : i32
    %c0_i32_1 = arith.constant 0 : i32
    return %arg0, %c0_i32, %c0_i32_0 : i32, i32, i32
  }
  func.func @transform_1(%arg0: i32, %arg1: i32) -> (i32, i32, i32) {
    %c0_i32 = arith.constant 0 : i32
    %c0_i32_0 = arith.constant 0 : i32
    %c0_i32_1 = arith.constant 0 : i32
    return %arg0, %c0_i32, %c0_i32_0 : i32, i32, i32
  }
  func.func @transform_2(%arg0: i32, %arg1: i32) -> (i32, i32, i32) {
    %c0_i32 = arith.constant 0 : i32
    %c0_i32_0 = arith.constant 0 : i32
    %c0_i32_1 = arith.constant 0 : i32
    return %arg1, %c0_i32, %c0_i32_0 : i32, i32, i32
  }
  func.func @transform_3(%arg0: i32, %arg1: i32) -> (i32, i32, i32) {
    %c0_i32 = arith.constant 0 : i32
    %c0_i32_0 = arith.constant 0 : i32
    %c0_i32_1 = arith.constant 0 : i32
    return %arg1, %c0_i32, %c0_i32_0 : i32, i32, i32
  }
  func.func @transform_4(%arg0: i32, %arg1: i32) -> (i32, i32, i32) {
    %c0_i32 = arith.constant 0 : i32
    %c0_i32_0 = arith.constant 0 : i32
    %c0_i32_1 = arith.constant 0 : i32
    return %arg1, %c0_i32, %c0_i32_0 : i32, i32, i32
  }
  func.func @transform_5(%arg0: i32, %arg1: i32) -> (i32, i32, i32) {
    %c0_i32 = arith.constant 0 : i32
    %c0_i32_0 = arith.constant 0 : i32
    %c0_i32_1 = arith.constant 0 : i32
    return %arg1, %c0_i32, %c0_i32_0 : i32, i32, i32
  }
  func.func @transform_6(%arg0: i32, %arg1: i32) -> (i32, i32, i32) {
    %c0_i32 = arith.constant 0 : i32
    %c0_i32_0 = arith.constant 0 : i32
    %c0_i32_1 = arith.constant 0 : i32
    return %arg1, %c0_i32, %c0_i32_0 : i32, i32, i32
  }
  func.func @transform_7(%arg0: i32, %arg1: i32) -> (i32, i32, i32) {
    %c0_i32 = arith.constant 0 : i32
    %c0_i32_0 = arith.constant 0 : i32
    %c0_i32_1 = arith.constant 0 : i32
    return %arg1, %c0_i32, %c0_i32_0 : i32, i32, i32
  }
  func.func @transform_8(%arg0: i32, %arg1: i32) -> (i32, i32, i32) {
    %c0_i32 = arith.constant 0 : i32
    %c0_i32_0 = arith.constant 0 : i32
    %c0_i32_1 = arith.constant 0 : i32
    return %arg1, %c0_i32, %c0_i32_0 : i32, i32, i32
  }
  func.func @transform_9(%arg0: i32, %arg1: i32) -> (i32, i32, i32) {
    %c0_i32 = arith.constant 0 : i32
    %c0_i32_0 = arith.constant 0 : i32
    %c0_i32_1 = arith.constant 0 : i32
    return %arg1, %c0_i32, %c0_i32_0 : i32, i32, i32
  }
  func.func @transform_10(%arg0: i32, %arg1: i32) -> (i32, i32, i32) {
    %c0_i32 = arith.constant 0 : i32
    %c0_i32_0 = arith.constant 0 : i32
    %c0_i32_1 = arith.constant 0 : i32
    return %arg1, %c0_i32, %c0_i32_0 : i32, i32, i32
  }
  func.func @transform_11(%arg0: i32, %arg1: i32) -> (i32, i32, i32) {
    %c0_i32 = arith.constant 0 : i32
    %c0_i32_0 = arith.constant 0 : i32
    %c0_i32_1 = arith.constant 0 : i32
    return %arg1, %c0_i32, %c0_i32_0 : i32, i32, i32
  }
  func.func @transform_12(%arg0: i32, %arg1: i32) -> (i32, i32, i32) {
    %c0_i32 = arith.constant 0 : i32
    %c0_i32_0 = arith.constant 0 : i32
    %c0_i32_1 = arith.constant 0 : i32
    return %arg1, %c0_i32, %c0_i32_0 : i32, i32, i32
  }
  func.func @transform_13(%arg0: i32, %arg1: i32) -> (i32, i32, i32) {
    %c0_i32 = arith.constant 0 : i32
    %c0_i32_0 = arith.constant 0 : i32
    %c0_i32_1 = arith.constant 0 : i32
    return %arg1, %c0_i32, %c0_i32_0 : i32, i32, i32
  }
  func.func @transform_14(%arg0: i32, %arg1: i32) -> (i32, i32) {
    %c0_i32 = arith.constant 0 : i32
    %c0_i32_0 = arith.constant 0 : i32
    %c0_i32_1 = arith.constant 0 : i32
    return %c0_i32, %c0_i32_0 : i32, i32
  }
  func.func @transform_15(%arg0: i32, %arg1: i32) -> (i32, i32) {
    %c0_i32 = arith.constant 0 : i32
    %c0_i32_0 = arith.constant 0 : i32
    %c0_i32_1 = arith.constant 0 : i32
    return %c0_i32, %c0_i32_0 : i32, i32
  }
  func.func @transform_16(%arg0: i32, %arg1: i32) -> (i32, i32, i32) {
    %c0_i32 = arith.constant 0 : i32
    %c0_i32_0 = arith.constant 0 : i32
    %c0_i32_1 = arith.constant 0 : i32
    return %arg0, %c0_i32, %c0_i32_0 : i32, i32, i32
  }
}

module attributes {stable_mosaic.version = 11 : i64} {
  func.func @_enc_stack_kernel(%arg0: i32, %arg1: i32, %arg2: memref<3x16x32xf32, #tpu.memory_space<vmem>>, %arg3: memref<3x1x16xf32, #tpu.memory_space<vmem>>, %arg4: memref<1x1x32xf32, #tpu.memory_space<vmem>>, %arg5: memref<1x1x32xf32, #tpu.memory_space<vmem>>, %arg6: memref<1x32x96xbf16, #tpu.memory_space<vmem>>, %arg7: memref<1x1x96xf32, #tpu.memory_space<vmem>>, %arg8: memref<1x32x32xbf16, #tpu.memory_space<vmem>>, %arg9: memref<1x1x32xf32, #tpu.memory_space<vmem>>, %arg10: memref<1x1x32xf32, #tpu.memory_space<vmem>>, %arg11: memref<1x1x32xf32, #tpu.memory_space<vmem>>, %arg12: memref<1x32x64xbf16, #tpu.memory_space<vmem>>, %arg13: memref<1x1x64xf32, #tpu.memory_space<vmem>>, %arg14: memref<1x64x32xbf16, #tpu.memory_space<vmem>>, %arg15: memref<1x1x32xf32, #tpu.memory_space<vmem>>, %arg16: memref<1x32xf32, #tpu.memory_space<vmem>>, %arg17: memref<1x32xf32, #tpu.memory_space<vmem>>, %arg18: memref<3x16x32xf32, #tpu.memory_space<vmem>>, %arg19: memref<48x32xf32, #tpu.memory_space<vmem>>) attributes {dimension_semantics = [#tpu.dimension_semantics<parallel>, #tpu.dimension_semantics<arbitrary>], iteration_bounds = array<i64: 2, 2>, scalar_prefetch = 0 : i64, scratch_operands = 1 : i64, tpu.core_type = #tpu.core_type<tc>, window_params = [{transform_indices = @transform_0, window_bounds = array<i64: 3, 16, 32>}, {transform_indices = @transform_1, window_bounds = array<i64: 3, 1, 16>}, {transform_indices = @transform_2, window_bounds = array<i64: 1, 1, 32>}, {transform_indices = @transform_3, window_bounds = array<i64: 1, 1, 32>}, {transform_indices = @transform_4, window_bounds = array<i64: 1, 32, 96>}, {transform_indices = @transform_5, window_bounds = array<i64: 1, 1, 96>}, {transform_indices = @transform_6, window_bounds = array<i64: 1, 32, 32>}, {transform_indices = @transform_7, window_bounds = array<i64: 1, 1, 32>}, {transform_indices = @transform_8, window_bounds = array<i64: 1, 1, 32>}, {transform_indices = @transform_9, window_bounds = array<i64: 1, 1, 32>}, {transform_indices = @transform_10, window_bounds = array<i64: 1, 32, 64>}, {transform_indices = @transform_11, window_bounds = array<i64: 1, 1, 64>}, {transform_indices = @transform_12, window_bounds = array<i64: 1, 64, 32>}, {transform_indices = @transform_13, window_bounds = array<i64: 1, 1, 32>}, {pipeline_mode = #tpu.pipeline_mode<synchronous>, transform_indices = @transform_14, window_bounds = array<i64: 1, 32>}, {pipeline_mode = #tpu.pipeline_mode<synchronous>, transform_indices = @transform_15, window_bounds = array<i64: 1, 32>}, {transform_indices = @transform_16, window_bounds = array<i64: 3, 16, 32>}]} {
    %c0_i32 = arith.constant 0 : i32
    %0 = arith.cmpi eq, %arg1, %c0_i32 : i32
    %1 = arith.extui %0 : i1 to i32
    %c0_i32_0 = arith.constant 0 : i32
    %2 = arith.cmpi ne, %1, %c0_i32_0 : i32
    scf.if %2 {
      %c0_78 = arith.constant 0 : index
      %c0_79 = arith.constant 0 : index
      %c0_80 = arith.constant 0 : index
      %237 = vector.load %arg2[%c0_78, %c0_79, %c0_80] : memref<3x16x32xf32, #tpu.memory_space<vmem>>, vector<3x16x32xf32>
      %238 = vector.shape_cast %237 : vector<3x16x32xf32> to vector<48x32xf32>
      %c0_81 = arith.constant 0 : index
      %c0_82 = arith.constant 0 : index
      %239 = vector.load %arg19[%c0_81, %c0_82] : memref<48x32xf32, #tpu.memory_space<vmem>>, vector<48x32xf32>
      tpu.vector_store %arg19[%c0_81, %c0_82], %238 {strides = array<i32>} : memref<48x32xf32, #tpu.memory_space<vmem>>, vector<48x32xf32>,
    } else {
    }
    %c0 = arith.constant 0 : index
    %c0_1 = arith.constant 0 : index
    %3 = vector.load %arg19[%c0, %c0_1] : memref<48x32xf32, #tpu.memory_space<vmem>>, vector<48x32xf32>
    %c0_i32_2 = arith.constant 0 : i32
    %4 = arith.cmpi eq, %arg1, %c0_i32_2 : i32
    %c0_3 = arith.constant 0 : index
    %c0_4 = arith.constant 0 : index
    %c0_5 = arith.constant 0 : index
    %5 = vector.load %arg4[%c0_3, %c0_4, %c0_5] : memref<1x1x32xf32, #tpu.memory_space<vmem>>, vector<1x1x32xf32>
    %6 = vector.shape_cast %5 : vector<1x1x32xf32> to vector<1x32xf32>
    %c0_6 = arith.constant 0 : index
    %c0_7 = arith.constant 0 : index
    %c0_8 = arith.constant 0 : index
    %7 = vector.load %arg5[%c0_6, %c0_7, %c0_8] : memref<1x1x32xf32, #tpu.memory_space<vmem>>, vector<1x1x32xf32>
    %8 = vector.shape_cast %7 : vector<1x1x32xf32> to vector<1x32xf32>
    %cst = arith.constant dense<0.000000e+00> : vector<48xf32>
    %9 = vector.multi_reduction <add>, %3, %cst [1] : vector<48x32xf32> to vector<48xf32>
    %10 = vector.shape_cast %9 : vector<48xf32> to vector<48x1xf32>
    %cst_9 = arith.constant 3.200000e+01 : f32
    %11 = vector.broadcast %cst_9 : f32 to vector<48x1xf32>
    %12 = arith.divf %10, %11 : vector<48x1xf32>
    %13 = vector.broadcast %12 : vector<48x1xf32> to vector<48x32xf32>
    %14 = arith.subf %3, %13 : vector<48x32xf32>
    %15 = arith.mulf %14, %14 : vector<48x32xf32>
    %cst_10 = arith.constant dense<0.000000e+00> : vector<48xf32>
    %16 = vector.multi_reduction <add>, %15, %cst_10 [1] : vector<48x32xf32> to vector<48xf32>
    %17 = vector.shape_cast %16 : vector<48xf32> to vector<48x1xf32>
    %cst_11 = arith.constant 3.200000e+01 : f32
    %18 = vector.broadcast %cst_11 : f32 to vector<48x1xf32>
    %19 = arith.divf %17, %18 : vector<48x1xf32>
    %20 = vector.broadcast %12 : vector<48x1xf32> to vector<48x32xf32>
    %21 = arith.subf %3, %20 : vector<48x32xf32>
    %cst_12 = arith.constant 9.99999997E-7 : f32
    %22 = vector.broadcast %cst_12 : f32 to vector<48x1xf32>
    %23 = arith.addf %19, %22 : vector<48x1xf32>
    %24 = math.rsqrt %23 : vector<48x1xf32>
    %25 = vector.broadcast %24 : vector<48x1xf32> to vector<48x32xf32>
    %26 = arith.mulf %21, %25 : vector<48x32xf32>
    %27 = vector.broadcast %6 : vector<1x32xf32> to vector<48x32xf32>
    %28 = arith.mulf %26, %27 : vector<48x32xf32>
    %29 = vector.broadcast %8 : vector<1x32xf32> to vector<48x32xf32>
    %30 = arith.addf %28, %29 : vector<48x32xf32>
    %31 = arith.select %4, %3, %30 : vector<48x32xf32>
    %c0_13 = arith.constant 0 : index
    %c0_14 = arith.constant 0 : index
    %c0_15 = arith.constant 0 : index
    %32 = vector.load %arg6[%c0_13, %c0_14, %c0_15] : memref<1x32x96xbf16, #tpu.memory_space<vmem>>, vector<1x32x96xbf16>
    %33 = vector.shape_cast %32 : vector<1x32x96xbf16> to vector<32x96xbf16>
    %34 = arith.truncf %31 : vector<48x32xf32> to vector<48x32xbf16>
    %cst_16 = arith.constant dense<0.000000e+00> : vector<48x96xf32>
    %35 = tpu.matmul %34, %33, %cst_16 {dimension_numbers = #tpu.dot_dimension_numbers<[1], [0], [0], [1], [0, 0, 1, 1], [], []>} : vector<48x32xbf16>, vector<32x96xbf16>, vector<48x96xf32> -> vector<48x96xf32>
    %c0_17 = arith.constant 0 : index
    %c0_18 = arith.constant 0 : index
    %c0_19 = arith.constant 0 : index
    %36 = vector.load %arg7[%c0_17, %c0_18, %c0_19] : memref<1x1x96xf32, #tpu.memory_space<vmem>>, vector<1x1x96xf32>
    %37 = vector.shape_cast %36 : vector<1x1x96xf32> to vector<1x96xf32>
    %38 = vector.broadcast %37 : vector<1x96xf32> to vector<48x96xf32>
    %39 = arith.addf %35, %38 : vector<48x96xf32>
    %40 = vector.extract_strided_slice %39 {offsets = [0, 0], sizes = [16, 32], strides = [1, 1]} : vector<48x96xf32> to vector<16x32xf32>
    %41 = vector.extract_strided_slice %39 {offsets = [0, 32], sizes = [16, 32], strides = [1, 1]} : vector<48x96xf32> to vector<16x32xf32>
    %42 = vector.extract_strided_slice %39 {offsets = [0, 64], sizes = [16, 32], strides = [1, 1]} : vector<48x96xf32> to vector<16x32xf32>
    %c0_20 = arith.constant 0 : index
    %c0_21 = arith.constant 0 : index
    %c0_22 = arith.constant 0 : index
    %43 = vector.load %arg3[%c0_20, %c0_21, %c0_22] : memref<3x1x16xf32, #tpu.memory_space<vmem>>, vector<1x1x16xf32>
    %44 = vector.shape_cast %43 : vector<1x1x16xf32> to vector<1x16xf32>
    %45 = vector.extract_strided_slice %40 {offsets = [0, 0], sizes = [16, 16], strides = [1, 1]} : vector<16x32xf32> to vector<16x16xf32>
    %46 = vector.extract_strided_slice %40 {offsets = [0, 16], sizes = [16, 16], strides = [1, 1]} : vector<16x32xf32> to vector<16x16xf32>
    %47 = vector.shape_cast %45 : vector<16x16xf32> to vector<1x16x16xf32>
    %48 = vector.shape_cast %46 : vector<16x16xf32> to vector<1x16x16xf32>
    %49 = tpu.concatenate %47, %48 in 0 : vector<1x16x16xf32>, vector<1x16x16xf32> -> vector<2x16x16xf32>
    %50 = arith.truncf %49 : vector<2x16x16xf32> to vector<2x16x16xbf16>
    %51 = vector.extract_strided_slice %41 {offsets = [0, 0], sizes = [16, 16], strides = [1, 1]} : vector<16x32xf32> to vector<16x16xf32>
    %52 = vector.extract_strided_slice %41 {offsets = [0, 16], sizes = [16, 16], strides = [1, 1]} : vector<16x32xf32> to vector<16x16xf32>
    %53 = vector.shape_cast %51 : vector<16x16xf32> to vector<1x16x16xf32>
    %54 = vector.shape_cast %52 : vector<16x16xf32> to vector<1x16x16xf32>
    %55 = tpu.concatenate %53, %54 in 0 : vector<1x16x16xf32>, vector<1x16x16xf32> -> vector<2x16x16xf32>
    %56 = arith.truncf %55 : vector<2x16x16xf32> to vector<2x16x16xbf16>
    %57 = vector.extract_strided_slice %42 {offsets = [0, 0], sizes = [16, 16], strides = [1, 1]} : vector<16x32xf32> to vector<16x16xf32>
    %58 = vector.extract_strided_slice %42 {offsets = [0, 16], sizes = [16, 16], strides = [1, 1]} : vector<16x32xf32> to vector<16x16xf32>
    %59 = vector.shape_cast %57 : vector<16x16xf32> to vector<1x16x16xf32>
    %60 = vector.shape_cast %58 : vector<16x16xf32> to vector<1x16x16xf32>
    %61 = tpu.concatenate %59, %60 in 0 : vector<1x16x16xf32>, vector<1x16x16xf32> -> vector<2x16x16xf32>
    %62 = arith.truncf %61 : vector<2x16x16xf32> to vector<2x16x16xbf16>
    %cst_23 = arith.constant dense<0.000000e+00> : vector<2x16x16xf32>
    %63 = tpu.matmul %50, %56, %cst_23 {dimension_numbers = #tpu.dot_dimension_numbers<[2], [2], [1], [1], [0, 0, 0, 1, 1, 1], [0], [0]>} : vector<2x16x16xbf16>, vector<2x16x16xbf16>, vector<2x16x16xf32> -> vector<2x16x16xf32>
    %cst_24 = arith.constant 2.500000e-01 : f32
    %64 = vector.broadcast %cst_24 : f32 to vector<2x16x16xf32>
    %65 = arith.mulf %63, %64 : vector<2x16x16xf32>
    %66 = vector.shape_cast %44 : vector<1x16xf32> to vector<1x1x16xf32>
    %67 = vector.broadcast %66 : vector<1x1x16xf32> to vector<2x16x16xf32>
    %68 = arith.addf %65, %67 : vector<2x16x16xf32>
    %cst_25 = arith.constant dense<0xFF800000> : vector<2x16xf32>
    %69 = vector.multi_reduction <maximumf>, %68, %cst_25 [2] : vector<2x16x16xf32> to vector<2x16xf32>
    %70 = vector.shape_cast %69 : vector<2x16xf32> to vector<2x16x1xf32>
    %71 = vector.broadcast %70 : vector<2x16x1xf32> to vector<2x16x16xf32>
    %72 = arith.subf %68, %71 : vector<2x16x16xf32>
    %73 = math.exp %72 : vector<2x16x16xf32>
    %cst_26 = arith.constant dense<0.000000e+00> : vector<2x16xf32>
    %74 = vector.multi_reduction <add>, %73, %cst_26 [2] : vector<2x16x16xf32> to vector<2x16xf32>
    %75 = vector.shape_cast %74 : vector<2x16xf32> to vector<2x16x1xf32>
    %76 = tpu.reciprocal %75 {approx = true} : vector<2x16x1xf32> -> vector<2x16x1xf32>
    %77 = vector.broadcast %76 : vector<2x16x1xf32> to vector<2x16x16xf32>
    %78 = arith.mulf %73, %77 : vector<2x16x16xf32>
    %79 = arith.truncf %78 : vector<2x16x16xf32> to vector<2x16x16xbf16>
    %cst_27 = arith.constant dense<0.000000e+00> : vector<2x16x16xf32>
    %80 = tpu.matmul %79, %62, %cst_27 {dimension_numbers = #tpu.dot_dimension_numbers<[2], [1], [1], [2], [0, 0, 0, 1, 1, 2], [0], [0]>} : vector<2x16x16xbf16>, vector<2x16x16xbf16>, vector<2x16x16xf32> -> vector<2x16x16xf32>
    %81 = vector.extract_strided_slice %80 {offsets = [0, 0, 0], sizes = [1, 16, 16], strides = [1, 1, 1]} : vector<2x16x16xf32> to vector<1x16x16xf32>
    %82 = vector.shape_cast %81 : vector<1x16x16xf32> to vector<16x16xf32>
    %83 = vector.extract_strided_slice %80 {offsets = [1, 0, 0], sizes = [1, 16, 16], strides = [1, 1, 1]} : vector<2x16x16xf32> to vector<1x16x16xf32>
    %84 = vector.shape_cast %83 : vector<1x16x16xf32> to vector<16x16xf32>
    %85 = tpu.concatenate %82, %84 in 1 : vector<16x16xf32>, vector<16x16xf32> -> vector<16x32xf32>
    %86 = vector.extract_strided_slice %39 {offsets = [16, 0], sizes = [16, 32], strides = [1, 1]} : vector<48x96xf32> to vector<16x32xf32>
    %87 = vector.extract_strided_slice %39 {offsets = [16, 32], sizes = [16, 32], strides = [1, 1]} : vector<48x96xf32> to vector<16x32xf32>
    %88 = vector.extract_strided_slice %39 {offsets = [16, 64], sizes = [16, 32], strides = [1, 1]} : vector<48x96xf32> to vector<16x32xf32>
    %c1 = arith.constant 1 : index
    %c0_28 = arith.constant 0 : index
    %c0_29 = arith.constant 0 : index
    %89 = vector.load %arg3[%c1, %c0_28, %c0_29] : memref<3x1x16xf32, #tpu.memory_space<vmem>>, vector<1x1x16xf32>
    %90 = vector.shape_cast %89 : vector<1x1x16xf32> to vector<1x16xf32>
    %91 = vector.extract_strided_slice %86 {offsets = [0, 0], sizes = [16, 16], strides = [1, 1]} : vector<16x32xf32> to vector<16x16xf32>
    %92 = vector.extract_strided_slice %86 {offsets = [0, 16], sizes = [16, 16], strides = [1, 1]} : vector<16x32xf32> to vector<16x16xf32>
    %93 = vector.shape_cast %91 : vector<16x16xf32> to vector<1x16x16xf32>
    %94 = vector.shape_cast %92 : vector<16x16xf32> to vector<1x16x16xf32>
    %95 = tpu.concatenate %93, %94 in 0 : vector<1x16x16xf32>, vector<1x16x16xf32> -> vector<2x16x16xf32>
    %96 = arith.truncf %95 : vector<2x16x16xf32> to vector<2x16x16xbf16>
    %97 = vector.extract_strided_slice %87 {offsets = [0, 0], sizes = [16, 16], strides = [1, 1]} : vector<16x32xf32> to vector<16x16xf32>
    %98 = vector.extract_strided_slice %87 {offsets = [0, 16], sizes = [16, 16], strides = [1, 1]} : vector<16x32xf32> to vector<16x16xf32>
    %99 = vector.shape_cast %97 : vector<16x16xf32> to vector<1x16x16xf32>
    %100 = vector.shape_cast %98 : vector<16x16xf32> to vector<1x16x16xf32>
    %101 = tpu.concatenate %99, %100 in 0 : vector<1x16x16xf32>, vector<1x16x16xf32> -> vector<2x16x16xf32>
    %102 = arith.truncf %101 : vector<2x16x16xf32> to vector<2x16x16xbf16>
    %103 = vector.extract_strided_slice %88 {offsets = [0, 0], sizes = [16, 16], strides = [1, 1]} : vector<16x32xf32> to vector<16x16xf32>
    %104 = vector.extract_strided_slice %88 {offsets = [0, 16], sizes = [16, 16], strides = [1, 1]} : vector<16x32xf32> to vector<16x16xf32>
    %105 = vector.shape_cast %103 : vector<16x16xf32> to vector<1x16x16xf32>
    %106 = vector.shape_cast %104 : vector<16x16xf32> to vector<1x16x16xf32>
    %107 = tpu.concatenate %105, %106 in 0 : vector<1x16x16xf32>, vector<1x16x16xf32> -> vector<2x16x16xf32>
    %108 = arith.truncf %107 : vector<2x16x16xf32> to vector<2x16x16xbf16>
    %cst_30 = arith.constant dense<0.000000e+00> : vector<2x16x16xf32>
    %109 = tpu.matmul %96, %102, %cst_30 {dimension_numbers = #tpu.dot_dimension_numbers<[2], [2], [1], [1], [0, 0, 0, 1, 1, 1], [0], [0]>} : vector<2x16x16xbf16>, vector<2x16x16xbf16>, vector<2x16x16xf32> -> vector<2x16x16xf32>
    %cst_31 = arith.constant 2.500000e-01 : f32
    %110 = vector.broadcast %cst_31 : f32 to vector<2x16x16xf32>
    %111 = arith.mulf %109, %110 : vector<2x16x16xf32>
    %112 = vector.shape_cast %90 : vector<1x16xf32> to vector<1x1x16xf32>
    %113 = vector.broadcast %112 : vector<1x1x16xf32> to vector<2x16x16xf32>
    %114 = arith.addf %111, %113 : vector<2x16x16xf32>
    %cst_32 = arith.constant dense<0xFF800000> : vector<2x16xf32>
    %115 = vector.multi_reduction <maximumf>, %114, %cst_32 [2] : vector<2x16x16xf32> to vector<2x16xf32>
    %116 = vector.shape_cast %115 : vector<2x16xf32> to vector<2x16x1xf32>
    %117 = vector.broadcast %116 : vector<2x16x1xf32> to vector<2x16x16xf32>
    %118 = arith.subf %114, %117 : vector<2x16x16xf32>
    %119 = math.exp %118 : vector<2x16x16xf32>
    %cst_33 = arith.constant dense<0.000000e+00> : vector<2x16xf32>
    %120 = vector.multi_reduction <add>, %119, %cst_33 [2] : vector<2x16x16xf32> to vector<2x16xf32>
    %121 = vector.shape_cast %120 : vector<2x16xf32> to vector<2x16x1xf32>
    %122 = tpu.reciprocal %121 {approx = true} : vector<2x16x1xf32> -> vector<2x16x1xf32>
    %123 = vector.broadcast %122 : vector<2x16x1xf32> to vector<2x16x16xf32>
    %124 = arith.mulf %119, %123 : vector<2x16x16xf32>
    %125 = arith.truncf %124 : vector<2x16x16xf32> to vector<2x16x16xbf16>
    %cst_34 = arith.constant dense<0.000000e+00> : vector<2x16x16xf32>
    %126 = tpu.matmul %125, %108, %cst_34 {dimension_numbers = #tpu.dot_dimension_numbers<[2], [1], [1], [2], [0, 0, 0, 1, 1, 2], [0], [0]>} : vector<2x16x16xbf16>, vector<2x16x16xbf16>, vector<2x16x16xf32> -> vector<2x16x16xf32>
    %127 = vector.extract_strided_slice %126 {offsets = [0, 0, 0], sizes = [1, 16, 16], strides = [1, 1, 1]} : vector<2x16x16xf32> to vector<1x16x16xf32>
    %128 = vector.shape_cast %127 : vector<1x16x16xf32> to vector<16x16xf32>
    %129 = vector.extract_strided_slice %126 {offsets = [1, 0, 0], sizes = [1, 16, 16], strides = [1, 1, 1]} : vector<2x16x16xf32> to vector<1x16x16xf32>
    %130 = vector.shape_cast %129 : vector<1x16x16xf32> to vector<16x16xf32>
    %131 = tpu.concatenate %128, %130 in 1 : vector<16x16xf32>, vector<16x16xf32> -> vector<16x32xf32>
    %132 = vector.extract_strided_slice %39 {offsets = [32, 0], sizes = [16, 32], strides = [1, 1]} : vector<48x96xf32> to vector<16x32xf32>
    %133 = vector.extract_strided_slice %39 {offsets = [32, 32], sizes = [16, 32], strides = [1, 1]} : vector<48x96xf32> to vector<16x32xf32>
    %134 = vector.extract_strided_slice %39 {offsets = [32, 64], sizes = [16, 32], strides = [1, 1]} : vector<48x96xf32> to vector<16x32xf32>
    %c2 = arith.constant 2 : index
    %c0_35 = arith.constant 0 : index
    %c0_36 = arith.constant 0 : index
    %135 = vector.load %arg3[%c2, %c0_35, %c0_36] : memref<3x1x16xf32, #tpu.memory_space<vmem>>, vector<1x1x16xf32>
    %136 = vector.shape_cast %135 : vector<1x1x16xf32> to vector<1x16xf32>
    %137 = vector.extract_strided_slice %132 {offsets = [0, 0], sizes = [16, 16], strides = [1, 1]} : vector<16x32xf32> to vector<16x16xf32>
    %138 = vector.extract_strided_slice %132 {offsets = [0, 16], sizes = [16, 16], strides = [1, 1]} : vector<16x32xf32> to vector<16x16xf32>
    %139 = vector.shape_cast %137 : vector<16x16xf32> to vector<1x16x16xf32>
    %140 = vector.shape_cast %138 : vector<16x16xf32> to vector<1x16x16xf32>
    %141 = tpu.concatenate %139, %140 in 0 : vector<1x16x16xf32>, vector<1x16x16xf32> -> vector<2x16x16xf32>
    %142 = arith.truncf %141 : vector<2x16x16xf32> to vector<2x16x16xbf16>
    %143 = vector.extract_strided_slice %133 {offsets = [0, 0], sizes = [16, 16], strides = [1, 1]} : vector<16x32xf32> to vector<16x16xf32>
    %144 = vector.extract_strided_slice %133 {offsets = [0, 16], sizes = [16, 16], strides = [1, 1]} : vector<16x32xf32> to vector<16x16xf32>
    %145 = vector.shape_cast %143 : vector<16x16xf32> to vector<1x16x16xf32>
    %146 = vector.shape_cast %144 : vector<16x16xf32> to vector<1x16x16xf32>
    %147 = tpu.concatenate %145, %146 in 0 : vector<1x16x16xf32>, vector<1x16x16xf32> -> vector<2x16x16xf32>
    %148 = arith.truncf %147 : vector<2x16x16xf32> to vector<2x16x16xbf16>
    %149 = vector.extract_strided_slice %134 {offsets = [0, 0], sizes = [16, 16], strides = [1, 1]} : vector<16x32xf32> to vector<16x16xf32>
    %150 = vector.extract_strided_slice %134 {offsets = [0, 16], sizes = [16, 16], strides = [1, 1]} : vector<16x32xf32> to vector<16x16xf32>
    %151 = vector.shape_cast %149 : vector<16x16xf32> to vector<1x16x16xf32>
    %152 = vector.shape_cast %150 : vector<16x16xf32> to vector<1x16x16xf32>
    %153 = tpu.concatenate %151, %152 in 0 : vector<1x16x16xf32>, vector<1x16x16xf32> -> vector<2x16x16xf32>
    %154 = arith.truncf %153 : vector<2x16x16xf32> to vector<2x16x16xbf16>
    %cst_37 = arith.constant dense<0.000000e+00> : vector<2x16x16xf32>
    %155 = tpu.matmul %142, %148, %cst_37 {dimension_numbers = #tpu.dot_dimension_numbers<[2], [2], [1], [1], [0, 0, 0, 1, 1, 1], [0], [0]>} : vector<2x16x16xbf16>, vector<2x16x16xbf16>, vector<2x16x16xf32> -> vector<2x16x16xf32>
    %cst_38 = arith.constant 2.500000e-01 : f32
    %156 = vector.broadcast %cst_38 : f32 to vector<2x16x16xf32>
    %157 = arith.mulf %155, %156 : vector<2x16x16xf32>
    %158 = vector.shape_cast %136 : vector<1x16xf32> to vector<1x1x16xf32>
    %159 = vector.broadcast %158 : vector<1x1x16xf32> to vector<2x16x16xf32>
    %160 = arith.addf %157, %159 : vector<2x16x16xf32>
    %cst_39 = arith.constant dense<0xFF800000> : vector<2x16xf32>
    %161 = vector.multi_reduction <maximumf>, %160, %cst_39 [2] : vector<2x16x16xf32> to vector<2x16xf32>
    %162 = vector.shape_cast %161 : vector<2x16xf32> to vector<2x16x1xf32>
    %163 = vector.broadcast %162 : vector<2x16x1xf32> to vector<2x16x16xf32>
    %164 = arith.subf %160, %163 : vector<2x16x16xf32>
    %165 = math.exp %164 : vector<2x16x16xf32>
    %cst_40 = arith.constant dense<0.000000e+00> : vector<2x16xf32>
    %166 = vector.multi_reduction <add>, %165, %cst_40 [2] : vector<2x16x16xf32> to vector<2x16xf32>
    %167 = vector.shape_cast %166 : vector<2x16xf32> to vector<2x16x1xf32>
    %168 = tpu.reciprocal %167 {approx = true} : vector<2x16x1xf32> -> vector<2x16x1xf32>
    %169 = vector.broadcast %168 : vector<2x16x1xf32> to vector<2x16x16xf32>
    %170 = arith.mulf %165, %169 : vector<2x16x16xf32>
    %171 = arith.truncf %170 : vector<2x16x16xf32> to vector<2x16x16xbf16>
    %cst_41 = arith.constant dense<0.000000e+00> : vector<2x16x16xf32>
    %172 = tpu.matmul %171, %154, %cst_41 {dimension_numbers = #tpu.dot_dimension_numbers<[2], [1], [1], [2], [0, 0, 0, 1, 1, 2], [0], [0]>} : vector<2x16x16xbf16>, vector<2x16x16xbf16>, vector<2x16x16xf32> -> vector<2x16x16xf32>
    %173 = vector.extract_strided_slice %172 {offsets = [0, 0, 0], sizes = [1, 16, 16], strides = [1, 1, 1]} : vector<2x16x16xf32> to vector<1x16x16xf32>
    %174 = vector.shape_cast %173 : vector<1x16x16xf32> to vector<16x16xf32>
    %175 = vector.extract_strided_slice %172 {offsets = [1, 0, 0], sizes = [1, 16, 16], strides = [1, 1, 1]} : vector<2x16x16xf32> to vector<1x16x16xf32>
    %176 = vector.shape_cast %175 : vector<1x16x16xf32> to vector<16x16xf32>
    %177 = tpu.concatenate %174, %176 in 1 : vector<16x16xf32>, vector<16x16xf32> -> vector<16x32xf32>
    %178 = tpu.concatenate %85, %131, %177 in 0 : vector<16x32xf32>, vector<16x32xf32>, vector<16x32xf32> -> vector<48x32xf32>
    %c0_42 = arith.constant 0 : index
    %c0_43 = arith.constant 0 : index
    %c0_44 = arith.constant 0 : index
    %179 = vector.load %arg8[%c0_42, %c0_43, %c0_44] : memref<1x32x32xbf16, #tpu.memory_space<vmem>>, vector<1x32x32xbf16>
    %180 = vector.shape_cast %179 : vector<1x32x32xbf16> to vector<32x32xbf16>
    %181 = arith.truncf %178 : vector<48x32xf32> to vector<48x32xbf16>
    %cst_45 = arith.constant dense<0.000000e+00> : vector<48x32xf32>
    %182 = tpu.matmul %181, %180, %cst_45 {dimension_numbers = #tpu.dot_dimension_numbers<[1], [0], [0], [1], [0, 0, 1, 1], [], []>} : vector<48x32xbf16>, vector<32x32xbf16>, vector<48x32xf32> -> vector<48x32xf32>
    %c0_46 = arith.constant 0 : index
    %c0_47 = arith.constant 0 : index
    %c0_48 = arith.constant 0 : index
    %183 = vector.load %arg9[%c0_46, %c0_47, %c0_48] : memref<1x1x32xf32, #tpu.memory_space<vmem>>, vector<1x1x32xf32>
    %184 = vector.shape_cast %183 : vector<1x1x32xf32> to vector<1x32xf32>
    %185 = vector.broadcast %184 : vector<1x32xf32> to vector<48x32xf32>
    %186 = arith.addf %182, %185 : vector<48x32xf32>
    %187 = arith.addf %186, %3 : vector<48x32xf32>
    %c0_49 = arith.constant 0 : index
    %c0_50 = arith.constant 0 : index
    %c0_51 = arith.constant 0 : index
    %188 = vector.load %arg10[%c0_49, %c0_50, %c0_51] : memref<1x1x32xf32, #tpu.memory_space<vmem>>, vector<1x1x32xf32>
    %189 = vector.shape_cast %188 : vector<1x1x32xf32> to vector<1x32xf32>
    %c0_52 = arith.constant 0 : index
    %c0_53 = arith.constant 0 : index
    %c0_54 = arith.constant 0 : index
    %190 = vector.load %arg11[%c0_52, %c0_53, %c0_54] : memref<1x1x32xf32, #tpu.memory_space<vmem>>, vector<1x1x32xf32>
    %191 = vector.shape_cast %190 : vector<1x1x32xf32> to vector<1x32xf32>
    %cst_55 = arith.constant dense<0.000000e+00> : vector<48xf32>
    %192 = vector.multi_reduction <add>, %187, %cst_55 [1] : vector<48x32xf32> to vector<48xf32>
    %193 = vector.shape_cast %192 : vector<48xf32> to vector<48x1xf32>
    %cst_56 = arith.constant 3.200000e+01 : f32
    %194 = vector.broadcast %cst_56 : f32 to vector<48x1xf32>
    %195 = arith.divf %193, %194 : vector<48x1xf32>
    %196 = vector.broadcast %195 : vector<48x1xf32> to vector<48x32xf32>
    %197 = arith.subf %187, %196 : vector<48x32xf32>
    %198 = arith.mulf %197, %197 : vector<48x32xf32>
    %cst_57 = arith.constant dense<0.000000e+00> : vector<48xf32>
    %199 = vector.multi_reduction <add>, %198, %cst_57 [1] : vector<48x32xf32> to vector<48xf32>
    %200 = vector.shape_cast %199 : vector<48xf32> to vector<48x1xf32>
    %cst_58 = arith.constant 3.200000e+01 : f32
    %201 = vector.broadcast %cst_58 : f32 to vector<48x1xf32>
    %202 = arith.divf %200, %201 : vector<48x1xf32>
    %203 = vector.broadcast %195 : vector<48x1xf32> to vector<48x32xf32>
    %204 = arith.subf %187, %203 : vector<48x32xf32>
    %cst_59 = arith.constant 9.99999997E-7 : f32
    %205 = vector.broadcast %cst_59 : f32 to vector<48x1xf32>
    %206 = arith.addf %202, %205 : vector<48x1xf32>
    %207 = math.rsqrt %206 : vector<48x1xf32>
    %208 = vector.broadcast %207 : vector<48x1xf32> to vector<48x32xf32>
    %209 = arith.mulf %204, %208 : vector<48x32xf32>
    %210 = vector.broadcast %189 : vector<1x32xf32> to vector<48x32xf32>
    %211 = arith.mulf %209, %210 : vector<48x32xf32>
    %212 = vector.broadcast %191 : vector<1x32xf32> to vector<48x32xf32>
    %213 = arith.addf %211, %212 : vector<48x32xf32>
    %c0_60 = arith.constant 0 : index
    %c0_61 = arith.constant 0 : index
    %c0_62 = arith.constant 0 : index
    %214 = vector.load %arg12[%c0_60, %c0_61, %c0_62] : memref<1x32x64xbf16, #tpu.memory_space<vmem>>, vector<1x32x64xbf16>
    %215 = vector.shape_cast %214 : vector<1x32x64xbf16> to vector<32x64xbf16>
    %216 = arith.truncf %213 : vector<48x32xf32> to vector<48x32xbf16>
    %cst_63 = arith.constant dense<0.000000e+00> : vector<48x64xf32>
    %217 = tpu.matmul %216, %215, %cst_63 {dimension_numbers = #tpu.dot_dimension_numbers<[1], [0], [0], [1], [0, 0, 1, 1], [], []>} : vector<48x32xbf16>, vector<32x64xbf16>, vector<48x64xf32> -> vector<48x64xf32>
    %c0_64 = arith.constant 0 : index
    %c0_65 = arith.constant 0 : index
    %c0_66 = arith.constant 0 : index
    %218 = vector.load %arg13[%c0_64, %c0_65, %c0_66] : memref<1x1x64xf32, #tpu.memory_space<vmem>>, vector<1x1x64xf32>
    %219 = vector.shape_cast %218 : vector<1x1x64xf32> to vector<1x64xf32>
    %220 = vector.broadcast %219 : vector<1x64xf32> to vector<48x64xf32>
    %221 = arith.addf %217, %220 : vector<48x64xf32>
    %cst_67 = arith.constant 0.000000e+00 : f32
    %222 = vector.broadcast %cst_67 : f32 to vector<48x64xf32>
    %223 = arith.maximumf %221, %222 : vector<48x64xf32>
    %c0_68 = arith.constant 0 : index
    %c0_69 = arith.constant 0 : index
    %c0_70 = arith.constant 0 : index
    %224 = vector.load %arg14[%c0_68, %c0_69, %c0_70] : memref<1x64x32xbf16, #tpu.memory_space<vmem>>, vector<1x64x32xbf16>
    %225 = vector.shape_cast %224 : vector<1x64x32xbf16> to vector<64x32xbf16>
    %226 = arith.truncf %223 : vector<48x64xf32> to vector<48x64xbf16>
    %cst_71 = arith.constant dense<0.000000e+00> : vector<48x32xf32>
    %227 = tpu.matmul %226, %225, %cst_71 {dimension_numbers = #tpu.dot_dimension_numbers<[1], [0], [0], [1], [0, 0, 1, 1], [], []>} : vector<48x64xbf16>, vector<64x32xbf16>, vector<48x32xf32> -> vector<48x32xf32>
    %c0_72 = arith.constant 0 : index
    %c0_73 = arith.constant 0 : index
    %c0_74 = arith.constant 0 : index
    %228 = vector.load %arg15[%c0_72, %c0_73, %c0_74] : memref<1x1x32xf32, #tpu.memory_space<vmem>>, vector<1x1x32xf32>
    %229 = vector.shape_cast %228 : vector<1x1x32xf32> to vector<1x32xf32>
    %230 = vector.broadcast %229 : vector<1x32xf32> to vector<48x32xf32>
    %231 = arith.addf %227, %230 : vector<48x32xf32>
    %232 = arith.addf %231, %187 : vector<48x32xf32>
    %c0_75 = arith.constant 0 : index
    %c0_76 = arith.constant 0 : index
    %233 = vector.load %arg19[%c0_75, %c0_76] : memref<48x32xf32, #tpu.memory_space<vmem>>, vector<48x32xf32>
    tpu.vector_store %arg19[%c0_75, %c0_76], %232 {strides = array<i32>} : memref<48x32xf32, #tpu.memory_space<vmem>>, vector<48x32xf32>,
    %c1_i32 = arith.constant 1 : i32
    %234 = arith.cmpi eq, %arg1, %c1_i32 : i32
    %235 = arith.extui %234 : i1 to i32
    %c0_i32_77 = arith.constant 0 : i32
    %236 = arith.cmpi ne, %235, %c0_i32_77 : i32
    scf.if %236 {
      %c0_78 = arith.constant 0 : index
      %c0_79 = arith.constant 0 : index
      %237 = vector.load %arg16[%c0_78, %c0_79] : memref<1x32xf32, #tpu.memory_space<vmem>>, vector<1x32xf32>
      %c0_80 = arith.constant 0 : index
      %c0_81 = arith.constant 0 : index
      %238 = vector.load %arg17[%c0_80, %c0_81] : memref<1x32xf32, #tpu.memory_space<vmem>>, vector<1x32xf32>
      %cst_82 = arith.constant dense<0.000000e+00> : vector<48xf32>
      %239 = vector.multi_reduction <add>, %232, %cst_82 [1] : vector<48x32xf32> to vector<48xf32>
      %240 = vector.shape_cast %239 : vector<48xf32> to vector<48x1xf32>
      %cst_83 = arith.constant 3.200000e+01 : f32
      %241 = vector.broadcast %cst_83 : f32 to vector<48x1xf32>
      %242 = arith.divf %240, %241 : vector<48x1xf32>
      %243 = vector.broadcast %242 : vector<48x1xf32> to vector<48x32xf32>
      %244 = arith.subf %232, %243 : vector<48x32xf32>
      %245 = arith.mulf %244, %244 : vector<48x32xf32>
      %cst_84 = arith.constant dense<0.000000e+00> : vector<48xf32>
      %246 = vector.multi_reduction <add>, %245, %cst_84 [1] : vector<48x32xf32> to vector<48xf32>
      %247 = vector.shape_cast %246 : vector<48xf32> to vector<48x1xf32>
      %cst_85 = arith.constant 3.200000e+01 : f32
      %248 = vector.broadcast %cst_85 : f32 to vector<48x1xf32>
      %249 = arith.divf %247, %248 : vector<48x1xf32>
      %250 = vector.broadcast %242 : vector<48x1xf32> to vector<48x32xf32>
      %251 = arith.subf %232, %250 : vector<48x32xf32>
      %cst_86 = arith.constant 9.99999997E-7 : f32
      %252 = vector.broadcast %cst_86 : f32 to vector<48x1xf32>
      %253 = arith.addf %249, %252 : vector<48x1xf32>
      %254 = math.rsqrt %253 : vector<48x1xf32>
      %255 = vector.broadcast %254 : vector<48x1xf32> to vector<48x32xf32>
      %256 = arith.mulf %251, %255 : vector<48x32xf32>
      %257 = vector.broadcast %237 : vector<1x32xf32> to vector<48x32xf32>
      %258 = arith.mulf %256, %257 : vector<48x32xf32>
      %259 = vector.broadcast %238 : vector<1x32xf32> to vector<48x32xf32>
      %260 = arith.addf %258, %259 : vector<48x32xf32>
      %261 = vector.shape_cast %260 : vector<48x32xf32> to vector<3x16x32xf32>
      %c0_87 = arith.constant 0 : index
      %c0_88 = arith.constant 0 : index
      %c0_89 = arith.constant 0 : index
      %262 = vector.load %arg18[%c0_87, %c0_88, %c0_89] : memref<3x16x32xf32, #tpu.memory_space<vmem>>, vector<3x16x32xf32>
      tpu.vector_store %arg18[%c0_87, %c0_88, %c0_89], %261 {strides = array<i32>} : memref<3x16x32xf32, #tpu.memory_space<vmem>>, vector<3x16x32xf32>,
    } else {
    }
    return
  }
  func.func @transform_0(%arg0: i32, %arg1: i32) -> (i32, i32, i32) {
    %c0_i32 = arith.constant 0 : i32
    %c0_i32_0 = arith.constant 0 : i32
    %c0_i32_1 = arith.constant 0 : i32
    return %arg0, %c0_i32, %c0_i32_0 : i32, i32, i32
  }
  func.func @transform_1(%arg0: i32, %arg1: i32) -> (i32, i32, i32) {
    %c0_i32 = arith.constant 0 : i32
    %c0_i32_0 = arith.constant 0 : i32
    %c0_i32_1 = arith.constant 0 : i32
    return %arg0, %c0_i32, %c0_i32_0 : i32, i32, i32
  }
  func.func @transform_2(%arg0: i32, %arg1: i32) -> (i32, i32, i32) {
    %c0_i32 = arith.constant 0 : i32
    %c0_i32_0 = arith.constant 0 : i32
    %c0_i32_1 = arith.constant 0 : i32
    return %arg1, %c0_i32, %c0_i32_0 : i32, i32, i32
  }
  func.func @transform_3(%arg0: i32, %arg1: i32) -> (i32, i32, i32) {
    %c0_i32 = arith.constant 0 : i32
    %c0_i32_0 = arith.constant 0 : i32
    %c0_i32_1 = arith.constant 0 : i32
    return %arg1, %c0_i32, %c0_i32_0 : i32, i32, i32
  }
  func.func @transform_4(%arg0: i32, %arg1: i32) -> (i32, i32, i32) {
    %c0_i32 = arith.constant 0 : i32
    %c0_i32_0 = arith.constant 0 : i32
    %c0_i32_1 = arith.constant 0 : i32
    return %arg1, %c0_i32, %c0_i32_0 : i32, i32, i32
  }
  func.func @transform_5(%arg0: i32, %arg1: i32) -> (i32, i32, i32) {
    %c0_i32 = arith.constant 0 : i32
    %c0_i32_0 = arith.constant 0 : i32
    %c0_i32_1 = arith.constant 0 : i32
    return %arg1, %c0_i32, %c0_i32_0 : i32, i32, i32
  }
  func.func @transform_6(%arg0: i32, %arg1: i32) -> (i32, i32, i32) {
    %c0_i32 = arith.constant 0 : i32
    %c0_i32_0 = arith.constant 0 : i32
    %c0_i32_1 = arith.constant 0 : i32
    return %arg1, %c0_i32, %c0_i32_0 : i32, i32, i32
  }
  func.func @transform_7(%arg0: i32, %arg1: i32) -> (i32, i32, i32) {
    %c0_i32 = arith.constant 0 : i32
    %c0_i32_0 = arith.constant 0 : i32
    %c0_i32_1 = arith.constant 0 : i32
    return %arg1, %c0_i32, %c0_i32_0 : i32, i32, i32
  }
  func.func @transform_8(%arg0: i32, %arg1: i32) -> (i32, i32, i32) {
    %c0_i32 = arith.constant 0 : i32
    %c0_i32_0 = arith.constant 0 : i32
    %c0_i32_1 = arith.constant 0 : i32
    return %arg1, %c0_i32, %c0_i32_0 : i32, i32, i32
  }
  func.func @transform_9(%arg0: i32, %arg1: i32) -> (i32, i32, i32) {
    %c0_i32 = arith.constant 0 : i32
    %c0_i32_0 = arith.constant 0 : i32
    %c0_i32_1 = arith.constant 0 : i32
    return %arg1, %c0_i32, %c0_i32_0 : i32, i32, i32
  }
  func.func @transform_10(%arg0: i32, %arg1: i32) -> (i32, i32, i32) {
    %c0_i32 = arith.constant 0 : i32
    %c0_i32_0 = arith.constant 0 : i32
    %c0_i32_1 = arith.constant 0 : i32
    return %arg1, %c0_i32, %c0_i32_0 : i32, i32, i32
  }
  func.func @transform_11(%arg0: i32, %arg1: i32) -> (i32, i32, i32) {
    %c0_i32 = arith.constant 0 : i32
    %c0_i32_0 = arith.constant 0 : i32
    %c0_i32_1 = arith.constant 0 : i32
    return %arg1, %c0_i32, %c0_i32_0 : i32, i32, i32
  }
  func.func @transform_12(%arg0: i32, %arg1: i32) -> (i32, i32, i32) {
    %c0_i32 = arith.constant 0 : i32
    %c0_i32_0 = arith.constant 0 : i32
    %c0_i32_1 = arith.constant 0 : i32
    return %arg1, %c0_i32, %c0_i32_0 : i32, i32, i32
  }
  func.func @transform_13(%arg0: i32, %arg1: i32) -> (i32, i32, i32) {
    %c0_i32 = arith.constant 0 : i32
    %c0_i32_0 = arith.constant 0 : i32
    %c0_i32_1 = arith.constant 0 : i32
    return %arg1, %c0_i32, %c0_i32_0 : i32, i32, i32
  }
  func.func @transform_14(%arg0: i32, %arg1: i32) -> (i32, i32) {
    %c0_i32 = arith.constant 0 : i32
    %c0_i32_0 = arith.constant 0 : i32
    %c0_i32_1 = arith.constant 0 : i32
    return %c0_i32, %c0_i32_0 : i32, i32
  }
  func.func @transform_15(%arg0: i32, %arg1: i32) -> (i32, i32) {
    %c0_i32 = arith.constant 0 : i32
    %c0_i32_0 = arith.constant 0 : i32
    %c0_i32_1 = arith.constant 0 : i32
    return %c0_i32, %c0_i32_0 : i32, i32
  }
  func.func @transform_16(%arg0: i32, %arg1: i32) -> (i32, i32, i32) {
    %c0_i32 = arith.constant 0 : i32
    %c0_i32_0 = arith.constant 0 : i32
    %c0_i32_1 = arith.constant 0 : i32
    return %arg0, %c0_i32, %c0_i32_0 : i32, i32, i32
  }
}

module attributes {stable_mosaic.version = 11 : i64} {
  func.func @_dec_stack_kernel(%arg0: i32, %arg1: i32, %arg2: memref<1x7x32xf32, #tpu.memory_space<vmem>>, %arg3: memref<1x4x32xf32, #tpu.memory_space<vmem>>, %arg4: memref<1x7x7xf32, #tpu.memory_space<vmem>>, %arg5: memref<1x1x4xf32, #tpu.memory_space<vmem>>, %arg6: memref<1x1x32xf32, #tpu.memory_space<vmem>>, %arg7: memref<1x1x32xf32, #tpu.memory_space<vmem>>, %arg8: memref<1x32x96xbf16, #tpu.memory_space<vmem>>, %arg9: memref<1x1x96xf32, #tpu.memory_space<vmem>>, %arg10: memref<1x32x32xbf16, #tpu.memory_space<vmem>>, %arg11: memref<1x1x32xf32, #tpu.memory_space<vmem>>, %arg12: memref<1x1x32xf32, #tpu.memory_space<vmem>>, %arg13: memref<1x1x32xf32, #tpu.memory_space<vmem>>, %arg14: memref<1x32x32xbf16, #tpu.memory_space<vmem>>, %arg15: memref<1x1x32xf32, #tpu.memory_space<vmem>>, %arg16: memref<1x32x64xbf16, #tpu.memory_space<vmem>>, %arg17: memref<1x1x64xf32, #tpu.memory_space<vmem>>, %arg18: memref<1x32x32xbf16, #tpu.memory_space<vmem>>, %arg19: memref<1x1x32xf32, #tpu.memory_space<vmem>>, %arg20: memref<1x1x32xf32, #tpu.memory_space<vmem>>, %arg21: memref<1x1x32xf32, #tpu.memory_space<vmem>>, %arg22: memref<1x32x64xbf16, #tpu.memory_space<vmem>>, %arg23: memref<1x1x64xf32, #tpu.memory_space<vmem>>, %arg24: memref<1x64x32xbf16, #tpu.memory_space<vmem>>, %arg25: memref<1x1x32xf32, #tpu.memory_space<vmem>>, %arg26: memref<1x32xf32, #tpu.memory_space<vmem>>, %arg27: memref<1x32xf32, #tpu.memory_space<vmem>>, %arg28: memref<1x7x32xf32, #tpu.memory_space<vmem>>, %arg29: memref<7x32xf32, #tpu.memory_space<vmem>>) attributes {dimension_semantics = [#tpu.dimension_semantics<parallel>, #tpu.dimension_semantics<arbitrary>], iteration_bounds = array<i64: 2, 2>, scalar_prefetch = 0 : i64, scratch_operands = 1 : i64, tpu.core_type = #tpu.core_type<tc>, window_params = [{transform_indices = @transform_0, window_bounds = array<i64: 1, 7, 32>}, {transform_indices = @transform_1, window_bounds = array<i64: 1, 4, 32>}, {transform_indices = @transform_2, window_bounds = array<i64: 1, 7, 7>}, {transform_indices = @transform_3, window_bounds = array<i64: 1, 1, 4>}, {transform_indices = @transform_4, window_bounds = array<i64: 1, 1, 32>}, {transform_indices = @transform_5, window_bounds = array<i64: 1, 1, 32>}, {transform_indices = @transform_6, window_bounds = array<i64: 1, 32, 96>}, {transform_indices = @transform_7, window_bounds = array<i64: 1, 1, 96>}, {transform_indices = @transform_8, window_bounds = array<i64: 1, 32, 32>}, {transform_indices = @transform_9, window_bounds = array<i64: 1, 1, 32>}, {transform_indices = @transform_10, window_bounds = array<i64: 1, 1, 32>}, {transform_indices = @transform_11, window_bounds = array<i64: 1, 1, 32>}, {transform_indices = @transform_12, window_bounds = array<i64: 1, 32, 32>}, {transform_indices = @transform_13, window_bounds = array<i64: 1, 1, 32>}, {transform_indices = @transform_14, window_bounds = array<i64: 1, 32, 64>}, {transform_indices = @transform_15, window_bounds = array<i64: 1, 1, 64>}, {transform_indices = @transform_16, window_bounds = array<i64: 1, 32, 32>}, {transform_indices = @transform_17, window_bounds = array<i64: 1, 1, 32>}, {transform_indices = @transform_18, window_bounds = array<i64: 1, 1, 32>}, {transform_indices = @transform_19, window_bounds = array<i64: 1, 1, 32>}, {transform_indices = @transform_20, window_bounds = array<i64: 1, 32, 64>}, {transform_indices = @transform_21, window_bounds = array<i64: 1, 1, 64>}, {transform_indices = @transform_22, window_bounds = array<i64: 1, 64, 32>}, {transform_indices = @transform_23, window_bounds = array<i64: 1, 1, 32>}, {pipeline_mode = #tpu.pipeline_mode<synchronous>, transform_indices = @transform_24, window_bounds = array<i64: 1, 32>}, {pipeline_mode = #tpu.pipeline_mode<synchronous>, transform_indices = @transform_25, window_bounds = array<i64: 1, 32>}, {transform_indices = @transform_26, window_bounds = array<i64: 1, 7, 32>}]} {
    %c0_i32 = arith.constant 0 : i32
    %0 = arith.cmpi eq, %arg1, %c0_i32 : i32
    %1 = arith.extui %0 : i1 to i32
    %c0_i32_0 = arith.constant 0 : i32
    %2 = arith.cmpi ne, %1, %c0_i32_0 : i32
    scf.if %2 {
      %c0_106 = arith.constant 0 : index
      %c0_107 = arith.constant 0 : index
      %c0_108 = arith.constant 0 : index
      %240 = vector.load %arg2[%c0_106, %c0_107, %c0_108] : memref<1x7x32xf32, #tpu.memory_space<vmem>>, vector<1x7x32xf32>
      %241 = vector.shape_cast %240 : vector<1x7x32xf32> to vector<7x32xf32>
      %c0_109 = arith.constant 0 : index
      %c0_110 = arith.constant 0 : index
      %242 = vector.load %arg29[%c0_109, %c0_110] : memref<7x32xf32, #tpu.memory_space<vmem>>, vector<7x32xf32>
      tpu.vector_store %arg29[%c0_109, %c0_110], %241 {strides = array<i32>} : memref<7x32xf32, #tpu.memory_space<vmem>>, vector<7x32xf32>,
    } else {
    }
    %c0 = arith.constant 0 : index
    %c0_1 = arith.constant 0 : index
    %3 = vector.load %arg29[%c0, %c0_1] : memref<7x32xf32, #tpu.memory_space<vmem>>, vector<7x32xf32>
    %c0_2 = arith.constant 0 : index
    %c0_3 = arith.constant 0 : index
    %c0_4 = arith.constant 0 : index
    %4 = vector.load %arg3[%c0_2, %c0_3, %c0_4] : memref<1x4x32xf32, #tpu.memory_space<vmem>>, vector<1x4x32xf32>
    %5 = vector.shape_cast %4 : vector<1x4x32xf32> to vector<4x32xf32>
    %c0_5 = arith.constant 0 : index
    %c0_6 = arith.constant 0 : index
    %c0_7 = arith.constant 0 : index
    %6 = vector.load %arg6[%c0_5, %c0_6, %c0_7] : memref<1x1x32xf32, #tpu.memory_space<vmem>>, vector<1x1x32xf32>
    %7 = vector.shape_cast %6 : vector<1x1x32xf32> to vector<1x32xf32>
    %c0_8 = arith.constant 0 : index
    %c0_9 = arith.constant 0 : index
    %c0_10 = arith.constant 0 : index
    %8 = vector.load %arg7[%c0_8, %c0_9, %c0_10] : memref<1x1x32xf32, #tpu.memory_space<vmem>>, vector<1x1x32xf32>
    %9 = vector.shape_cast %8 : vector<1x1x32xf32> to vector<1x32xf32>
    %cst = arith.constant dense<0.000000e+00> : vector<7xf32>
    %10 = vector.multi_reduction <add>, %3, %cst [1] : vector<7x32xf32> to vector<7xf32>
    %11 = vector.shape_cast %10 : vector<7xf32> to vector<7x1xf32>
    %cst_11 = arith.constant 3.200000e+01 : f32
    %12 = vector.broadcast %cst_11 : f32 to vector<7x1xf32>
    %13 = arith.divf %11, %12 : vector<7x1xf32>
    %14 = vector.broadcast %13 : vector<7x1xf32> to vector<7x32xf32>
    %15 = arith.subf %3, %14 : vector<7x32xf32>
    %16 = arith.mulf %15, %15 : vector<7x32xf32>
    %cst_12 = arith.constant dense<0.000000e+00> : vector<7xf32>
    %17 = vector.multi_reduction <add>, %16, %cst_12 [1] : vector<7x32xf32> to vector<7xf32>
    %18 = vector.shape_cast %17 : vector<7xf32> to vector<7x1xf32>
    %cst_13 = arith.constant 3.200000e+01 : f32
    %19 = vector.broadcast %cst_13 : f32 to vector<7x1xf32>
    %20 = arith.divf %18, %19 : vector<7x1xf32>
    %21 = vector.broadcast %13 : vector<7x1xf32> to vector<7x32xf32>
    %22 = arith.subf %3, %21 : vector<7x32xf32>
    %cst_14 = arith.constant 9.99999997E-7 : f32
    %23 = vector.broadcast %cst_14 : f32 to vector<7x1xf32>
    %24 = arith.addf %20, %23 : vector<7x1xf32>
    %25 = math.rsqrt %24 : vector<7x1xf32>
    %26 = vector.broadcast %25 : vector<7x1xf32> to vector<7x32xf32>
    %27 = arith.mulf %22, %26 : vector<7x32xf32>
    %28 = vector.broadcast %7 : vector<1x32xf32> to vector<7x32xf32>
    %29 = arith.mulf %27, %28 : vector<7x32xf32>
    %30 = vector.broadcast %9 : vector<1x32xf32> to vector<7x32xf32>
    %31 = arith.addf %29, %30 : vector<7x32xf32>
    %c0_15 = arith.constant 0 : index
    %c0_16 = arith.constant 0 : index
    %c0_17 = arith.constant 0 : index
    %32 = vector.load %arg8[%c0_15, %c0_16, %c0_17] : memref<1x32x96xbf16, #tpu.memory_space<vmem>>, vector<1x32x96xbf16>
    %33 = vector.shape_cast %32 : vector<1x32x96xbf16> to vector<32x96xbf16>
    %34 = arith.truncf %31 : vector<7x32xf32> to vector<7x32xbf16>
    %cst_18 = arith.constant dense<0.000000e+00> : vector<7x96xf32>
    %35 = tpu.matmul %34, %33, %cst_18 {dimension_numbers = #tpu.dot_dimension_numbers<[1], [0], [0], [1], [0, 0, 1, 1], [], []>} : vector<7x32xbf16>, vector<32x96xbf16>, vector<7x96xf32> -> vector<7x96xf32>
    %c0_19 = arith.constant 0 : index
    %c0_20 = arith.constant 0 : index
    %c0_21 = arith.constant 0 : index
    %36 = vector.load %arg9[%c0_19, %c0_20, %c0_21] : memref<1x1x96xf32, #tpu.memory_space<vmem>>, vector<1x1x96xf32>
    %37 = vector.shape_cast %36 : vector<1x1x96xf32> to vector<1x96xf32>
    %38 = vector.broadcast %37 : vector<1x96xf32> to vector<7x96xf32>
    %39 = arith.addf %35, %38 : vector<7x96xf32>
    %40 = vector.extract_strided_slice %39 {offsets = [0, 0], sizes = [7, 32], strides = [1, 1]} : vector<7x96xf32> to vector<7x32xf32>
    %41 = vector.extract_strided_slice %39 {offsets = [0, 32], sizes = [7, 32], strides = [1, 1]} : vector<7x96xf32> to vector<7x32xf32>
    %42 = vector.extract_strided_slice %39 {offsets = [0, 64], sizes = [7, 32], strides = [1, 1]} : vector<7x96xf32> to vector<7x32xf32>
    %c0_22 = arith.constant 0 : index
    %c0_23 = arith.constant 0 : index
    %c0_24 = arith.constant 0 : index
    %43 = vector.load %arg4[%c0_22, %c0_23, %c0_24] : memref<1x7x7xf32, #tpu.memory_space<vmem>>, vector<1x7x7xf32>
    %44 = vector.shape_cast %43 : vector<1x7x7xf32> to vector<7x7xf32>
    %45 = vector.extract_strided_slice %40 {offsets = [0, 0], sizes = [7, 16], strides = [1, 1]} : vector<7x32xf32> to vector<7x16xf32>
    %46 = vector.extract_strided_slice %40 {offsets = [0, 16], sizes = [7, 16], strides = [1, 1]} : vector<7x32xf32> to vector<7x16xf32>
    %47 = vector.shape_cast %45 : vector<7x16xf32> to vector<1x7x16xf32>
    %48 = vector.shape_cast %46 : vector<7x16xf32> to vector<1x7x16xf32>
    %49 = tpu.concatenate %47, %48 in 0 : vector<1x7x16xf32>, vector<1x7x16xf32> -> vector<2x7x16xf32>
    %50 = arith.truncf %49 : vector<2x7x16xf32> to vector<2x7x16xbf16>
    %51 = vector.extract_strided_slice %41 {offsets = [0, 0], sizes = [7, 16], strides = [1, 1]} : vector<7x32xf32> to vector<7x16xf32>
    %52 = vector.extract_strided_slice %41 {offsets = [0, 16], sizes = [7, 16], strides = [1, 1]} : vector<7x32xf32> to vector<7x16xf32>
    %53 = vector.shape_cast %51 : vector<7x16xf32> to vector<1x7x16xf32>
    %54 = vector.shape_cast %52 : vector<7x16xf32> to vector<1x7x16xf32>
    %55 = tpu.concatenate %53, %54 in 0 : vector<1x7x16xf32>, vector<1x7x16xf32> -> vector<2x7x16xf32>
    %56 = arith.truncf %55 : vector<2x7x16xf32> to vector<2x7x16xbf16>
    %57 = vector.extract_strided_slice %42 {offsets = [0, 0], sizes = [7, 16], strides = [1, 1]} : vector<7x32xf32> to vector<7x16xf32>
    %58 = vector.extract_strided_slice %42 {offsets = [0, 16], sizes = [7, 16], strides = [1, 1]} : vector<7x32xf32> to vector<7x16xf32>
    %59 = vector.shape_cast %57 : vector<7x16xf32> to vector<1x7x16xf32>
    %60 = vector.shape_cast %58 : vector<7x16xf32> to vector<1x7x16xf32>
    %61 = tpu.concatenate %59, %60 in 0 : vector<1x7x16xf32>, vector<1x7x16xf32> -> vector<2x7x16xf32>
    %62 = arith.truncf %61 : vector<2x7x16xf32> to vector<2x7x16xbf16>
    %cst_25 = arith.constant dense<0.000000e+00> : vector<2x7x7xf32>
    %63 = tpu.matmul %50, %56, %cst_25 {dimension_numbers = #tpu.dot_dimension_numbers<[2], [2], [1], [1], [0, 0, 0, 1, 1, 1], [0], [0]>} : vector<2x7x16xbf16>, vector<2x7x16xbf16>, vector<2x7x7xf32> -> vector<2x7x7xf32>
    %cst_26 = arith.constant 2.500000e-01 : f32
    %64 = vector.broadcast %cst_26 : f32 to vector<2x7x7xf32>
    %65 = arith.mulf %63, %64 : vector<2x7x7xf32>
    %66 = vector.shape_cast %44 : vector<7x7xf32> to vector<1x7x7xf32>
    %67 = vector.broadcast %66 : vector<1x7x7xf32> to vector<2x7x7xf32>
    %68 = arith.addf %65, %67 : vector<2x7x7xf32>
    %cst_27 = arith.constant dense<0xFF800000> : vector<2x7xf32>
    %69 = vector.multi_reduction <maximumf>, %68, %cst_27 [2] : vector<2x7x7xf32> to vector<2x7xf32>
    %70 = vector.shape_cast %69 : vector<2x7xf32> to vector<2x7x1xf32>
    %71 = vector.broadcast %70 : vector<2x7x1xf32> to vector<2x7x7xf32>
    %72 = arith.subf %68, %71 : vector<2x7x7xf32>
    %73 = math.exp %72 : vector<2x7x7xf32>
    %cst_28 = arith.constant dense<0.000000e+00> : vector<2x7xf32>
    %74 = vector.multi_reduction <add>, %73, %cst_28 [2] : vector<2x7x7xf32> to vector<2x7xf32>
    %75 = vector.shape_cast %74 : vector<2x7xf32> to vector<2x7x1xf32>
    %76 = tpu.reciprocal %75 {approx = true} : vector<2x7x1xf32> -> vector<2x7x1xf32>
    %77 = vector.broadcast %76 : vector<2x7x1xf32> to vector<2x7x7xf32>
    %78 = arith.mulf %73, %77 : vector<2x7x7xf32>
    %79 = arith.truncf %78 : vector<2x7x7xf32> to vector<2x7x7xbf16>
    %cst_29 = arith.constant dense<0.000000e+00> : vector<2x7x16xf32>
    %80 = tpu.matmul %79, %62, %cst_29 {dimension_numbers = #tpu.dot_dimension_numbers<[2], [1], [1], [2], [0, 0, 0, 1, 1, 2], [0], [0]>} : vector<2x7x7xbf16>, vector<2x7x16xbf16>, vector<2x7x16xf32> -> vector<2x7x16xf32>
    %81 = vector.extract_strided_slice %80 {offsets = [0, 0, 0], sizes = [1, 7, 16], strides = [1, 1, 1]} : vector<2x7x16xf32> to vector<1x7x16xf32>
    %82 = vector.shape_cast %81 : vector<1x7x16xf32> to vector<7x16xf32>
    %83 = vector.extract_strided_slice %80 {offsets = [1, 0, 0], sizes = [1, 7, 16], strides = [1, 1, 1]} : vector<2x7x16xf32> to vector<1x7x16xf32>
    %84 = vector.shape_cast %83 : vector<1x7x16xf32> to vector<7x16xf32>
    %85 = tpu.concatenate %82, %84 in 1 : vector<7x16xf32>, vector<7x16xf32> -> vector<7x32xf32>
    %c0_30 = arith.constant 0 : index
    %c0_31 = arith.constant 0 : index
    %c0_32 = arith.constant 0 : index
    %86 = vector.load %arg10[%c0_30, %c0_31, %c0_32] : memref<1x32x32xbf16, #tpu.memory_space<vmem>>, vector<1x32x32xbf16>
    %87 = vector.shape_cast %86 : vector<1x32x32xbf16> to vector<32x32xbf16>
    %88 = arith.truncf %85 : vector<7x32xf32> to vector<7x32xbf16>
    %cst_33 = arith.constant dense<0.000000e+00> : vector<7x32xf32>
    %89 = tpu.matmul %88, %87, %cst_33 {dimension_numbers = #tpu.dot_dimension_numbers<[1], [0], [0], [1], [0, 0, 1, 1], [], []>} : vector<7x32xbf16>, vector<32x32xbf16>, vector<7x32xf32> -> vector<7x32xf32>
    %c0_34 = arith.constant 0 : index
    %c0_35 = arith.constant 0 : index
    %c0_36 = arith.constant 0 : index
    %90 = vector.load %arg11[%c0_34, %c0_35, %c0_36] : memref<1x1x32xf32, #tpu.memory_space<vmem>>, vector<1x1x32xf32>
    %91 = vector.shape_cast %90 : vector<1x1x32xf32> to vector<1x32xf32>
    %92 = vector.broadcast %91 : vector<1x32xf32> to vector<7x32xf32>
    %93 = arith.addf %89, %92 : vector<7x32xf32>
    %94 = arith.addf %93, %3 : vector<7x32xf32>
    %c0_37 = arith.constant 0 : index
    %c0_38 = arith.constant 0 : index
    %c0_39 = arith.constant 0 : index
    %95 = vector.load %arg12[%c0_37, %c0_38, %c0_39] : memref<1x1x32xf32, #tpu.memory_space<vmem>>, vector<1x1x32xf32>
    %96 = vector.shape_cast %95 : vector<1x1x32xf32> to vector<1x32xf32>
    %c0_40 = arith.constant 0 : index
    %c0_41 = arith.constant 0 : index
    %c0_42 = arith.constant 0 : index
    %97 = vector.load %arg13[%c0_40, %c0_41, %c0_42] : memref<1x1x32xf32, #tpu.memory_space<vmem>>, vector<1x1x32xf32>
    %98 = vector.shape_cast %97 : vector<1x1x32xf32> to vector<1x32xf32>
    %cst_43 = arith.constant dense<0.000000e+00> : vector<7xf32>
    %99 = vector.multi_reduction <add>, %94, %cst_43 [1] : vector<7x32xf32> to vector<7xf32>
    %100 = vector.shape_cast %99 : vector<7xf32> to vector<7x1xf32>
    %cst_44 = arith.constant 3.200000e+01 : f32
    %101 = vector.broadcast %cst_44 : f32 to vector<7x1xf32>
    %102 = arith.divf %100, %101 : vector<7x1xf32>
    %103 = vector.broadcast %102 : vector<7x1xf32> to vector<7x32xf32>
    %104 = arith.subf %94, %103 : vector<7x32xf32>
    %105 = arith.mulf %104, %104 : vector<7x32xf32>
    %cst_45 = arith.constant dense<0.000000e+00> : vector<7xf32>
    %106 = vector.multi_reduction <add>, %105, %cst_45 [1] : vector<7x32xf32> to vector<7xf32>
    %107 = vector.shape_cast %106 : vector<7xf32> to vector<7x1xf32>
    %cst_46 = arith.constant 3.200000e+01 : f32
    %108 = vector.broadcast %cst_46 : f32 to vector<7x1xf32>
    %109 = arith.divf %107, %108 : vector<7x1xf32>
    %110 = vector.broadcast %102 : vector<7x1xf32> to vector<7x32xf32>
    %111 = arith.subf %94, %110 : vector<7x32xf32>
    %cst_47 = arith.constant 9.99999997E-7 : f32
    %112 = vector.broadcast %cst_47 : f32 to vector<7x1xf32>
    %113 = arith.addf %109, %112 : vector<7x1xf32>
    %114 = math.rsqrt %113 : vector<7x1xf32>
    %115 = vector.broadcast %114 : vector<7x1xf32> to vector<7x32xf32>
    %116 = arith.mulf %111, %115 : vector<7x32xf32>
    %117 = vector.broadcast %96 : vector<1x32xf32> to vector<7x32xf32>
    %118 = arith.mulf %116, %117 : vector<7x32xf32>
    %119 = vector.broadcast %98 : vector<1x32xf32> to vector<7x32xf32>
    %120 = arith.addf %118, %119 : vector<7x32xf32>
    %c0_48 = arith.constant 0 : index
    %c0_49 = arith.constant 0 : index
    %c0_50 = arith.constant 0 : index
    %121 = vector.load %arg14[%c0_48, %c0_49, %c0_50] : memref<1x32x32xbf16, #tpu.memory_space<vmem>>, vector<1x32x32xbf16>
    %122 = vector.shape_cast %121 : vector<1x32x32xbf16> to vector<32x32xbf16>
    %123 = arith.truncf %120 : vector<7x32xf32> to vector<7x32xbf16>
    %cst_51 = arith.constant dense<0.000000e+00> : vector<7x32xf32>
    %124 = tpu.matmul %123, %122, %cst_51 {dimension_numbers = #tpu.dot_dimension_numbers<[1], [0], [0], [1], [0, 0, 1, 1], [], []>} : vector<7x32xbf16>, vector<32x32xbf16>, vector<7x32xf32> -> vector<7x32xf32>
    %c0_52 = arith.constant 0 : index
    %c0_53 = arith.constant 0 : index
    %c0_54 = arith.constant 0 : index
    %125 = vector.load %arg15[%c0_52, %c0_53, %c0_54] : memref<1x1x32xf32, #tpu.memory_space<vmem>>, vector<1x1x32xf32>
    %126 = vector.shape_cast %125 : vector<1x1x32xf32> to vector<1x32xf32>
    %127 = vector.broadcast %126 : vector<1x32xf32> to vector<7x32xf32>
    %128 = arith.addf %124, %127 : vector<7x32xf32>
    %c0_55 = arith.constant 0 : index
    %c0_56 = arith.constant 0 : index
    %c0_57 = arith.constant 0 : index
    %129 = vector.load %arg16[%c0_55, %c0_56, %c0_57] : memref<1x32x64xbf16, #tpu.memory_space<vmem>>, vector<1x32x64xbf16>
    %130 = vector.shape_cast %129 : vector<1x32x64xbf16> to vector<32x64xbf16>
    %131 = arith.truncf %5 : vector<4x32xf32> to vector<4x32xbf16>
    %cst_58 = arith.constant dense<0.000000e+00> : vector<4x64xf32>
    %132 = tpu.matmul %131, %130, %cst_58 {dimension_numbers = #tpu.dot_dimension_numbers<[1], [0], [0], [1], [0, 0, 1, 1], [], []>} : vector<4x32xbf16>, vector<32x64xbf16>, vector<4x64xf32> -> vector<4x64xf32>
    %c0_59 = arith.constant 0 : index
    %c0_60 = arith.constant 0 : index
    %c0_61 = arith.constant 0 : index
    %133 = vector.load %arg17[%c0_59, %c0_60, %c0_61] : memref<1x1x64xf32, #tpu.memory_space<vmem>>, vector<1x1x64xf32>
    %134 = vector.shape_cast %133 : vector<1x1x64xf32> to vector<1x64xf32>
    %135 = vector.broadcast %134 : vector<1x64xf32> to vector<4x64xf32>
    %136 = arith.addf %132, %135 : vector<4x64xf32>
    %137 = vector.extract_strided_slice %136 {offsets = [0, 0], sizes = [4, 32], strides = [1, 1]} : vector<4x64xf32> to vector<4x32xf32>
    %138 = vector.extract_strided_slice %136 {offsets = [0, 32], sizes = [4, 32], strides = [1, 1]} : vector<4x64xf32> to vector<4x32xf32>
    %c0_62 = arith.constant 0 : index
    %c0_63 = arith.constant 0 : index
    %c0_64 = arith.constant 0 : index
    %139 = vector.load %arg5[%c0_62, %c0_63, %c0_64] : memref<1x1x4xf32, #tpu.memory_space<vmem>>, vector<1x1x4xf32>
    %140 = vector.shape_cast %139 : vector<1x1x4xf32> to vector<1x4xf32>
    %141 = vector.extract_strided_slice %128 {offsets = [0, 0], sizes = [7, 16], strides = [1, 1]} : vector<7x32xf32> to vector<7x16xf32>
    %142 = vector.extract_strided_slice %128 {offsets = [0, 16], sizes = [7, 16], strides = [1, 1]} : vector<7x32xf32> to vector<7x16xf32>
    %143 = vector.shape_cast %141 : vector<7x16xf32> to vector<1x7x16xf32>
    %144 = vector.shape_cast %142 : vector<7x16xf32> to vector<1x7x16xf32>
    %145 = tpu.concatenate %143, %144 in 0 : vector<1x7x16xf32>, vector<1x7x16xf32> -> vector<2x7x16xf32>
    %146 = arith.truncf %145 : vector<2x7x16xf32> to vector<2x7x16xbf16>
    %147 = vector.extract_strided_slice %137 {offsets = [0, 0], sizes = [4, 16], strides = [1, 1]} : vector<4x32xf32> to vector<4x16xf32>
    %148 = vector.extract_strided_slice %137 {offsets = [0, 16], sizes = [4, 16], strides = [1, 1]} : vector<4x32xf32> to vector<4x16xf32>
    %149 = vector.shape_cast %147 : vector<4x16xf32> to vector<1x4x16xf32>
    %150 = vector.shape_cast %148 : vector<4x16xf32> to vector<1x4x16xf32>
    %151 = tpu.concatenate %149, %150 in 0 : vector<1x4x16xf32>, vector<1x4x16xf32> -> vector<2x4x16xf32>
    %152 = arith.truncf %151 : vector<2x4x16xf32> to vector<2x4x16xbf16>
    %153 = vector.extract_strided_slice %138 {offsets = [0, 0], sizes = [4, 16], strides = [1, 1]} : vector<4x32xf32> to vector<4x16xf32>
    %154 = vector.extract_strided_slice %138 {offsets = [0, 16], sizes = [4, 16], strides = [1, 1]} : vector<4x32xf32> to vector<4x16xf32>
    %155 = vector.shape_cast %153 : vector<4x16xf32> to vector<1x4x16xf32>
    %156 = vector.shape_cast %154 : vector<4x16xf32> to vector<1x4x16xf32>
    %157 = tpu.concatenate %155, %156 in 0 : vector<1x4x16xf32>, vector<1x4x16xf32> -> vector<2x4x16xf32>
    %158 = arith.truncf %157 : vector<2x4x16xf32> to vector<2x4x16xbf16>
    %cst_65 = arith.constant dense<0.000000e+00> : vector<2x7x4xf32>
    %159 = tpu.matmul %146, %152, %cst_65 {dimension_numbers = #tpu.dot_dimension_numbers<[2], [2], [1], [1], [0, 0, 0, 1, 1, 1], [0], [0]>} : vector<2x7x16xbf16>, vector<2x4x16xbf16>, vector<2x7x4xf32> -> vector<2x7x4xf32>
    %cst_66 = arith.constant 2.500000e-01 : f32
    %160 = vector.broadcast %cst_66 : f32 to vector<2x7x4xf32>
    %161 = arith.mulf %159, %160 : vector<2x7x4xf32>
    %162 = vector.shape_cast %140 : vector<1x4xf32> to vector<1x1x4xf32>
    %163 = vector.broadcast %162 : vector<1x1x4xf32> to vector<2x7x4xf32>
    %164 = arith.addf %161, %163 : vector<2x7x4xf32>
    %cst_67 = arith.constant dense<0xFF800000> : vector<2x7xf32>
    %165 = vector.multi_reduction <maximumf>, %164, %cst_67 [2] : vector<2x7x4xf32> to vector<2x7xf32>
    %166 = vector.shape_cast %165 : vector<2x7xf32> to vector<2x7x1xf32>
    %167 = vector.broadcast %166 : vector<2x7x1xf32> to vector<2x7x4xf32>
    %168 = arith.subf %164, %167 : vector<2x7x4xf32>
    %169 = math.exp %168 : vector<2x7x4xf32>
    %cst_68 = arith.constant dense<0.000000e+00> : vector<2x7xf32>
    %170 = vector.multi_reduction <add>, %169, %cst_68 [2] : vector<2x7x4xf32> to vector<2x7xf32>
    %171 = vector.shape_cast %170 : vector<2x7xf32> to vector<2x7x1xf32>
    %172 = tpu.reciprocal %171 {approx = true} : vector<2x7x1xf32> -> vector<2x7x1xf32>
    %173 = vector.broadcast %172 : vector<2x7x1xf32> to vector<2x7x4xf32>
    %174 = arith.mulf %169, %173 : vector<2x7x4xf32>
    %175 = arith.truncf %174 : vector<2x7x4xf32> to vector<2x7x4xbf16>
    %cst_69 = arith.constant dense<0.000000e+00> : vector<2x7x16xf32>
    %176 = tpu.matmul %175, %158, %cst_69 {dimension_numbers = #tpu.dot_dimension_numbers<[2], [1], [1], [2], [0, 0, 0, 1, 1, 2], [0], [0]>} : vector<2x7x4xbf16>, vector<2x4x16xbf16>, vector<2x7x16xf32> -> vector<2x7x16xf32>
    %177 = vector.extract_strided_slice %176 {offsets = [0, 0, 0], sizes = [1, 7, 16], strides = [1, 1, 1]} : vector<2x7x16xf32> to vector<1x7x16xf32>
    %178 = vector.shape_cast %177 : vector<1x7x16xf32> to vector<7x16xf32>
    %179 = vector.extract_strided_slice %176 {offsets = [1, 0, 0], sizes = [1, 7, 16], strides = [1, 1, 1]} : vector<2x7x16xf32> to vector<1x7x16xf32>
    %180 = vector.shape_cast %179 : vector<1x7x16xf32> to vector<7x16xf32>
    %181 = tpu.concatenate %178, %180 in 1 : vector<7x16xf32>, vector<7x16xf32> -> vector<7x32xf32>
    %c0_70 = arith.constant 0 : index
    %c0_71 = arith.constant 0 : index
    %c0_72 = arith.constant 0 : index
    %182 = vector.load %arg18[%c0_70, %c0_71, %c0_72] : memref<1x32x32xbf16, #tpu.memory_space<vmem>>, vector<1x32x32xbf16>
    %183 = vector.shape_cast %182 : vector<1x32x32xbf16> to vector<32x32xbf16>
    %184 = arith.truncf %181 : vector<7x32xf32> to vector<7x32xbf16>
    %cst_73 = arith.constant dense<0.000000e+00> : vector<7x32xf32>
    %185 = tpu.matmul %184, %183, %cst_73 {dimension_numbers = #tpu.dot_dimension_numbers<[1], [0], [0], [1], [0, 0, 1, 1], [], []>} : vector<7x32xbf16>, vector<32x32xbf16>, vector<7x32xf32> -> vector<7x32xf32>
    %c0_74 = arith.constant 0 : index
    %c0_75 = arith.constant 0 : index
    %c0_76 = arith.constant 0 : index
    %186 = vector.load %arg19[%c0_74, %c0_75, %c0_76] : memref<1x1x32xf32, #tpu.memory_space<vmem>>, vector<1x1x32xf32>
    %187 = vector.shape_cast %186 : vector<1x1x32xf32> to vector<1x32xf32>
    %188 = vector.broadcast %187 : vector<1x32xf32> to vector<7x32xf32>
    %189 = arith.addf %185, %188 : vector<7x32xf32>
    %190 = arith.addf %189, %94 : vector<7x32xf32>
    %c0_77 = arith.constant 0 : index
    %c0_78 = arith.constant 0 : index
    %c0_79 = arith.constant 0 : index
    %191 = vector.load %arg20[%c0_77, %c0_78, %c0_79] : memref<1x1x32xf32, #tpu.memory_space<vmem>>, vector<1x1x32xf32>
    %192 = vector.shape_cast %191 : vector<1x1x32xf32> to vector<1x32xf32>
    %c0_80 = arith.constant 0 : index
    %c0_81 = arith.constant 0 : index
    %c0_82 = arith.constant 0 : index
    %193 = vector.load %arg21[%c0_80, %c0_81, %c0_82] : memref<1x1x32xf32, #tpu.memory_space<vmem>>, vector<1x1x32xf32>
    %194 = vector.shape_cast %193 : vector<1x1x32xf32> to vector<1x32xf32>
    %cst_83 = arith.constant dense<0.000000e+00> : vector<7xf32>
    %195 = vector.multi_reduction <add>, %190, %cst_83 [1] : vector<7x32xf32> to vector<7xf32>
    %196 = vector.shape_cast %195 : vector<7xf32> to vector<7x1xf32>
    %cst_84 = arith.constant 3.200000e+01 : f32
    %197 = vector.broadcast %cst_84 : f32 to vector<7x1xf32>
    %198 = arith.divf %196, %197 : vector<7x1xf32>
    %199 = vector.broadcast %198 : vector<7x1xf32> to vector<7x32xf32>
    %200 = arith.subf %190, %199 : vector<7x32xf32>
    %201 = arith.mulf %200, %200 : vector<7x32xf32>
    %cst_85 = arith.constant dense<0.000000e+00> : vector<7xf32>
    %202 = vector.multi_reduction <add>, %201, %cst_85 [1] : vector<7x32xf32> to vector<7xf32>
    %203 = vector.shape_cast %202 : vector<7xf32> to vector<7x1xf32>
    %cst_86 = arith.constant 3.200000e+01 : f32
    %204 = vector.broadcast %cst_86 : f32 to vector<7x1xf32>
    %205 = arith.divf %203, %204 : vector<7x1xf32>
    %206 = vector.broadcast %198 : vector<7x1xf32> to vector<7x32xf32>
    %207 = arith.subf %190, %206 : vector<7x32xf32>
    %cst_87 = arith.constant 9.99999997E-7 : f32
    %208 = vector.broadcast %cst_87 : f32 to vector<7x1xf32>
    %209 = arith.addf %205, %208 : vector<7x1xf32>
    %210 = math.rsqrt %209 : vector<7x1xf32>
    %211 = vector.broadcast %210 : vector<7x1xf32> to vector<7x32xf32>
    %212 = arith.mulf %207, %211 : vector<7x32xf32>
    %213 = vector.broadcast %192 : vector<1x32xf32> to vector<7x32xf32>
    %214 = arith.mulf %212, %213 : vector<7x32xf32>
    %215 = vector.broadcast %194 : vector<1x32xf32> to vector<7x32xf32>
    %216 = arith.addf %214, %215 : vector<7x32xf32>
    %c0_88 = arith.constant 0 : index
    %c0_89 = arith.constant 0 : index
    %c0_90 = arith.constant 0 : index
    %217 = vector.load %arg22[%c0_88, %c0_89, %c0_90] : memref<1x32x64xbf16, #tpu.memory_space<vmem>>, vector<1x32x64xbf16>
    %218 = vector.shape_cast %217 : vector<1x32x64xbf16> to vector<32x64xbf16>
    %219 = arith.truncf %216 : vector<7x32xf32> to vector<7x32xbf16>
    %cst_91 = arith.constant dense<0.000000e+00> : vector<7x64xf32>
    %220 = tpu.matmul %219, %218, %cst_91 {dimension_numbers = #tpu.dot_dimension_numbers<[1], [0], [0], [1], [0, 0, 1, 1], [], []>} : vector<7x32xbf16>, vector<32x64xbf16>, vector<7x64xf32> -> vector<7x64xf32>
    %c0_92 = arith.constant 0 : index
    %c0_93 = arith.constant 0 : index
    %c0_94 = arith.constant 0 : index
    %221 = vector.load %arg23[%c0_92, %c0_93, %c0_94] : memref<1x1x64xf32, #tpu.memory_space<vmem>>, vector<1x1x64xf32>
    %222 = vector.shape_cast %221 : vector<1x1x64xf32> to vector<1x64xf32>
    %223 = vector.broadcast %222 : vector<1x64xf32> to vector<7x64xf32>
    %224 = arith.addf %220, %223 : vector<7x64xf32>
    %cst_95 = arith.constant 0.000000e+00 : f32
    %225 = vector.broadcast %cst_95 : f32 to vector<7x64xf32>
    %226 = arith.maximumf %224, %225 : vector<7x64xf32>
    %c0_96 = arith.constant 0 : index
    %c0_97 = arith.constant 0 : index
    %c0_98 = arith.constant 0 : index
    %227 = vector.load %arg24[%c0_96, %c0_97, %c0_98] : memref<1x64x32xbf16, #tpu.memory_space<vmem>>, vector<1x64x32xbf16>
    %228 = vector.shape_cast %227 : vector<1x64x32xbf16> to vector<64x32xbf16>
    %229 = arith.truncf %226 : vector<7x64xf32> to vector<7x64xbf16>
    %cst_99 = arith.constant dense<0.000000e+00> : vector<7x32xf32>
    %230 = tpu.matmul %229, %228, %cst_99 {dimension_numbers = #tpu.dot_dimension_numbers<[1], [0], [0], [1], [0, 0, 1, 1], [], []>} : vector<7x64xbf16>, vector<64x32xbf16>, vector<7x32xf32> -> vector<7x32xf32>
    %c0_100 = arith.constant 0 : index
    %c0_101 = arith.constant 0 : index
    %c0_102 = arith.constant 0 : index
    %231 = vector.load %arg25[%c0_100, %c0_101, %c0_102] : memref<1x1x32xf32, #tpu.memory_space<vmem>>, vector<1x1x32xf32>
    %232 = vector.shape_cast %231 : vector<1x1x32xf32> to vector<1x32xf32>
    %233 = vector.broadcast %232 : vector<1x32xf32> to vector<7x32xf32>
    %234 = arith.addf %230, %233 : vector<7x32xf32>
    %235 = arith.addf %234, %190 : vector<7x32xf32>
    %c0_103 = arith.constant 0 : index
    %c0_104 = arith.constant 0 : index
    %236 = vector.load %arg29[%c0_103, %c0_104] : memref<7x32xf32, #tpu.memory_space<vmem>>, vector<7x32xf32>
    tpu.vector_store %arg29[%c0_103, %c0_104], %235 {strides = array<i32>} : memref<7x32xf32, #tpu.memory_space<vmem>>, vector<7x32xf32>,
    %c1_i32 = arith.constant 1 : i32
    %237 = arith.cmpi eq, %arg1, %c1_i32 : i32
    %238 = arith.extui %237 : i1 to i32
    %c0_i32_105 = arith.constant 0 : i32
    %239 = arith.cmpi ne, %238, %c0_i32_105 : i32
    scf.if %239 {
      %c0_106 = arith.constant 0 : index
      %c0_107 = arith.constant 0 : index
      %240 = vector.load %arg26[%c0_106, %c0_107] : memref<1x32xf32, #tpu.memory_space<vmem>>, vector<1x32xf32>
      %c0_108 = arith.constant 0 : index
      %c0_109 = arith.constant 0 : index
      %241 = vector.load %arg27[%c0_108, %c0_109] : memref<1x32xf32, #tpu.memory_space<vmem>>, vector<1x32xf32>
      %cst_110 = arith.constant dense<0.000000e+00> : vector<7xf32>
      %242 = vector.multi_reduction <add>, %235, %cst_110 [1] : vector<7x32xf32> to vector<7xf32>
      %243 = vector.shape_cast %242 : vector<7xf32> to vector<7x1xf32>
      %cst_111 = arith.constant 3.200000e+01 : f32
      %244 = vector.broadcast %cst_111 : f32 to vector<7x1xf32>
      %245 = arith.divf %243, %244 : vector<7x1xf32>
      %246 = vector.broadcast %245 : vector<7x1xf32> to vector<7x32xf32>
      %247 = arith.subf %235, %246 : vector<7x32xf32>
      %248 = arith.mulf %247, %247 : vector<7x32xf32>
      %cst_112 = arith.constant dense<0.000000e+00> : vector<7xf32>
      %249 = vector.multi_reduction <add>, %248, %cst_112 [1] : vector<7x32xf32> to vector<7xf32>
      %250 = vector.shape_cast %249 : vector<7xf32> to vector<7x1xf32>
      %cst_113 = arith.constant 3.200000e+01 : f32
      %251 = vector.broadcast %cst_113 : f32 to vector<7x1xf32>
      %252 = arith.divf %250, %251 : vector<7x1xf32>
      %253 = vector.broadcast %245 : vector<7x1xf32> to vector<7x32xf32>
      %254 = arith.subf %235, %253 : vector<7x32xf32>
      %cst_114 = arith.constant 9.99999997E-7 : f32
      %255 = vector.broadcast %cst_114 : f32 to vector<7x1xf32>
      %256 = arith.addf %252, %255 : vector<7x1xf32>
      %257 = math.rsqrt %256 : vector<7x1xf32>
      %258 = vector.broadcast %257 : vector<7x1xf32> to vector<7x32xf32>
      %259 = arith.mulf %254, %258 : vector<7x32xf32>
      %260 = vector.broadcast %240 : vector<1x32xf32> to vector<7x32xf32>
      %261 = arith.mulf %259, %260 : vector<7x32xf32>
      %262 = vector.broadcast %241 : vector<1x32xf32> to vector<7x32xf32>
      %263 = arith.addf %261, %262 : vector<7x32xf32>
      %264 = vector.shape_cast %263 : vector<7x32xf32> to vector<1x7x32xf32>
      %c0_115 = arith.constant 0 : index
      %c0_116 = arith.constant 0 : index
      %c0_117 = arith.constant 0 : index
      %265 = vector.load %arg28[%c0_115, %c0_116, %c0_117] : memref<1x7x32xf32, #tpu.memory_space<vmem>>, vector<1x7x32xf32>
      tpu.vector_store %arg28[%c0_115, %c0_116, %c0_117], %264 {strides = array<i32>} : memref<1x7x32xf32, #tpu.memory_space<vmem>>, vector<1x7x32xf32>,
    } else {
    }
    return
  }
  func.func @transform_0(%arg0: i32, %arg1: i32) -> (i32, i32, i32) {
    %c0_i32 = arith.constant 0 : i32
    %c0_i32_0 = arith.constant 0 : i32
    %c0_i32_1 = arith.constant 0 : i32
    return %arg0, %c0_i32, %c0_i32_0 : i32, i32, i32
  }
  func.func @transform_1(%arg0: i32, %arg1: i32) -> (i32, i32, i32) {
    %c0_i32 = arith.constant 0 : i32
    %c0_i32_0 = arith.constant 0 : i32
    %c0_i32_1 = arith.constant 0 : i32
    return %arg0, %c0_i32, %c0_i32_0 : i32, i32, i32
  }
  func.func @transform_2(%arg0: i32, %arg1: i32) -> (i32, i32, i32) {
    %c0_i32 = arith.constant 0 : i32
    %c0_i32_0 = arith.constant 0 : i32
    %c0_i32_1 = arith.constant 0 : i32
    return %arg0, %c0_i32, %c0_i32_0 : i32, i32, i32
  }
  func.func @transform_3(%arg0: i32, %arg1: i32) -> (i32, i32, i32) {
    %c0_i32 = arith.constant 0 : i32
    %c0_i32_0 = arith.constant 0 : i32
    %c0_i32_1 = arith.constant 0 : i32
    return %arg0, %c0_i32, %c0_i32_0 : i32, i32, i32
  }
  func.func @transform_4(%arg0: i32, %arg1: i32) -> (i32, i32, i32) {
    %c0_i32 = arith.constant 0 : i32
    %c0_i32_0 = arith.constant 0 : i32
    %c0_i32_1 = arith.constant 0 : i32
    return %arg1, %c0_i32, %c0_i32_0 : i32, i32, i32
  }
  func.func @transform_5(%arg0: i32, %arg1: i32) -> (i32, i32, i32) {
    %c0_i32 = arith.constant 0 : i32
    %c0_i32_0 = arith.constant 0 : i32
    %c0_i32_1 = arith.constant 0 : i32
    return %arg1, %c0_i32, %c0_i32_0 : i32, i32, i32
  }
  func.func @transform_6(%arg0: i32, %arg1: i32) -> (i32, i32, i32) {
    %c0_i32 = arith.constant 0 : i32
    %c0_i32_0 = arith.constant 0 : i32
    %c0_i32_1 = arith.constant 0 : i32
    return %arg1, %c0_i32, %c0_i32_0 : i32, i32, i32
  }
  func.func @transform_7(%arg0: i32, %arg1: i32) -> (i32, i32, i32) {
    %c0_i32 = arith.constant 0 : i32
    %c0_i32_0 = arith.constant 0 : i32
    %c0_i32_1 = arith.constant 0 : i32
    return %arg1, %c0_i32, %c0_i32_0 : i32, i32, i32
  }
  func.func @transform_8(%arg0: i32, %arg1: i32) -> (i32, i32, i32) {
    %c0_i32 = arith.constant 0 : i32
    %c0_i32_0 = arith.constant 0 : i32
    %c0_i32_1 = arith.constant 0 : i32
    return %arg1, %c0_i32, %c0_i32_0 : i32, i32, i32
  }
  func.func @transform_9(%arg0: i32, %arg1: i32) -> (i32, i32, i32) {
    %c0_i32 = arith.constant 0 : i32
    %c0_i32_0 = arith.constant 0 : i32
    %c0_i32_1 = arith.constant 0 : i32
    return %arg1, %c0_i32, %c0_i32_0 : i32, i32, i32
  }
  func.func @transform_10(%arg0: i32, %arg1: i32) -> (i32, i32, i32) {
    %c0_i32 = arith.constant 0 : i32
    %c0_i32_0 = arith.constant 0 : i32
    %c0_i32_1 = arith.constant 0 : i32
    return %arg1, %c0_i32, %c0_i32_0 : i32, i32, i32
  }
  func.func @transform_11(%arg0: i32, %arg1: i32) -> (i32, i32, i32) {
    %c0_i32 = arith.constant 0 : i32
    %c0_i32_0 = arith.constant 0 : i32
    %c0_i32_1 = arith.constant 0 : i32
    return %arg1, %c0_i32, %c0_i32_0 : i32, i32, i32
  }
  func.func @transform_12(%arg0: i32, %arg1: i32) -> (i32, i32, i32) {
    %c0_i32 = arith.constant 0 : i32
    %c0_i32_0 = arith.constant 0 : i32
    %c0_i32_1 = arith.constant 0 : i32
    return %arg1, %c0_i32, %c0_i32_0 : i32, i32, i32
  }
  func.func @transform_13(%arg0: i32, %arg1: i32) -> (i32, i32, i32) {
    %c0_i32 = arith.constant 0 : i32
    %c0_i32_0 = arith.constant 0 : i32
    %c0_i32_1 = arith.constant 0 : i32
    return %arg1, %c0_i32, %c0_i32_0 : i32, i32, i32
  }
  func.func @transform_14(%arg0: i32, %arg1: i32) -> (i32, i32, i32) {
    %c0_i32 = arith.constant 0 : i32
    %c0_i32_0 = arith.constant 0 : i32
    %c0_i32_1 = arith.constant 0 : i32
    return %arg1, %c0_i32, %c0_i32_0 : i32, i32, i32
  }
  func.func @transform_15(%arg0: i32, %arg1: i32) -> (i32, i32, i32) {
    %c0_i32 = arith.constant 0 : i32
    %c0_i32_0 = arith.constant 0 : i32
    %c0_i32_1 = arith.constant 0 : i32
    return %arg1, %c0_i32, %c0_i32_0 : i32, i32, i32
  }
  func.func @transform_16(%arg0: i32, %arg1: i32) -> (i32, i32, i32) {
    %c0_i32 = arith.constant 0 : i32
    %c0_i32_0 = arith.constant 0 : i32
    %c0_i32_1 = arith.constant 0 : i32
    return %arg1, %c0_i32, %c0_i32_0 : i32, i32, i32
  }
  func.func @transform_17(%arg0: i32, %arg1: i32) -> (i32, i32, i32) {
    %c0_i32 = arith.constant 0 : i32
    %c0_i32_0 = arith.constant 0 : i32
    %c0_i32_1 = arith.constant 0 : i32
    return %arg1, %c0_i32, %c0_i32_0 : i32, i32, i32
  }
  func.func @transform_18(%arg0: i32, %arg1: i32) -> (i32, i32, i32) {
    %c0_i32 = arith.constant 0 : i32
    %c0_i32_0 = arith.constant 0 : i32
    %c0_i32_1 = arith.constant 0 : i32
    return %arg1, %c0_i32, %c0_i32_0 : i32, i32, i32
  }
  func.func @transform_19(%arg0: i32, %arg1: i32) -> (i32, i32, i32) {
    %c0_i32 = arith.constant 0 : i32
    %c0_i32_0 = arith.constant 0 : i32
    %c0_i32_1 = arith.constant 0 : i32
    return %arg1, %c0_i32, %c0_i32_0 : i32, i32, i32
  }
  func.func @transform_20(%arg0: i32, %arg1: i32) -> (i32, i32, i32) {
    %c0_i32 = arith.constant 0 : i32
    %c0_i32_0 = arith.constant 0 : i32
    %c0_i32_1 = arith.constant 0 : i32
    return %arg1, %c0_i32, %c0_i32_0 : i32, i32, i32
  }
  func.func @transform_21(%arg0: i32, %arg1: i32) -> (i32, i32, i32) {
    %c0_i32 = arith.constant 0 : i32
    %c0_i32_0 = arith.constant 0 : i32
    %c0_i32_1 = arith.constant 0 : i32
    return %arg1, %c0_i32, %c0_i32_0 : i32, i32, i32
  }
  func.func @transform_22(%arg0: i32, %arg1: i32) -> (i32, i32, i32) {
    %c0_i32 = arith.constant 0 : i32
    %c0_i32_0 = arith.constant 0 : i32
    %c0_i32_1 = arith.constant 0 : i32
    return %arg1, %c0_i32, %c0_i32_0 : i32, i32, i32
  }
  func.func @transform_23(%arg0: i32, %arg1: i32) -> (i32, i32, i32) {
    %c0_i32 = arith.constant 0 : i32
    %c0_i32_0 = arith.constant 0 : i32
    %c0_i32_1 = arith.constant 0 : i32
    return %arg1, %c0_i32, %c0_i32_0 : i32, i32, i32
  }
  func.func @transform_24(%arg0: i32, %arg1: i32) -> (i32, i32) {
    %c0_i32 = arith.constant 0 : i32
    %c0_i32_0 = arith.constant 0 : i32
    %c0_i32_1 = arith.constant 0 : i32
    return %c0_i32, %c0_i32_0 : i32, i32
  }
  func.func @transform_25(%arg0: i32, %arg1: i32) -> (i32, i32) {
    %c0_i32 = arith.constant 0 : i32
    %c0_i32_0 = arith.constant 0 : i32
    %c0_i32_1 = arith.constant 0 : i32
    return %c0_i32, %c0_i32_0 : i32, i32
  }
  func.func @transform_26(%arg0: i32, %arg1: i32) -> (i32, i32, i32) {
    %c0_i32 = arith.constant 0 : i32
    %c0_i32_0 = arith.constant 0 : i32
    %c0_i32_1 = arith.constant 0 : i32
    return %arg0, %c0_i32, %c0_i32_0 : i32, i32, i32
  }
}

</mosaic_0001>

<bundles_post_ra>
// kernel: model_forward.4
= control target key start
LH: loop header
LB: loop body
LE: loop exit
PB: predicated region body
PF: predicated region fallthrough
CT: control target
= control target key end

     0   :  { %s1904_s21 = smov 0   ;;  %s1906_s22 = smov 0   ;;  %s2147_s0 = inlined_call_operand.vmem [shape: f32[2,4,32], index: 0, kind: input, shape index: {}]   ;;  %s2148_s1 = inlined_call_operand.vmem [shape: f32[2,1,4], index: 1, kind: input, shape index: {}]   ;;  %s2149_s2 = inlined_call_operand.vmem [shape: f32[2,1,32], index: 2, kind: input, shape index: {}]   ;;  %s2150_s3 = inlined_call_operand.vmem [shape: f32[2,1,32], index: 3, kind: input, shape index: {}]   ;;  %s2151_s4 = inlined_call_operand.vmem [shape: bf16[2,32,96], index: 4, kind: input, shape index: {}]   ;;  %s2152_s5 = inlined_call_operand.vmem [shape: f32[2,1,96], index: 5, kind: input, shape index: {}]   ;;  %s2153_s6 = inlined_call_operand.vmem [shape: bf16[2,32,32], index: 6, kind: input, shape index: {}]   ;;  %s2154_s7 = inlined_call_operand.vmem [shape: f32[2,1,32], index: 7, kind: input, shape index: {}]   ;;  %s2155_s8 = inlined_call_operand.vmem [shape: f32[2,1,32], index: 8, kind: input, shape index: {}]   ;;  %s2156_s9 = inlined_call_operand.vmem [shape: f32[2,1,32], index: 9, kind: input, shape index: {}]   ;;  %s2157_s10 = inlined_call_operand.vmem [shape: bf16[2,32,64], index: 10, kind: input, shape index: {}]   ;;  %s2158_s11 = inlined_call_operand.vmem [shape: f32[2,1,64], index: 11, kind: input, shape index: {}]   ;;  %s2159_s12 = inlined_call_operand.vmem [shape: bf16[2,64,32], index: 12, kind: input, shape index: {}]   ;;  %s2160_s13 = inlined_call_operand.vmem [shape: f32[2,1,32], index: 13, kind: input, shape index: {}]   ;;  %s2161_s14 = inlined_call_operand.vmem [shape: f32[1,32], index: 14, kind: input, shape index: {}]   ;;  %s2162_s15 = inlined_call_operand.vmem [shape: f32[1,32], index: 15, kind: input, shape index: {}]   ;;  %s2163_s16 = inlined_call_operand.vmem [shape: f32[2,4,32], index: 16, kind: output, shape index: {}]  }
   0x1   :  { %2169 = sst [smem:[#allocation9_spill]] %s2147_s0  ;;  %s1908_s23 = smov 0  }
   0x2   :  { %2170 = sst [smem:[#allocation10_spill]] %s2148_s1  ;;  %s1910_s24 = smov 0  }
   0x3   :  { %2171 = sst [smem:[#allocation11_spill]] %s2151_s4  ;;  %s1912_s25 = smov 0  }
   0x4   :  { %2172 = sst [smem:[#allocation12_spill]] %s2153_s6 }
   0x5   :  { %2173 = sst [smem:[#allocation13_spill]] %s2154_s7 }
   0x6   :  { %2174 = sst [smem:[#allocation14_spill]] %s2155_s8 }
   0x7   :  { %2175 = sst [smem:[#allocation15_spill]] %s2159_s12 }
   0x8   :  { %2176 = sst [smem:[#allocation16_spill]] %s2160_s13 }
   0x9   :  { %2177 = sst [smem:[#allocation17_spill]] %s2161_s14 }
   0xa   :  { %2178 = sst [smem:[#allocation18_spill]] %s2162_s15 }
   0xb   :  { %2179 = sst [smem:[#allocation19_spill]] %s2163_s16 }
   0xc LB: > { %2180 = sst [smem:[#allocation3_spill]] %s1795_s21  ;;  %s35_s26 = sadd.s32 1, %s1803_s23  ;;  %s1811_s25 = sphi %s1912_s25, %s26_s25   ;;  %s1807_s24 = sphi %s1910_s24, %s2214_s24   ;;  %s1803_s23 = sphi %s1908_s23, %s2213_s23   ;;  %s1799_s22 = sphi %s1906_s22, %s2212_s22   ;;  %s1795_s21 = sphi %s1904_s21, %s2211_s21  }
   0xd   : > { %2181 = sst [smem:[#allocation4_spill]] %s1803_s23  ;;  %s38_s27 = sadd.s32 1, %s1807_s24 }
   0xe   : > { %2182 = sst [smem:[#allocation5_spill]] %s1807_s24  ;;  %p36_p0 = scmp.ge.s32.totalorder %s35_s26, 2 }
   0xf   : > { %2183 = sst [smem:[#allocation6_spill]] %s1811_s25  ;;  %p1573_p1 = scmp.ge.s32.totalorder %s1811_s25, 1 }
  0x10   : > { %p585_p2 = scmp.lt.s32.totalorder %s1811_s25, 5  ;;  %s2216_s26 = smov (%p36_p0, %s35_s26), 0 }
  0x11   : > { %2184 = sst [smem:[#allocation7_spill]] %s2216_s26  ;;  %s2218_s27 = smov (!%p36_p0, %s38_s27), %s1807_s24 }
  0x12   : > { %p586_p3 = pnand %p1573_p1, %p585_p2  ;;  %p40_p4 = scmp.ge.s32.totalorder %s2218_s27, 2 }
  0x13   : > { %p680_p5 = scmp.lt.s32.totalorder (!%p586_p3), %s1799_s22, 1  ;;  %p687_p6 = scmp.lt.s32.totalorder (!%p586_p3), %s1795_s21, 1 }
  0x14   : > { %s2220_s27 = smov (%p40_p4, %s2218_s27), 0  ;;  %589 = sbr.rel (%p586_p3) target bundleno = 2837 (0xb15), region = 84 }
  0x15   : > { %2185 = sst [smem:[#allocation8_spill]] %s2220_s27  ;;  %p736_p7 = scmp.eq.s32.totalorder (!%p586_p3), %s1795_s21, 0 }
  0x16   : > { %s2187_s20 = sld [smem:[#allocation9_spill]] (!%p586_p3) }
  0x17   : > { %s2188_s4 = sld [smem:[#allocation11_spill]] (!%p586_p3) }
  0x18   : > { %s2189_s6 = sld [smem:[#allocation12_spill]] (!%p586_p3) }
  0x19   : > { %s2222_s22 = smov (!%p680_p5, %s1799_s22), 1  ;;  %s2192_s15 = sld [smem:[#allocation16_spill]] }
  0x1a   : > { %s1941_s28 = scalar_select %p687_p6, %s1795_s21, 1 }
  0x1b   : > { %s1574_s29 = sshll.u32 %s2222_s22, 2  ;;  %s2193_s23 = sld [smem:[#allocation15_spill]] }
  0x1c   : > { %s683_s27 = scalar_lea.vmem %s2187_s20, %s1574_s29  ;;  %s1617_s21 = sshll.u32 %s1941_s28, 4 }
  0x1d   : > { %s1963_s13 = scalar_lea.vmem %s2188_s4, %s1617_s21  ;;  %s1989_s0 = scalar_lea.vmem %s2157_s10, %s1617_s21 }
  0x1e   : > { %s1972_s20 = scalar_lea.vmem %s2189_s6, %s1617_s21  ;;  %s722_s17 = scalar_lea.vmem %s2158_s11, %s1941_s28 }
  0x1f   : > { %s1620_s6 = sshll.u32 %s1941_s28, 5  ;;  %s730_s7 = scalar_lea.vmem %s2192_s15, %s1941_s28 }
  0x20   : > { %s2194_s4 = sld [smem:[#allocation19_spill]] }
  0x21   : > { %s2003_s8 = scalar_lea.vmem %s2193_s23, %s1620_s6  ;;  %s2195_s21 = sld [smem:[#allocation3_spill]] }
  0x26   : > { %s2008_s1 = scalar_lea.vmem %s2194_s4, %s1574_s29 }
  0x27   : > { %p1584_p8 = scmp.ne.s32.totalorder %s2195_s21, 0 }
  0x29   : > { %739 = sbr.rel (%p1584_p8) target bundleno = 48 (0x30), region = 88 }
  0x2e   : > { %v740_v0 = vld [vmem:[%s683_s27] sm:$0xf]  ;;  %vm741_vm0 = vcmask 257024  }
  0x2f   : > { %742 = vst.msk [vmem:[#allocation2] sm:$0xf] %vm741_vm0, %v740_v0 }
  0x30 PF: > { %vm746_vm1 = vcmask 257024   ;;  %v1749_v8 = vld [vmem:[%s1963_s13 + $0x8] sm:$0xff]   ;;  %s2196_s4 = sld [smem:[#allocation3_spill]]  ;;  %v1813_v9 = vmov 0.0   ;;  %vm1814_vm2 = vmmov 0   ;;  %v1750_v10 = vld [vmem:[%s1963_s13] sm:$0xff]   ;;  %s2197_s27 = scalar_lea.vmem %s2149_s2, %s1941_s28 }
  0x31   : > { %1643 = vmatprep.subr.bf16.mxu0 %v1813_v9  ;;  %1647 = vmatprep.mubr.msk.bf16.mxu0 %vm1814_vm2, %v1813_v9  ;;  %s775_s6 = scalar_select %p736_p7, 1, 0  ;;  %v1585_v15 = vld [vmem:[%s2197_s27] ss:$0 sm:$0xff]  ;;  %vm803_vm4 = vcmask 261120   ;;  %vm857_vm5 = vcmask 130048  }
  0x32   : > { %1644 = vmatpush3.bf16.msra.mxu0 %v1749_v8  ;;  %1651 = vmatprep.subr.bf16.mxu1 %v1813_v9  ;;  %s2198_s30 = scalar_lea.vmem %s2150_s3, %s1941_s28  ;;  %s2199_s24 = scalar_lea.vmem %s2152_s5, %s1941_s28  ;;  %vm963_vm6 = vcmask 27648   ;;  %vm994_vm7 = vcmask 1041408   ;;  %vm990_vm8 = vcmask 31744   ;;  %vm1296_vm9 = vcmask 523264  }
  0x33   : > { %1645 = vmatprep.subr.bf16.mxu0 %v1813_v9  ;;  %1653 = vmatprep.mubr.msk.bf16.mxu1 %vm1814_vm2, %v1813_v9  ;;  %v776_v17 = vstv %s775_s6  ;;  %v1586_v18 = vld [vmem:[%s2198_s30] ss:$0 sm:$0xff]  ;;  %s1815_s26 = smov 112   ;;  %s1816_s14 = smov 96  }
  0x34   : > { %vm777_vm3 = vcmp.eq.s32.totalorder %v776_v17, 1  ;;  %v1587_v23 = vld [vmem:[%s2199_s24] ss:$0 sm:$0xff]  ;;  %s2200_s16 = sld [smem:[#allocation10_spill]]  ;;  %s1818_s6 = smov 16  }
  0x35   : > { %s2202_s13 = sld [smem:[#allocation13_spill]]  ;;  %s2206_s24 = scalar_lea.vmem %s2156_s9, %s1941_s28 }
  0x36   : > { %v2011_v1 = vld [vmem:[#allocation2] sm:$0xf]  ;;  %1646 = vmatpush3.bf16.msra.mxu0 %v1750_v10  ;;  %s2204_s15 = sld [smem:[#allocation14_spill]]  ;;  %p1612_p9 = scmp.ne.s32.totalorder %s2196_s4, 1 }
  0x37   : > { %v747_v2 = vsel %vm746_vm1, %v2011_v1, 0.0  ;;  %1657 = vmatprep.subr.bf16.mxu0 %v1813_v9 }
  0x38   : > { %748 = vadd.xlane.f32.xlu0 %v747_v2 }
  0x3a   : > { %s2201_s21 = scalar_lea.vmem %s2200_s16, %s2222_s22  ;;  %s1817_s22 = smov 64  }
  0x3b   : > { %v1593_v37 = vld [vmem:[%s2201_s21] ss:$0 sm:$0xff]  ;;  %s2203_s27 = scalar_lea.vmem %s2202_s13, %s1941_s28  ;;  %s2209_s21 = sld [smem:[#allocation18_spill]] (!%p1612_p9) }
  0x3c   : > { %s2205_s30 = scalar_lea.vmem %s2204_s15, %s1941_s28  ;;  %s2208_s28 = sld [smem:[#allocation17_spill]] (!%p1612_p9) }
  0xc1   : > { %v749_v3 = vpop.xlane.xlu0 %748 }
  0xc2   : > { %v751_v4 = vmul.f32 0.03125, %v749_v3 }
  0xc4   : > { %v752_v5 = vsub.f32 %v2011_v1, %v751_v4 }
  0xc6   : > { %v753_v6 = vmul.f32 %v752_v5, %v752_v5 }
  0xc8   : > { %v754_v7 = vsel %vm746_vm1, %v753_v6, 0.0 }
  0xc9   : > { %755 = vadd.xlane.f32.xlu0 %v754_v7 }
 0x152   : > { %v756_v11 = vpop.xlane.xlu0 %755 }
 0x153   : > { %v757_v12 = vmul.f32 0.03125, %v756_v11  ;;  %v1751_v11 = vld [vmem:[%s1972_s20 + $0x8] sm:$0xff]  }
 0x155   : > { %v758_v13 = vadd.f32 1e-06, %v757_v12 }
 0x157   : > { %1759 = vrsqrt.f32 %v758_v13 }
 0x164   : > { %v1760_v14 = vpop.eup %1759 }
 0x165   : > { %v760_v16 = vmul.f32 %v1760_v14, %v752_v5 }
 0x167   : > { %v767_v19 = vmul.f32 %v1585_v15, %v760_v16  ;;  %v1752_v16 = vld [vmem:[%s1972_s20] sm:$0xff]  }
 0x169   : > { %v774_v20 = vadd.f32 %v1586_v18, %v767_v19 }
 0x16b   : > { %v778_v21 = vsel %vm777_vm3, %v2011_v1, %v774_v20 }
 0x16c   : > { %v783_v22 = vpack.c.bf16 %v778_v21, %v778_v21 }
 0x16e   : > { %1648 = vmatmul.mubr.msk.bf16.vlgmr.msra.gmra.mxu0 %vm803_vm4, %v783_v22 }
 0x16f   : > { %1659 = vmatprep.mubr.msk.bf16.mxu0 %vm1814_vm2, %v1813_v9 }
 0x22e   : > { %v841_v24 = vpop.f32.mrf.mxu0 }
 0x22f   : > { %v842_v25 = vadd.f32 %v1587_v23, %v841_v24  ;;  %v1596_v24 = vld [vmem:[%s2203_s27] ss:$0 sm:$0xff] }
 0x230   : > { %v1649_v26 = vpop.f32.mrf.mxu0 }
 0x231   : > { %v852_v27 = vpack.c.bf16 %v842_v25, %v842_v25  ;;  %849 = vrot.lane.b32.xlu1 %v842_v25, %s1815_s26 }
 0x232   : > { %v844_v28 = vpop.f32.mrf.mxu0 }
 0x233   : > { %855 = vrot.lane.b32.xlu0 %v852_v27, %s1816_s14 }
 0x234   : > { %v1650_v29 = vpop.f32.mrf.mxu0 }
 0x2a3   : > { %v850_v30 = vpop.permute.xlu1 %849 }
 0x2a4   : > { %v853_v31 = vpack.c.bf16 %v850_v30, %v850_v30 }
 0x2a5   : > { %v856_v32 = vpop.permute.xlu0 %855 }
 0x2a6   : > { %905 = vrot.lane.b32.xlu1 %v853_v31, %s1816_s14  ;;  %v862_v33 = vsel %vm857_vm5, %v856_v32, 0 }
 0x2a7   : > { %1652 = vmatpush3.bf16.xpose.msra.mxu1 %v862_v33 }
 0x2a8   : > { %1663 = vmatprep.subr.bf16.mxu1 %v1813_v9 }
 0x2ae   : > { %1654 = vmatmul.mubr.msk.bf16.vlgmr.msra.gmra.mxu1 %vm857_vm5, %v852_v27 }
 0x2af   : > { %1665 = vmatprep.mubr.msk.bf16.mxu1 %vm1814_vm2, %v1813_v9 }
 0x318   : > { %v906_v34 = vpop.permute.xlu1 %905 }
 0x319   : > { %v911_v35 = vsel %vm857_vm5, %v906_v34, 0 }
 0x31a   : > { %1658 = vmatpush3.bf16.xpose.msra.mxu0 %v911_v35 }
 0x31b   : > { %1669 = vmatprep.subr.bf16.mxu0 %v1813_v9 }
 0x321   : > { %1660 = vmatmul.mubr.msk.bf16.vlgmr.msra.gmra.mxu0 %vm857_vm5, %v853_v31 }
 0x322   : > { %1671 = vmatprep.mubr.msk.bf16.mxu0 %vm1814_vm2, %v1813_v9 }
 0x36e   : > { %v898_v36 = vpop.f32.mrf.mxu1 }
 0x36f   : > { %v953_v38 = vmul.f32 0.25, %v898_v36 }
 0x370   : > { %v1655_v39 = vpop.f32.mrf.mxu1 }
 0x371   : > { %v961_v40 = vadd.f32 %v1593_v37, %v953_v38  ;;  %v1754_v38 = vld [vmem:[%s1989_s0] sm:$0xff]   ;;  %v1756_v39 = vld [vmem:[%s2003_s8 + $0x10] sm:$0xff]  }
 0x372   : > { %v901_v41 = vpop.f32.mrf.mxu1 }
 0x373   : > { %v964_v42 = vsel %vm963_vm6, %v961_v40, -inf }
 0x374   : > { %965 = vmax.xlane.f32.xlu0 %v964_v42  ;;  %v1656_v43 = vpop.f32.mrf.mxu1 }
 0x3e1   : > { %v947_v44 = vpop.f32.mrf.mxu0 }
 0x3e2   : > { %v954_v45 = vmul.f32 0.25, %v947_v44  ;;  %v1600_v44 = vld [vmem:[%s2205_s30] ss:$0 sm:$0xff] }
 0x3e3   : > { %v1661_v46 = vpop.f32.mrf.mxu0 }
 0x3e4   : > { %v962_v47 = vadd.f32 %v1593_v37, %v954_v45  ;;  %v1753_v37 = vld [vmem:[%s1989_s0 + $0x8] sm:$0xff]   ;;  %v1601_v46 = vld [vmem:[%s2206_s24] ss:$0 sm:$0xff] }
 0x3e5   : > { %v950_v48 = vpop.f32.mrf.mxu0 }
 0x3e6   : > { %v967_v49 = vsel %vm963_vm6, %v962_v47, -inf }
 0x3e7   : > { %968 = vmax.xlane.f32.xlu1 %v967_v49  ;;  %v1662_v50 = vpop.f32.mrf.mxu0 }
 0x3e8   : > { %v1757_v50 = vld [vmem:[%s2003_s8 + $0x8] sm:$0xff]  }
 0x3fd   : > { %v966_v51 = vpop.xlane.xlu0 %965 }
 0x3fe   : > { %v970_v52 = vsub.f32 %v961_v40, %v966_v51  ;;  %v1758_v51 = vld [vmem:[%s2003_s8] sm:$0xff]  }
 0x400   : > { %v972_v53 = vmul.f32 1.442695, %v970_v52  ;;  %v1602_v52 = vld [vmem:[%s722_s17] ss:$0 sm:$0xff] }
 0x402   : > { %1761 = vpow2.f32 %v972_v53 }
 0x40f   : > { %v1762_v54 = vpop.eup %1761 }
 0x410   : > { %v976_v55 = vsel %vm963_vm6, %v1762_v54, 0.0 }
 0x411   : > { %977 = vadd.xlane.f32.xlu0 %v976_v55 }
 0x427   : > { %988 = vrot.lane.b32.xlu0 %v852_v27, %s1817_s22 }
 0x470   : > { %v969_v56 = vpop.xlane.xlu1 %968 }
 0x471   : > { %v971_v57 = vsub.f32 %v962_v47, %v969_v56 }
 0x473   : > { %v974_v58 = vmul.f32 1.442695, %v971_v57 }
 0x475   : > { %1763 = vpow2.f32 %v974_v58 }
 0x482   : > { %v1764_v59 = vpop.eup %1763 }
 0x483   : > { %v979_v60 = vsel %vm963_vm6, %v1764_v59, 0.0 }
 0x484   : > { %980 = vadd.xlane.f32.xlu1 %v979_v60 }
 0x495   : > { %1038 = vrot.lane.b32.xlu1 %v853_v31, %s1817_s22 }
 0x49a   : > { %v978_v61 = vpop.xlane.xlu0 %977 }
 0x49b   : > { %1765 = vrcp.f32 %v978_v61 }
 0x49e   : > { %v989_v62 = vpop.permute.xlu0 %988 }
 0x49f   : > { %v996_v63 = vsel %vm994_vm7, %v989_v62, 0 }
 0x4a0   : > { %1664 = vmatpush3.bf16.msra.mxu1 %v996_v63 }
 0x4a1   : > { %1675 = vmatprep.subr.bf16.mxu1 %v1813_v9 }
 0x4a8   : > { %v1766_v0 = vpop.eup %1765 }
 0x4a9   : > { %v984_v2 = vmul.f32 %v1766_v0, %v1762_v54 }
 0x4ab   : > { %v986_v3 = vpack.c.bf16 %v984_v2, %v984_v2 }
 0x4ad   : > { %1666 = vmatmul.mubr.msk.bf16.vlgmr.msra.gmra.mxu1 %vm990_vm8, %v986_v3 }
 0x4ae   : > { %1679 = vmatprep.mubr.msk.bf16.mxu1 %vm1814_vm2, %v1813_v9  ;;  %1676 = vmatpush3.bf16.msra.mxu1 %v1751_v11 }
 0x4af   : > { %1677 = vmatprep.subr.bf16.mxu1 %v1813_v9 }
 0x4b2   : > { %1678 = vmatpush3.bf16.msra.mxu1 %v1752_v16 }
 0x4b3   : > { %1691 = vmatprep.subr.bf16.mxu1 %v1813_v9 }
 0x50d   : > { %v981_v4 = vpop.xlane.xlu1 %980 }
 0x50e   : > { %1767 = vrcp.f32 %v981_v4 }
 0x511   : > { %v1039_v5 = vpop.permute.xlu1 %1038 }
 0x512   : > { %v1044_v6 = vsel %vm994_vm7, %v1039_v5, 0 }
 0x513   : > { %1670 = vmatpush3.bf16.msra.mxu0 %v1044_v6 }
 0x514   : > { %1683 = vmatprep.subr.bf16.mxu0 %v1813_v9 }
 0x51b   : > { %v1768_v7 = vpop.eup %1767 }
 0x51c   : > { %v985_v8 = vmul.f32 %v1768_v7, %v1764_v59 }
 0x51e   : > { %v987_v10 = vpack.c.bf16 %v985_v8, %v985_v8 }
 0x520   : > { %1672 = vmatmul.mubr.msk.bf16.vlgmr.msra.gmra.mxu0 %vm990_vm8, %v987_v10 }
 0x521   : > { %1687 = vmatprep.mubr.msk.bf16.mxu0 %vm1814_vm2, %v1813_v9  ;;  %1684 = vmatpush3.bf16.msra.mxu0 %v1753_v37 }
 0x522   : > { %1685 = vmatprep.subr.bf16.mxu0 %v1813_v9 }
 0x525   : > { %1686 = vmatpush3.bf16.msra.mxu0 %v1754_v38 }
 0x56d   : > { %v1032_v12 = vpop.f32.mrf.mxu1 }
 0x56f   : > { %v1667_v13 = vpop.f32.mrf.mxu1 }
 0x571   : > { %v1035_v14 = vpop.f32.mrf.mxu1 }
 0x573   : > { %v1668_v15 = vpop.f32.mrf.mxu1 }
 0x5e0   : > { %v1080_v17 = vpop.f32.mrf.mxu0 }
 0x5e1   : > { %1087 = vrot.lane.b32.xlu1 %v1080_v17, %s1818_s6 }
 0x5e2   : > { %v1673_v18 = vpop.f32.mrf.mxu0 }
 0x5e4   : > { %v1083_v19 = vpop.f32.mrf.mxu0 }
 0x5e6   : > { %v1674_v20 = vpop.f32.mrf.mxu0 }
 0x653   : > { %v1088_v21 = vpop.permute.xlu1 %1087 }
 0x654   : > { %v1090_v22 = vsel %vm857_vm5, %v1032_v12, %v1088_v21 }
 0x655   : > { %v1095_v23 = vpack.c.bf16 %v1090_v22, %v1090_v22 }
 0x657   : > { %1680 = vmatmul.mubr.msk.bf16.vlgmr.msra.gmra.mxu1 %vm803_vm4, %v1095_v23 }
 0x658   : > { %1699 = vmatprep.mubr.msk.bf16.mxu1 %vm1814_vm2, %v1813_v9 }
 0x717   : > { %v1152_v25 = vpop.f32.mrf.mxu1 }
 0x718   : > { %v1153_v26 = vadd.f32 %v1596_v24, %v1152_v25 }
 0x719   : > { %v1681_v27 = vpop.f32.mrf.mxu1 }
 0x71a   : > { %v1158_v28 = vadd.f32 %v1153_v26, %v2011_v1  ;;  %v1755_v1 = vld [vmem:[%s2003_s8 + $0x18] sm:$0xff]  }
 0x71b   : > { %v1155_v29 = vpop.f32.mrf.mxu1  ;;  %1692 = vmatpush3.bf16.msra.mxu1 %v1755_v1 }
 0x71c   : > { %v1161_v30 = vsel %vm746_vm1, %v1158_v28, 0.0  ;;  %1693 = vmatprep.subr.bf16.mxu1 %v1813_v9 }
 0x71d   : > { %1162 = vadd.xlane.f32.xlu1 %v1161_v30  ;;  %v1682_v31 = vpop.f32.mrf.mxu1 }
 0x71f   : > { %1694 = vmatpush3.bf16.msra.mxu1 %v1756_v39 }
 0x720   : > { %1695 = vmatprep.subr.bf16.mxu1 %v1813_v9 }
 0x723   : > { %1696 = vmatpush3.bf16.msra.mxu1 %v1757_v50 }
 0x724   : > { %1697 = vmatprep.subr.bf16.mxu1 %v1813_v9  ;;  %v1606_v9 = vld [vmem:[%s730_s7] ss:$0 sm:$0xff] }
 0x727   : > { %1698 = vmatpush3.bf16.msra.mxu1 %v1758_v51 }
 0x7a6   : > { %v1163_v32 = vpop.xlane.xlu1 %1162 }
 0x7a7   : > { %v1164_v33 = vmul.f32 0.03125, %v1163_v32 }
 0x7a9   : > { %v1165_v34 = vsub.f32 %v1158_v28, %v1164_v33 }
 0x7ab   : > { %v1166_v35 = vmul.f32 %v1165_v34, %v1165_v34 }
 0x7ad   : > { %v1167_v36 = vsel %vm746_vm1, %v1166_v35, 0.0 }
 0x7ae   : > { %1168 = vadd.xlane.f32.xlu0 %v1167_v36 }
 0x837   : > { %v1169_v40 = vpop.xlane.xlu0 %1168 }
 0x838   : > { %v1170_v41 = vmul.f32 0.03125, %v1169_v40 }
 0x83a   : > { %v1171_v42 = vadd.f32 1e-06, %v1170_v41 }
 0x83c   : > { %1769 = vrsqrt.f32 %v1171_v42 }
 0x849   : > { %v1770_v43 = vpop.eup %1769 }
 0x84a   : > { %v1173_v45 = vmul.f32 %v1770_v43, %v1165_v34 }
 0x84c   : > { %v1180_v47 = vmul.f32 %v1600_v44, %v1173_v45 }
 0x84e   : > { %v1187_v48 = vadd.f32 %v1601_v46, %v1180_v47 }
 0x850   : > { %v1192_v49 = vpack.c.bf16 %v1187_v48, %v1187_v48 }
 0x852   : > { %1688 = vmatmul.mubr.msk.bf16.vlgmr.msra.gmra.mxu0 %vm803_vm4, %v1192_v49 }
 0x912   : > { %v1249_v53 = vpop.f32.mrf.mxu0 }
 0x913   : > { %v1250_v54 = vadd.f32 %v1602_v52, %v1249_v53 }
 0x914   : > { %v1689_v55 = vpop.f32.mrf.mxu0 }
 0x915   : > { %v1255_v56 = vmax.f32 %v1250_v54, 0.0 }
 0x916   : > { %v1252_v57 = vpop.f32.mrf.mxu0 }
 0x917   : > { %v1264_v58 = vpack.c.bf16 %v1255_v56, %v1255_v56 }
 0x918   : > { %v1690_v59 = vpop.f32.mrf.mxu0 }
 0x919   : > { %1700 = vmatmul.mubr.msk.bf16.vlgmr.msra.gmra.mxu1 %vm1296_vm9, %v1264_v58 }
 0x9d9   : > { %v1334_v60 = vpop.f32.mrf.mxu1 }
 0x9da   : > { %v1335_v61 = vadd.f32 %v1606_v9, %v1334_v60 }
 0x9db   : > { %v1701_v62 = vpop.f32.mrf.mxu1  ;;  %1345 = sbr.rel (%p1612_p9) target bundleno = 2837 (0xb15), region = 92 }
 0x9dc   : > { %v1340_v63 = vadd.f32 %v1335_v61, %v1158_v28 }
 0x9dd   : > { %v1337_v0 = vpop.f32.mrf.mxu1 }
 0x9de   : > { %1341 = vst.msk [vmem:[#allocation2] sm:$0xf] %vm746_vm1, %v1340_v63 }
 0x9df   : > { %v1702_v2 = vpop.f32.mrf.mxu1 }
 0x9e0   : > { %v1348_v3 = vsel %vm746_vm1, %v1340_v63, 0.0  ;;  %v1613_v14 = vld [vmem:[%s2208_s28] ss:$0 sm:$0xff] }
 0x9e1   : > { %1349 = vadd.xlane.f32.xlu0 %v1348_v3  ;;  %v1614_v16 = vld [vmem:[%s2209_s21] ss:$0 sm:$0xff] }
 0xa6a   : > { %v1350_v4 = vpop.xlane.xlu0 %1349 }
 0xa6b   : > { %v1351_v5 = vmul.f32 0.03125, %v1350_v4 }
 0xa6d   : > { %v1352_v6 = vsub.f32 %v1340_v63, %v1351_v5 }
 0xa6f   : > { %v1353_v7 = vmul.f32 %v1352_v6, %v1352_v6 }
 0xa71   : > { %v1354_v8 = vsel %vm746_vm1, %v1353_v7, 0.0 }
 0xa72   : > { %1355 = vadd.xlane.f32.xlu0 %v1354_v8 }
 0xafb   : > { %v1356_v10 = vpop.xlane.xlu0 %1355 }
 0xafc   : > { %v1357_v11 = vmul.f32 0.03125, %v1356_v10 }
 0xafe   : > { %v1358_v12 = vadd.f32 1e-06, %v1357_v11 }
 0xb00   : > { %1771 = vrsqrt.f32 %v1358_v12 }
 0xb0d   : > { %v1772_v13 = vpop.eup %1771 }
 0xb0e   : > { %v1360_v15 = vmul.f32 %v1772_v13, %v1352_v6 }
 0xb10   : > { %v1367_v17 = vmul.f32 %v1613_v14, %v1360_v15 }
 0xb12   : > { %v1374_v18 = vadd.f32 %v1614_v16, %v1367_v17 }
 0xb14   : > { %1375 = vst.msk [vmem:[%s2008_s1] sm:$0xf] %vm746_vm1, %v1374_v18 }
 0xb15 PF: > { %s2210_s22 = sld [smem:[#allocation6_spill]] }
 0xb16   : > { %s2211_s21 = sld [smem:[#allocation4_spill]] }
 0xb17   : > { %s2213_s23 = sld [smem:[#allocation7_spill]] }
 0xb18   : > { %s2214_s24 = sld [smem:[#allocation8_spill]] }
 0xb1b   : > { %s26_s25 = sadd.s32 1, %s2210_s22   ;;  %s2212_s22 = sld [smem:[#allocation5_spill]] }
 0xb1c   : > { %p23_p10 = scmp.ge.s32.totalorder %s26_s25, 6  }
 0xb1e   :  { %25 = sbr.rel (!%p23_p10) target bundleno = 12 (0xc), region = 161 }

// kernel: model_forward.3
= control target key start
LH: loop header
LB: loop body
LE: loop exit
PB: predicated region body
PF: predicated region fallthrough
CT: control target
= control target key end

     0   :  { %s3114_s21 = smov 0   ;;  %s3116_s22 = smov 0   ;;  %s3696_s0 = inlined_call_operand.vmem [shape: f32[6,16,32], index: 0, kind: input, shape index: {}]   ;;  %s3697_s1 = inlined_call_operand.vmem [shape: f32[6,1,16], index: 1, kind: input, shape index: {}]   ;;  %s3698_s2 = inlined_call_operand.vmem [shape: f32[2,1,32], index: 2, kind: input, shape index: {}]   ;;  %s3699_s3 = inlined_call_operand.vmem [shape: f32[2,1,32], index: 3, kind: input, shape index: {}]   ;;  %s3700_s4 = inlined_call_operand.vmem [shape: bf16[2,32,96], index: 4, kind: input, shape index: {}]   ;;  %s3701_s5 = inlined_call_operand.vmem [shape: f32[2,1,96], index: 5, kind: input, shape index: {}]   ;;  %s3702_s6 = inlined_call_operand.vmem [shape: bf16[2,32,32], index: 6, kind: input, shape index: {}]   ;;  %s3703_s7 = inlined_call_operand.vmem [shape: f32[2,1,32], index: 7, kind: input, shape index: {}]   ;;  %s3704_s8 = inlined_call_operand.vmem [shape: f32[2,1,32], index: 8, kind: input, shape index: {}]   ;;  %s3705_s9 = inlined_call_operand.vmem [shape: f32[2,1,32], index: 9, kind: input, shape index: {}]   ;;  %s3706_s10 = inlined_call_operand.vmem [shape: bf16[2,32,64], index: 10, kind: input, shape index: {}]   ;;  %s3707_s11 = inlined_call_operand.vmem [shape: f32[2,1,64], index: 11, kind: input, shape index: {}]   ;;  %s3708_s12 = inlined_call_operand.vmem [shape: bf16[2,64,32], index: 12, kind: input, shape index: {}]   ;;  %s3709_s13 = inlined_call_operand.vmem [shape: f32[2,1,32], index: 13, kind: input, shape index: {}]   ;;  %s3710_s14 = inlined_call_operand.vmem [shape: f32[1,32], index: 14, kind: input, shape index: {}]   ;;  %s3711_s15 = inlined_call_operand.vmem [shape: f32[1,32], index: 15, kind: input, shape index: {}]   ;;  %s3712_s16 = inlined_call_operand.vmem [shape: f32[6,16,32], index: 16, kind: output, shape index: {}]  }
   0x1   :  { %3719 = sst [smem:[#allocation10_spill]] %s3696_s0  ;;  %s3118_s23 = smov 0  }
   0x2   :  { %3720 = sst [smem:[#allocation11_spill]] %s3697_s1  ;;  %s3120_s24 = smov 0  }
   0x3   :  { %3721 = sst [smem:[#allocation12_spill]] %s3700_s4  ;;  %s3122_s25 = smov 0  }
   0x4   :  { %3722 = sst [smem:[#allocation13_spill]] %s3702_s6 }
   0x5   :  { %3723 = sst [smem:[#allocation14_spill]] %s3704_s8 }
   0x6   :  { %3724 = sst [smem:[#allocation15_spill]] %s3708_s12 }
   0x7   :  { %3725 = sst [smem:[#allocation16_spill]] %s3710_s14 }
   0x8   :  { %3726 = sst [smem:[#allocation17_spill]] %s3711_s15 }
   0x9   :  { %3727 = sst [smem:[#allocation18_spill]] %s3712_s16 }
   0xa LB: > { %3728 = sst [smem:[#allocation3_spill]] %s3005_s21  ;;  %s35_s26 = sadd.s32 1, %s3013_s23  ;;  %s3021_s25 = sphi %s3122_s25, %s26_s25   ;;  %s3017_s24 = sphi %s3120_s24, %s3760_s24   ;;  %s3013_s23 = sphi %s3118_s23, %s3759_s23   ;;  %s3009_s22 = sphi %s3116_s22, %s3758_s22   ;;  %s3005_s21 = sphi %s3114_s21, %s3757_s21  }
   0xb   : > { %3729 = sst [smem:[#allocation4_spill]] %s3013_s23  ;;  %s38_s27 = sadd.s32 1, %s3017_s24 }
   0xc   : > { %3730 = sst [smem:[#allocation5_spill]] %s3017_s24  ;;  %p36_p0 = scmp.ge.s32.totalorder %s35_s26, 2 }
   0xd   : > { %3731 = sst [smem:[#allocation6_spill]] %s3021_s25  ;;  %p2550_p1 = scmp.ge.s32.totalorder %s3021_s25, 1 }
   0xe   : > { %p590_p2 = scmp.lt.s32.totalorder %s3021_s25, 5  ;;  %s3762_s26 = smov (%p36_p0, %s35_s26), 0 }
   0xf   : > { %3732 = sst [smem:[#allocation7_spill]] %s3762_s26  ;;  %s3764_s27 = smov (!%p36_p0, %s38_s27), %s3017_s24 }
  0x10   : > { %p591_p3 = pnand %p2550_p1, %p590_p2  ;;  %p40_p4 = scmp.ge.s32.totalorder %s3764_s27, 2 }
  0x12   : > { %s3766_s27 = smov (%p40_p4, %s3764_s27), 0  ;;  %594 = sbr.rel (%p591_p3) target bundleno = 4000 (0xfa0), region = 84 }
  0x13   : > { %3733 = sst [smem:[#allocation8_spill]] %s3766_s27 }
  0x17   : > { %s690_s28 = smul.u32 3, %s3009_s22  ;;  %p702_p5 = scmp.lt.s32.totalorder %s3005_s21, 1 }
  0x18   : > { %p754_p6 = scmp.eq.s32.totalorder %s3005_s21, 0  ;;  %s3734_s1 = sld [smem:[#allocation11_spill]] }
  0x19   : > { %p691_p7 = scmp.lt.s32.totalorder %s690_s28, 5  ;;  %s3736_s15 = sld [smem:[#allocation10_spill]] }
  0x1a   : > { %s3149_s29 = scalar_select %p702_p5, %s3005_s21, 1 }
  0x1b   : > { %s3768_s28 = smov (!%p691_p7, %s690_s28), 5  ;;  %s3737_s4 = sld [smem:[#allocation12_spill]] }
  0x1c   : > { %s2616_s22 = sshll.u32 %s3768_s28, 4  ;;  %s2617_s21 = sshll.u32 %s3149_s29, 4 }
  0x1d   : > { %s3738_s6 = sld [smem:[#allocation13_spill]]  ;;  %s3197_s0 = scalar_lea.vmem %s3706_s10, %s2617_s21 }
  0x1e   : > { %s3162_s24 = scalar_lea.vmem %s3734_s1, %s3768_s28  ;;  %s737_s18 = scalar_lea.vmem %s3707_s11, %s3149_s29 }
  0x1f   : > { %3735 = sst [smem:[#allocation9_spill]] %s3162_s24  ;;  %s695_s14 = scalar_lea.vmem %s3736_s15, %s2616_s22 }
  0x20   : > { %s745_s23 = scalar_lea.vmem %s3709_s13, %s3149_s29  ;;  %s3740_s1 = sld [smem:[#allocation15_spill]] }
  0x21   : > { %s3171_s30 = scalar_lea.vmem %s3737_s4, %s2617_s21  ;;  %s3741_s4 = sld [smem:[#allocation18_spill]] }
  0x23   : > { %s3180_s26 = scalar_lea.vmem %s3738_s6, %s2617_s21  ;;  %s2620_s6 = sshll.u32 %s3149_s29, 5 }
  0x24   : > { %s3742_s21 = sld [smem:[#allocation3_spill]] }
  0x26   : > { %s3211_s8 = scalar_lea.vmem %s3740_s1, %s2620_s6 }
  0x27   : > { %s3216_s24 = scalar_lea.vmem %s3741_s4, %s2616_s22 }
  0x2a   : > { %p2563_p8 = scmp.ne.s32.totalorder %s3742_s21, 0 }
  0x2c   : > { %757 = sbr.rel (%p2563_p8) target bundleno = 53 (0x35), region = 88 }
  0x31   : > { %v758_v0 = vld [vmem:[%s695_s14] sm:$0xff]  ;;  %vm764_vm0 = vcmask 261120   ;;  %v759_v1 = vld [vmem:[%s695_s14 + $0x8] sm:$0xff]  ;;  %v760_v2 = vld [vmem:[%s695_s14 + $0x10] sm:$0xff] }
  0x32   : > { %765 = vst.msk [vmem:[#allocation2] sm:$0xff] %vm764_vm0, %v758_v0  ;;  %766 = vst.msk [vmem:[#allocation2 + $0x8] sm:$0xff] %vm764_vm0, %v759_v1  ;;  %v761_v3 = vld [vmem:[%s695_s14 + $0x18] sm:$0xff]  ;;  %v762_v4 = vld [vmem:[%s695_s14 + $0x20] sm:$0xff] }
  0x33   : > { %767 = vst.msk [vmem:[#allocation2 + $0x10] sm:$0xff] %vm764_vm0, %v760_v2  ;;  %v763_v5 = vld [vmem:[%s695_s14 + $0x28] sm:$0xff]  ;;  %768 = vst.msk [vmem:[#allocation2 + $0x18] sm:$0xff] %vm764_vm0, %v761_v3 }
  0x34   : > { %769 = vst.msk [vmem:[#allocation2 + $0x20] sm:$0xff] %vm764_vm0, %v762_v4  ;;  %770 = vst.msk [vmem:[#allocation2 + $0x28] sm:$0xff] %vm764_vm0, %v763_v5 }
  0x35 PF: > { %vm779_vm1 = vcmask 261120   ;;  %v2884_v20 = vld [vmem:[%s3171_s30 + $0x8] sm:$0xff]   ;;  %v3023_v21 = vmov 0.0   ;;  %vm3024_vm2 = vmmov 0   ;;  %v2885_v22 = vld [vmem:[%s3171_s30] sm:$0xff]   ;;  %s3743_s1 = sld [smem:[#allocation3_spill]]  ;;  %s3744_s14 = scalar_lea.vmem %s3698_s2, %s3149_s29 }
  0x36   : > { %2668 = vmatprep.subr.bf16.mxu0 %v3023_v21  ;;  %2672 = vmatprep.mubr.msk.bf16.mxu0 %vm3024_vm2, %v3023_v21  ;;  %v3262_v38 = vld [vmem:[%s3744_s14] ss:$0 sm:$0xff]  ;;  %s883_s22 = scalar_select %p754_p6, 1, 0  ;;  %vm998_vm4 = vcmask 130048   ;;  %vm2154_vm5 = vcmask 523264  }
  0x37   : > { %2669 = vmatpush3.bf16.msra.mxu0 %v2884_v20  ;;  %2690 = vmatprep.subr.bf16.mxu1 %v3023_v21  ;;  %s3745_s20 = scalar_lea.vmem %s3699_s3, %s3149_s29  ;;  %s3748_s28 = scalar_lea.vmem %s3701_s5, %s3149_s29 }
  0x38   : > { %2670 = vmatprep.subr.bf16.mxu0 %v3023_v21  ;;  %2692 = vmatprep.mubr.msk.bf16.mxu1 %vm3024_vm2, %v3023_v21  ;;  %v3272_v42 = vld [vmem:[%s3745_s20] ss:$0 sm:$0xff]  ;;  %v884_v44 = vstv %s883_s22  ;;  %s3025_s15 = smov 112   ;;  %s3026_s25 = smov 96  }
  0x39   : > { %v3219_v6 = vld [vmem:[#allocation2] sm:$0xff]  ;;  %v3221_v7 = vld [vmem:[#allocation2 + $0x8] sm:$0xff]  ;;  %vm3276_vm3 = vcmp.eq.s32.totalorder %v884_v44, 1  ;;  %s3749_s12 = sld [smem:[#allocation9_spill]]  ;;  %s3027_s16 = smov 64  }
  0x3a   : > { %v780_v8 = vsel %vm779_vm1, %v3219_v6, 0.0  ;;  %v783_v9 = vsel %vm779_vm1, %v3221_v7, 0.0  ;;  %v3241_v23 = vld [vmem:[#allocation2 + $0x10] sm:$0xff]  ;;  %v3243_v24 = vld [vmem:[#allocation2 + $0x18] sm:$0xff]  ;;  %v3295_v53 = vld [vmem:[%s3748_s28] ss:$0 sm:$0xff]  ;;  %s3750_s6 = scalar_lea.vmem %s3703_s7, %s3149_s29  ;;  %s3753_s19 = scalar_lea.vmem %s3705_s9, %s3149_s29 }
  0x3b   : > { %781 = vadd.xlane.f32.xlu0 %v780_v8  ;;  %2671 = vmatpush3.bf16.msra.mxu0 %v2885_v22  ;;  %v3245_v25 = vld [vmem:[#allocation2 + $0x20] sm:$0xff]  ;;  %v786_v26 = vsel %vm779_vm1, %v3241_v23, 0.0  ;;  %v789_v27 = vsel %vm779_vm1, %v3243_v24, 0.0  ;;  %v3253_v29 = vld [vmem:[#allocation2 + $0x28] sm:$0xff]  ;;  %s3028_s21 = smov 16   ;;  %s3751_s22 = sld [smem:[#allocation14_spill]] }
  0x3c   : > { %2684 = vmatprep.subr.bf16.mxu0 %v3023_v21  ;;  %v792_v28 = vsel %vm779_vm1, %v3245_v25, 0.0  ;;  %v795_v30 = vsel %vm779_vm1, %v3253_v29, 0.0  ;;  %p2611_p9 = scmp.ne.s32.totalorder %s3743_s1, 1 }
  0x3d   : > { %s3754_s1 = sld [smem:[#allocation16_spill]] (!%p2611_p9) }
  0x3f   : > { %784 = vadd.xlane.f32.xlu0 %v783_v9 }
  0x41   : > { %s3752_s30 = scalar_lea.vmem %s3751_s22, %s3149_s29 }
  0x43   : > { %787 = vadd.xlane.f32.xlu0 %v786_v26 }
  0xc4   : > { %v782_v10 = vpop.xlane.xlu0 %781 }
  0xc5   : > { %v799_v11 = vmul.f32 0.03125, %v782_v10 }
  0xc7   : > { %v805_v12 = vsub.f32 %v3219_v6, %v799_v11 }
  0xc8   : > { %v785_v13 = vpop.xlane.xlu0 %784 }
  0xc9   : > { %v800_v14 = vmul.f32 0.03125, %v785_v13  ;;  %v811_v15 = vmul.f32 %v805_v12, %v805_v12 }
  0xcb   : > { %v806_v16 = vsub.f32 %v3221_v7, %v800_v14  ;;  %v817_v17 = vsel %vm779_vm1, %v811_v15, 0.0 }
  0xcc   : > { %818 = vadd.xlane.f32.xlu1 %v817_v17  ;;  %v788_v61 = vpop.xlane.xlu0 %787 }
  0xcd   : > { %v812_v18 = vmul.f32 %v806_v16, %v806_v16  ;;  %v801_v63 = vmul.f32 0.03125, %v788_v61 }
  0xcf   : > { %v820_v19 = vsel %vm779_vm1, %v812_v18, 0.0  ;;  %v3301_v0 = vsub.f32 %v3241_v23, %v801_v63 }
  0xd0   : > { %821 = vadd.xlane.f32.xlu1 %v820_v19 }
  0xd1   : > { %v813_v5 = vmul.f32 %v3301_v0, %v3301_v0 }
  0xd4   : > { %790 = vadd.xlane.f32.xlu1 %v789_v27 }
  0xd8   : > { %793 = vadd.xlane.f32.xlu1 %v792_v28 }
  0xdc   : > { %796 = vadd.xlane.f32.xlu1 %v795_v30 }
 0x155   : > { %v819_v31 = vpop.xlane.xlu1 %818 }
 0x156   : > { %v835_v32 = vmul.f32 0.03125, %v819_v31 }
 0x158   : > { %v841_v33 = vadd.f32 1e-06, %v835_v32 }
 0x159   : > { %v822_v34 = vpop.xlane.xlu1 %821 }
 0x15a   : > { %2894 = vrsqrt.f32 %v841_v33  ;;  %v836_v35 = vmul.f32 0.03125, %v822_v34 }
 0x15c   : > { %v842_v36 = vadd.f32 1e-06, %v836_v35 }
 0x15d   : > { %v791_v60 = vpop.xlane.xlu1 %790 }
 0x15e   : > { %2896 = vrsqrt.f32 %v842_v36  ;;  %v802_v17 = vmul.f32 0.03125, %v791_v60 }
 0x160   : > { %v808_v18 = vsub.f32 %v3243_v24, %v802_v17 }
 0x161   : > { %v794_v62 = vpop.xlane.xlu1 %793 }
 0x162   : > { %v803_v1 = vmul.f32 0.03125, %v794_v62  ;;  %v814_v19 = vmul.f32 %v808_v18, %v808_v18 }
 0x164   : > { %v809_v3 = vsub.f32 %v3245_v25, %v803_v1  ;;  %v826_v20 = vsel %vm779_vm1, %v814_v19, 0.0 }
 0x165   : > { %v797_v2 = vpop.xlane.xlu1 %796 }
 0x166   : > { %v804_v4 = vmul.f32 0.03125, %v797_v2  ;;  %v815_v8 = vmul.f32 %v809_v3, %v809_v3 }
 0x167   : > { %v2895_v37 = vpop.eup %2894 }
 0x168   : > { %v853_v39 = vmul.f32 %v2895_v37, %v805_v12  ;;  %v829_v9 = vsel %vm779_vm1, %v815_v8, 0.0 }
 0x16a   : > { %v865_v40 = vmul.f32 %v3262_v38, %v853_v39 }
 0x16b   : > { %v2897_v41 = vpop.eup %2896 }
 0x16c   : > { %v854_v43 = vmul.f32 %v2897_v41, %v806_v16  ;;  %v877_v46 = vadd.f32 %v3272_v42, %v865_v40 }
 0x16e   : > { %v866_v45 = vmul.f32 %v3262_v38, %v854_v43  ;;  %v886_v49 = vsel %vm3276_vm3, %v3219_v6, %v877_v46  ;;  %v810_v6 = vsub.f32 %v3253_v29, %v804_v4 }
 0x170   : > { %v878_v48 = vadd.f32 %v3272_v42, %v866_v45  ;;  %v816_v10 = vmul.f32 %v810_v6, %v810_v6 }
 0x172   : > { %v887_v50 = vsel %vm3276_vm3, %v3221_v7, %v878_v48  ;;  %v823_v7 = vsel %vm779_vm1, %v813_v5, 0.0  ;;  %v832_v11 = vsel %vm779_vm1, %v816_v10, 0.0 }
 0x173   : > { %v896_v51 = vpack.c.bf16 %v887_v50, %v886_v49 }
 0x175   : > { %2673 = vmatmul.mubr.msk.bf16.vlgmr.msra.gmra.mxu0 %vm779_vm1, %v896_v51 }
 0x176   : > { %2676 = vmatprep.mubr.msk.bf16.mxu0 %vm3024_vm2, %v3023_v21 }
 0x235   : > { %v961_v52 = vpop.f32.mrf.mxu0 }
 0x236   : > { %v962_v56 = vadd.f32 %v3295_v53, %v961_v52 }
 0x237   : > { %v2674_v54 = vpop.f32.mrf.mxu0 }
 0x239   : > { %v964_v55 = vpop.f32.mrf.mxu0 }
 0x23a   : > { %v965_v57 = vadd.f32 %v3295_v53, %v964_v55 }
 0x23b   : > { %v2675_v58 = vpop.f32.mrf.mxu0 }
 0x23c   : > { %v2854_v59 = vpack.i.bf16 %v965_v57, %v962_v56  ;;  %v3310_v12 = vpack.c.bf16 %v965_v57, %v962_v56 }
 0x23e   : > { %2855 = vrot.lane.b32.xlu0 %v2854_v59, %s3025_s15 }
 0x25d   : > { %824 = vadd.xlane.f32.xlu0 %v823_v7 }
 0x261   : > { %830 = vadd.xlane.f32.xlu0 %v829_v9 }
 0x265   : > { %833 = vadd.xlane.f32.xlu0 %v832_v11 }
 0x27b   : > { %996 = vrot.lane.b32.xlu0 %v3310_v12, %s3026_s25 }
 0x2b0   : > { %v2856_v13 = vpop.permute.xlu0 %2855 }
 0x2b1   : > { %v2858_v14 = vunpack.i.h.bf16 %v2856_v13  ;;  %v2857_v15 = vunpack.i.l.bf16 %v2856_v13 }
 0x2b3   : > { %v3314_v16 = vpack.c.bf16 %v2858_v14, %v2857_v15 }
 0x2b5   : > { %1047 = vrot.lane.b32.xlu1 %v3314_v16, %s3026_s25 }
 0x2d9   : > { %827 = vadd.xlane.f32.xlu1 %v826_v20 }
 0x2e6   : > { %v825_v22 = vpop.xlane.xlu0 %824 }
 0x2e7   : > { %v837_v51 = vmul.f32 0.03125, %v825_v22 }
 0x2e9   : > { %v843_v52 = vadd.f32 1e-06, %v837_v51 }
 0x2ea   : > { %v831_v26 = vpop.xlane.xlu0 %830 }
 0x2eb   : > { %v839_v27 = vmul.f32 0.03125, %v831_v26 }
 0x2ed   : > { %v845_v28 = vadd.f32 1e-06, %v839_v27 }
 0x2ee   : > { %v834_v30 = vpop.xlane.xlu0 %833 }
 0x2ef   : > { %2898 = vrsqrt.f32 %v845_v28  ;;  %v840_v31 = vmul.f32 0.03125, %v834_v30 }
 0x2f1   : > { %v846_v32 = vadd.f32 1e-06, %v840_v31 }
 0x2f2   : > { %v997_v33 = vpop.permute.xlu0 %996 }
 0x2f3   : > { %2900 = vrsqrt.f32 %v846_v32  ;;  %v1003_v34 = vsel %vm998_vm4, %v997_v33, 0 }
 0x2f4   : > { %2685 = vmatpush3.bf16.xpose.msra.mxu0 %v1003_v34  ;;  %2902 = vrsqrt.f32 %v843_v52 }
 0x2f5   : > { %2702 = vmatprep.subr.bf16.mxu0 %v3023_v21 }
 0x2fc   : > { %v2899_v35 = vpop.eup %2898 }
 0x2fd   : > { %v857_v36 = vmul.f32 %v2899_v35, %v809_v3 }
 0x2ff   : > { %v869_v37 = vmul.f32 %v3262_v38, %v857_v36 }
 0x300   : > { %v2901_v39 = vpop.eup %2900 }
 0x301   : > { %v858_v40 = vmul.f32 %v2901_v39, %v810_v6  ;;  %v881_v43 = vadd.f32 %v3272_v42, %v869_v37 }
 0x303   : > { %v870_v41 = vmul.f32 %v3262_v38, %v858_v40  ;;  %v890_v45 = vsel %vm3276_vm3, %v3245_v25, %v881_v43 }
 0x305   : > { %v882_v44 = vadd.f32 %v3272_v42, %v870_v41 }
 0x307   : > { %v891_v46 = vsel %vm3276_vm3, %v3253_v29, %v882_v44  ;;  %v2903_v29 = vpop.eup %2902 }
 0x308   : > { %v898_v48 = vpack.c.bf16 %v891_v46, %v890_v45  ;;  %v855_v56 = vmul.f32 %v2903_v29, %v3301_v0 }
 0x30a   : > { %v867_v57 = vmul.f32 %v3262_v38, %v855_v56 }
 0x30c   : > { %v879_v61 = vadd.f32 %v3272_v42, %v867_v57 }
 0x30e   : > { %v888_v63 = vsel %vm3276_vm3, %v3241_v23, %v879_v61 }
 0x327   : > { %v1048_v49 = vpop.permute.xlu1 %1047 }
 0x328   : > { %v1053_v50 = vsel %vm998_vm4, %v1048_v49, 0 }
 0x329   : > { %2691 = vmatpush3.bf16.xpose.msra.mxu1 %v1053_v50 }
 0x32a   : > { %2696 = vmatprep.subr.bf16.mxu1 %v3023_v21 }
 0x330   : > { %2693 = vmatmul.mubr.msk.bf16.vlgmr.msra.gmra.mxu1 %vm998_vm4, %v3314_v16 }
 0x331   : > { %2698 = vmatprep.mubr.msk.bf16.mxu1 %vm3024_vm2, %v3023_v21 }
 0x362   : > { %v828_v25 = vpop.xlane.xlu1 %827 }
 0x363   : > { %v838_v54 = vmul.f32 0.03125, %v828_v25 }
 0x365   : > { %v844_v55 = vadd.f32 1e-06, %v838_v54 }
 0x367   : > { %2904 = vrsqrt.f32 %v844_v55 }
 0x374   : > { %v2905_v58 = vpop.eup %2904 }
 0x375   : > { %v856_v59 = vmul.f32 %v2905_v58, %v808_v18 }
 0x377   : > { %v868_v60 = vmul.f32 %v3262_v38, %v856_v59 }
 0x379   : > { %v880_v62 = vadd.f32 %v3272_v42, %v868_v60  ;;  %v2574_v42 = vld [vmem:[%s3749_s12] ss:$0 sm:$0xff] }
 0x37b   : > { %v889_v1 = vsel %vm3276_vm3, %v3243_v24, %v880_v62 }
 0x37c   : > { %v897_v0 = vpack.c.bf16 %v889_v1, %v888_v63 }
 0x37e   : > { %2677 = vmatmul.mubr.msk.bf16.gmra.mxu0 %vm779_vm1, %v897_v0 }
 0x37f   : > { %2680 = vmatprep.mubr.msk.bf16.mxu0 %vm3024_vm2, %v3023_v21 }
 0x386   : > { %2681 = vmatmul.mubr.msk.bf16.gmra.mxu0 %vm779_vm1, %v898_v48 }
 0x387   : > { %2686 = vmatprep.mubr.msk.bf16.mxu0 %vm3024_vm2, %v3023_v21 }
 0x38e   : > { %2687 = vmatmul.mubr.msk.bf16.vlgmr.msra.gmra.mxu0 %vm998_vm4, %v3310_v12 }
 0x38f   : > { %2704 = vmatprep.mubr.msk.bf16.mxu0 %vm3024_vm2, %v3023_v21 }
 0x3f0   : > { %v1089_v38 = vpop.f32.mrf.mxu1 }
 0x3f1   : > { %v1098_v24 = vmul.f32 0.25, %v1089_v38 }
 0x3f2   : > { %v2694_v47 = vpop.f32.mrf.mxu1 }
 0x3f3   : > { %v1108_v2 = vadd.f32 %v2574_v42, %v1098_v24 }
 0x3f4   : > { %v1092_v3 = vpop.f32.mrf.mxu1 }
 0x3f5   : > { %v1099_v4 = vmul.f32 0.25, %v1092_v3  ;;  %v1116_v5 = vsel %vm998_vm4, %v1108_v2, -inf }
 0x3f6   : > { %1117 = vmax.xlane.f32.xlu1 %v1116_v5  ;;  %v2695_v6 = vpop.f32.mrf.mxu1 }
 0x3f7   : > { %v1109_v7 = vadd.f32 %v2574_v42, %v1099_v4 }
 0x3f9   : > { %v1119_v8 = vsel %vm998_vm4, %v1109_v7, -inf }
 0x3fa   : > { %1120 = vmax.xlane.f32.xlu1 %v1119_v8 }
 0x43e   : > { %v969_v9 = vpop.f32.mrf.mxu0 }
 0x43f   : > { %v970_v13 = vadd.f32 %v3295_v53, %v969_v9 }
 0x440   : > { %v2678_v10 = vpop.f32.mrf.mxu0 }
 0x442   : > { %v972_v11 = vpop.f32.mrf.mxu0 }
 0x443   : > { %v973_v14 = vadd.f32 %v3295_v53, %v972_v11 }
 0x444   : > { %v2679_v15 = vpop.f32.mrf.mxu0 }
 0x445   : > { %v3364_v17 = vpack.c.bf16 %v973_v14, %v970_v13  ;;  %v2859_v41 = vpack.i.bf16 %v973_v14, %v970_v13 }
 0x446   : > { %v977_v18 = vpop.f32.mrf.mxu0 }
 0x447   : > { %v3367_v22 = vadd.f32 %v3295_v53, %v977_v18 }
 0x448   : > { %v2682_v19 = vpop.f32.mrf.mxu0 }
 0x44a   : > { %v980_v20 = vpop.f32.mrf.mxu0 }
 0x44b   : > { %v3370_v26 = vadd.f32 %v3295_v53, %v980_v20 }
 0x44c   : > { %v2683_v27 = vpop.f32.mrf.mxu0 }
 0x44d   : > { %v2864_v28 = vpack.i.bf16 %v3370_v26, %v3367_v22  ;;  %v3376_v30 = vpack.c.bf16 %v3370_v26, %v3367_v22 }
 0x44e   : > { %v1039_v31 = vpop.f32.mrf.mxu0 }
 0x44f   : > { %v1096_v32 = vmul.f32 0.25, %v1039_v31 }
 0x450   : > { %v2688_v33 = vpop.f32.mrf.mxu0 }
 0x451   : > { %v1106_v34 = vadd.f32 %v2574_v42, %v1096_v32 }
 0x452   : > { %v1042_v35 = vpop.f32.mrf.mxu0 }
 0x453   : > { %v1097_v36 = vmul.f32 0.25, %v1042_v35  ;;  %v1110_v37 = vsel %vm998_vm4, %v1106_v34, -inf  ;;  %v2580_v35 = vld [vmem:[%s3749_s12 + $0x1] ss:$0 sm:$0xff] }
 0x454   : > { %1111 = vmax.xlane.f32.xlu1 %v1110_v37  ;;  %v2689_v39 = vpop.f32.mrf.mxu0 }
 0x455   : > { %v1107_v53 = vadd.f32 %v2574_v42, %v1097_v36 }
 0x457   : > { %v1113_v40 = vsel %vm998_vm4, %v1107_v53, -inf }
 0x458   : > { %1114 = vmax.xlane.f32.xlu1 %v1113_v40 }
 0x469   : > { %2860 = vrot.lane.b32.xlu1 %v2859_v41, %s3025_s15 }
 0x47f   : > { %v1118_v43 = vpop.xlane.xlu1 %1117 }
 0x480   : > { %v1124_v44 = vsub.f32 %v1108_v2, %v1118_v43 }
 0x482   : > { %v1130_v45 = vmul.f32 1.442695, %v1124_v44 }
 0x483   : > { %v1121_v46 = vpop.xlane.xlu1 %1120 }
 0x484   : > { %2906 = vpow2.f32 %v1130_v45  ;;  %v1125_v48 = vsub.f32 %v1109_v7, %v1121_v46 }
 0x486   : > { %v1132_v49 = vmul.f32 1.442695, %v1125_v48 }
 0x488   : > { %2908 = vpow2.f32 %v1132_v49 }
 0x491   : > { %v2907_v50 = vpop.eup %2906 }
 0x492   : > { %v1140_v51 = vsel %vm998_vm4, %v2907_v50, 0.0 }
 0x493   : > { %1141 = vadd.xlane.f32.xlu0 %v1140_v51 }
 0x495   : > { %v2909_v52 = vpop.eup %2908 }
 0x496   : > { %v1143_v25 = vsel %vm998_vm4, %v2909_v52, 0.0 }
 0x497   : > { %1144 = vadd.xlane.f32.xlu1 %v1143_v25 }
 0x4a9   : > { %1203 = vrot.lane.b32.xlu0 %v3314_v16, %s3027_s16 }
 0x4dd   : > { %v1112_v54 = vpop.xlane.xlu1 %1111 }
 0x4de   : > { %v1122_v55 = vsub.f32 %v1106_v34, %v1112_v54 }
 0x4e0   : > { %v1126_v29 = vmul.f32 1.442695, %v1122_v55 }
 0x4e1   : > { %v1115_v56 = vpop.xlane.xlu1 %1114 }
 0x4e2   : > { %2910 = vpow2.f32 %v1126_v29  ;;  %v1123_v63 = vsub.f32 %v1107_v53, %v1115_v56 }
 0x4e4   : > { %v1128_v1 = vmul.f32 1.442695, %v1123_v63 }
 0x4e5   : > { %v2861_v57 = vpop.permute.xlu1 %2860 }
 0x4e6   : > { %v2863_v58 = vunpack.i.h.bf16 %v2861_v57  ;;  %v2862_v59 = vunpack.i.l.bf16 %v2861_v57  ;;  %2912 = vpow2.f32 %v1128_v1 }
 0x4e8   : > { %v3385_v60 = vpack.c.bf16 %v2863_v58, %v2862_v59 }
 0x4ea   : > { %1323 = vrot.lane.b32.xlu1 %v3385_v60, %s3026_s25 }
 0x4ef   : > { %v2911_v61 = vpop.eup %2910 }
 0x4f0   : > { %v1134_v62 = vsel %vm998_vm4, %v2911_v61, 0.0 }
 0x4f1   : > { %1135 = vadd.xlane.f32.xlu0 %v1134_v62 }
 0x4f3   : > { %v2913_v16 = vpop.eup %2912 }
 0x4f4   : > { %v1137_v0 = vsel %vm998_vm4, %v2913_v16, 0.0 }
 0x507   : > { %1156 = vrot.lane.b32.xlu0 %v3310_v12, %s3027_s16 }
 0x50e   : > { %1138 = vadd.xlane.f32.xlu1 %v1137_v0 }
 0x51c   : > { %v1142_v38 = vpop.xlane.xlu0 %1141 }
 0x51d   : > { %2914 = vrcp.f32 %v1142_v38 }
 0x51f   : > { %1273 = vrot.lane.b32.xlu1 %v3364_v17, %s3026_s25 }
 0x520   : > { %v1204_v42 = vpop.permute.xlu0 %1203  ;;  %v1145_v24 = vpop.xlane.xlu1 %1144 }
 0x521   : > { %2916 = vrcp.f32 %v1145_v24  ;;  %2703 = vmatpush3.bf16.msra.mxu0 %v1204_v42 }
 0x522   : > { %2714 = vmatprep.subr.bf16.mxu0 %v3023_v21 }
 0x52a   : > { %v2915_v47 = vpop.eup %2914 }
 0x52b   : > { %v1152_v3 = vmul.f32 %v2915_v47, %v2907_v50 }
 0x52e   : > { %v2917_v2 = vpop.eup %2916 }
 0x52f   : > { %v1153_v4 = vmul.f32 %v2917_v2, %v2909_v52 }
 0x531   : > { %v1155_v12 = vpack.c.bf16 %v1153_v4, %v1152_v3 }
 0x533   : > { %2705 = vmatmul.mubr.msk.bf16.vlgmr.msra.gmra.mxu0 %vm998_vm4, %v1155_v12 }
 0x534   : > { %2716 = vmatprep.mubr.msk.bf16.mxu0 %vm3024_vm2, %v3023_v21 }
 0x55c   : > { %v1324_v5 = vpop.permute.xlu1 %1323 }
 0x55d   : > { %v1329_v6 = vsel %vm998_vm4, %v1324_v5, 0 }
 0x55e   : > { %2715 = vmatpush3.bf16.xpose.msra.mxu0 %v1329_v6 }
 0x55f   : > { %2726 = vmatprep.subr.bf16.mxu0 %v3023_v21 }
 0x565   : > { %2717 = vmatmul.mubr.msk.bf16.vlgmr.msra.gmra.mxu0 %vm998_vm4, %v3385_v60 }
 0x566   : > { %2728 = vmatprep.mubr.msk.bf16.mxu0 %vm3024_vm2, %v3023_v21 }
 0x57a   : > { %v1136_v7 = vpop.xlane.xlu0 %1135 }
 0x57b   : > { %2918 = vrcp.f32 %v1136_v7 }
 0x57e   : > { %v1157_v8 = vpop.permute.xlu0 %1156 }
 0x57f   : > { %2697 = vmatpush3.bf16.msra.mxu1 %v1157_v8 }
 0x580   : > { %2708 = vmatprep.subr.bf16.mxu1 %v3023_v21 }
 0x588   : > { %v2919_v10 = vpop.eup %2918 }
 0x589   : > { %v1150_v13 = vmul.f32 %v2919_v10, %v2911_v61 }
 0x597   : > { %v1139_v9 = vpop.xlane.xlu1 %1138 }
 0x598   : > { %2920 = vrcp.f32 %v1139_v9 }
 0x59b   : > { %v1274_v15 = vpop.permute.xlu1 %1273 }
 0x59c   : > { %v1279_v19 = vsel %vm998_vm4, %v1274_v15, 0 }
 0x5a5   : > { %v2921_v11 = vpop.eup %2920 }
 0x5a6   : > { %v1151_v14 = vmul.f32 %v2921_v11, %v2913_v16 }
 0x5a8   : > { %v1154_v18 = vpack.c.bf16 %v1151_v14, %v1150_v13 }
 0x5aa   : > { %2699 = vmatmul.mubr.msk.bf16.vlgmr.msra.gmra.mxu1 %vm998_vm4, %v1154_v18 }
 0x5ab   : > { %2709 = vmatpush3.bf16.xpose.msra.mxu1 %v1279_v19  ;;  %2710 = vmatprep.mubr.msk.bf16.mxu1 %vm3024_vm2, %v3023_v21 }
 0x5ac   : > { %2720 = vmatprep.subr.bf16.mxu1 %v3023_v21 }
 0x5b2   : > { %2711 = vmatmul.mubr.msk.bf16.vlgmr.msra.gmra.mxu1 %vm998_vm4, %v3364_v17 }
 0x5b3   : > { %2722 = vmatprep.mubr.msk.bf16.mxu1 %vm3024_vm2, %v3023_v21 }
 0x5f3   : > { %v3415_v20 = vpop.f32.mrf.mxu0 }
 0x5f5   : > { %v2706_v27 = vpop.f32.mrf.mxu0 }
 0x5f7   : > { %v3417_v31 = vpop.f32.mrf.mxu0 }
 0x5f8   : > { %v2869_v32 = vpack.i.bf16 %v3417_v31, %v3415_v20 }
 0x5f9   : > { %v2707_v33 = vpop.f32.mrf.mxu0 }
 0x625   : > { %v1365_v34 = vpop.f32.mrf.mxu0 }
 0x626   : > { %v1374_v36 = vmul.f32 0.25, %v1365_v34 }
 0x627   : > { %v2718_v37 = vpop.f32.mrf.mxu0 }
 0x628   : > { %v1384_v39 = vadd.f32 %v2580_v35, %v1374_v36 }
 0x629   : > { %v1368_v53 = vpop.f32.mrf.mxu0 }
 0x62a   : > { %v1375_v40 = vmul.f32 0.25, %v1368_v53  ;;  %v1392_v41 = vsel %vm998_vm4, %v1384_v39, -inf }
 0x62b   : > { %1393 = vmax.xlane.f32.xlu0 %v1392_v41  ;;  %v2719_v43 = vpop.f32.mrf.mxu0 }
 0x62c   : > { %v1385_v44 = vadd.f32 %v2580_v35, %v1375_v40 }
 0x62e   : > { %v1395_v45 = vsel %vm998_vm4, %v1385_v44, -inf }
 0x62f   : > { %1396 = vmax.xlane.f32.xlu1 %v1395_v45 }
 0x66a   : > { %v3424_v46 = vpop.f32.mrf.mxu1 }
 0x66c   : > { %v2700_v48 = vpop.f32.mrf.mxu1 }
 0x66e   : > { %v3426_v49 = vpop.f32.mrf.mxu1 }
 0x670   : > { %v2701_v50 = vpop.f32.mrf.mxu1 }
 0x672   : > { %v1315_v51 = vpop.f32.mrf.mxu1 }
 0x673   : > { %v1372_v52 = vmul.f32 0.25, %v1315_v51 }
 0x674   : > { %v2712_v25 = vpop.f32.mrf.mxu1 }
 0x675   : > { %v1382_v54 = vadd.f32 %v2580_v35, %v1372_v52 }
 0x676   : > { %v1318_v55 = vpop.f32.mrf.mxu1 }
 0x677   : > { %v1373_v29 = vmul.f32 0.25, %v1318_v55  ;;  %v1386_v56 = vsel %vm998_vm4, %v1382_v54, -inf }
 0x678   : > { %1387 = vmax.xlane.f32.xlu0 %v1386_v56  ;;  %v2713_v57 = vpop.f32.mrf.mxu1 }
 0x679   : > { %v1383_v58 = vadd.f32 %v2580_v35, %v1373_v29 }
 0x67b   : > { %v1389_v59 = vsel %vm998_vm4, %v1383_v58, -inf }
 0x67c   : > { %1390 = vmax.xlane.f32.xlu0 %v1389_v59 }
 0x692   : > { %2865 = vrot.lane.b32.xlu0 %v2864_v28, %s3025_s15 }
 0x6b4   : > { %v1394_v61 = vpop.xlane.xlu0 %1393 }
 0x6b5   : > { %v1400_v62 = vsub.f32 %v1384_v39, %v1394_v61 }
 0x6b7   : > { %v1406_v63 = vmul.f32 1.442695, %v1400_v62 }
 0x6b8   : > { %v1397_v1 = vpop.xlane.xlu1 %1396 }
 0x6b9   : > { %2922 = vpow2.f32 %v1406_v63  ;;  %v1401_v16 = vsub.f32 %v1385_v44, %v1397_v1 }
 0x6bb   : > { %v1408_v0 = vmul.f32 1.442695, %v1401_v16 }
 0x6bd   : > { %2924 = vpow2.f32 %v1408_v0 }
 0x6c6   : > { %v2923_v38 = vpop.eup %2922 }
 0x6c7   : > { %v1416_v42 = vsel %vm998_vm4, %v2923_v38, 0.0 }
 0x6c8   : > { %1417 = vadd.xlane.f32.xlu1 %v1416_v42 }
 0x6ca   : > { %v2925_v24 = vpop.eup %2924 }
 0x6cb   : > { %v1419_v47 = vsel %vm998_vm4, %v2925_v24, 0.0 }
 0x6cc   : > { %1420 = vadd.xlane.f32.xlu1 %v1419_v47 }
 0x6dd   : > { %1479 = vrot.lane.b32.xlu1 %v3385_v60, %s3027_s16 }
 0x701   : > { %v1388_v22 = vpop.xlane.xlu0 %1387 }
 0x702   : > { %v1398_v6 = vsub.f32 %v1382_v54, %v1388_v22  ;;  %v2586_v54 = vld [vmem:[%s3749_s12 + $0x2] ss:$0 sm:$0xff]  ;;  %s3755_s12 = sld [smem:[#allocation17_spill]] (!%p2611_p9) }
 0x704   : > { %v1402_v8 = vmul.f32 1.442695, %v1398_v6 }
 0x705   : > { %v1391_v26 = vpop.xlane.xlu0 %1390 }
 0x706   : > { %v1399_v28 = vsub.f32 %v1383_v58, %v1391_v26 }
 0x708   : > { %v1404_v2 = vmul.f32 1.442695, %v1399_v28 }
 0x709   : > { %v2866_v3 = vpop.permute.xlu0 %2865 }
 0x70a   : > { %2926 = vpow2.f32 %v1404_v2  ;;  %v2868_v4 = vunpack.i.h.bf16 %v2866_v3  ;;  %v2867_v12 = vunpack.i.l.bf16 %v2866_v3 }
 0x70b   : > { %2928 = vpow2.f32 %v1402_v8 }
 0x70c   : > { %v3438_v5 = vpack.c.bf16 %v2868_v4, %v2867_v12 }
 0x70e   : > { %1599 = vrot.lane.b32.xlu0 %v3438_v5, %s3026_s25 }
 0x717   : > { %v2927_v7 = vpop.eup %2926 }
 0x718   : > { %v1413_v9 = vsel %vm998_vm4, %v2927_v7, 0.0  ;;  %v2929_v60 = vpop.eup %2928 }
 0x719   : > { %1414 = vadd.xlane.f32.xlu1 %v1413_v9  ;;  %v1410_v10 = vsel %vm998_vm4, %v2929_v60, 0.0 }
 0x72a   : > { %1549 = vrot.lane.b32.xlu1 %v3376_v30, %s3026_s25 }
 0x72d   : > { %1411 = vadd.xlane.f32.xlu0 %v1410_v10 }
 0x743   : > { %1432 = vrot.lane.b32.xlu0 %v3364_v17, %s3027_s16 }
 0x751   : > { %v1418_v11 = vpop.xlane.xlu1 %1417 }
 0x752   : > { %2930 = vrcp.f32 %v1418_v11 }
 0x755   : > { %v1421_v13 = vpop.xlane.xlu1 %1420 }
 0x756   : > { %2932 = vrcp.f32 %v1421_v13 }
 0x759   : > { %v1480_v14 = vpop.permute.xlu1 %1479 }
 0x75a   : > { %2727 = vmatpush3.bf16.msra.mxu0 %v1480_v14 }
 0x75b   : > { %2738 = vmatprep.subr.bf16.mxu0 %v3023_v21 }
 0x75f   : > { %v2931_v15 = vpop.eup %2930 }
 0x760   : > { %v1428_v19 = vmul.f32 %v2931_v15, %v2923_v38 }
 0x763   : > { %v2933_v18 = vpop.eup %2932 }
 0x764   : > { %v1429_v27 = vmul.f32 %v2933_v18, %v2925_v24 }
 0x766   : > { %v1431_v33 = vpack.c.bf16 %v1429_v27, %v1428_v19 }
 0x768   : > { %2729 = vmatmul.mubr.msk.bf16.vlgmr.msra.gmra.mxu0 %vm998_vm4, %v1431_v33 }
 0x769   : > { %2740 = vmatprep.mubr.msk.bf16.mxu0 %vm3024_vm2, %v3023_v21 }
 0x780   : > { %v1600_v34 = vpop.permute.xlu0 %1599 }
 0x781   : > { %v1605_v17 = vsel %vm998_vm4, %v1600_v34, 0 }
 0x782   : > { %2739 = vmatpush3.bf16.xpose.msra.mxu0 %v1605_v17 }
 0x783   : > { %2750 = vmatprep.subr.bf16.mxu0 %v3023_v21 }
 0x789   : > { %2741 = vmatmul.mubr.msk.bf16.vlgmr.msra.gmra.mxu0 %vm998_vm4, %v3438_v5 }
 0x78a   : > { %2752 = vmatprep.mubr.msk.bf16.mxu0 %vm3024_vm2, %v3023_v21 }
 0x7a2   : > { %v1415_v35 = vpop.xlane.xlu1 %1414 }
 0x7a3   : > { %2934 = vrcp.f32 %v1415_v35 }
 0x7a6   : > { %v1550_v43 = vpop.permute.xlu1 %1549 }
 0x7a7   : > { %v1555_v45 = vsel %vm998_vm4, %v1550_v43, 0 }
 0x7b0   : > { %v2935_v39 = vpop.eup %2934 }
 0x7b1   : > { %v1427_v41 = vmul.f32 %v2935_v39, %v2927_v7 }
 0x7b6   : > { %v1412_v36 = vpop.xlane.xlu0 %1411 }
 0x7b7   : > { %2936 = vrcp.f32 %v1412_v36 }
 0x7ba   : > { %v1433_v37 = vpop.permute.xlu0 %1432 }
 0x7bb   : > { %2721 = vmatpush3.bf16.msra.mxu1 %v1433_v37 }
 0x7bc   : > { %2732 = vmatprep.subr.bf16.mxu1 %v3023_v21 }
 0x7c4   : > { %v2937_v53 = vpop.eup %2936 }
 0x7c5   : > { %v1426_v40 = vmul.f32 %v2937_v53, %v2929_v60 }
 0x7c7   : > { %v1430_v44 = vpack.c.bf16 %v1427_v41, %v1426_v40 }
 0x7c9   : > { %2723 = vmatmul.mubr.msk.bf16.vlgmr.msra.gmra.mxu1 %vm998_vm4, %v1430_v44 }
 0x7ca   : > { %2733 = vmatpush3.bf16.xpose.msra.mxu1 %v1555_v45  ;;  %2734 = vmatprep.mubr.msk.bf16.mxu1 %vm3024_vm2, %v3023_v21 }
 0x7cb   : > { %2744 = vmatprep.subr.bf16.mxu1 %v3023_v21 }
 0x7d1   : > { %2735 = vmatmul.mubr.msk.bf16.vlgmr.msra.gmra.mxu1 %vm998_vm4, %v3376_v30 }
 0x7d2   : > { %2746 = vmatprep.mubr.msk.bf16.mxu1 %vm3024_vm2, %v3023_v21 }
 0x828   : > { %v1519_v48 = vpop.f32.mrf.mxu0 }
 0x82a   : > { %v2730_v50 = vpop.f32.mrf.mxu0 }
 0x82c   : > { %v1522_v51 = vpop.f32.mrf.mxu0 }
 0x82d   : > { %v2874_v1 = vpack.i.bf16 %v1522_v51, %v1519_v48 }
 0x82e   : > { %v2731_v52 = vpop.f32.mrf.mxu0 }
 0x849   : > { %v1641_v25 = vpop.f32.mrf.mxu0 }
 0x84a   : > { %v1650_v55 = vmul.f32 0.25, %v1641_v25 }
 0x84b   : > { %v2742_v29 = vpop.f32.mrf.mxu0 }
 0x84c   : > { %v1660_v56 = vadd.f32 %v2586_v54, %v1650_v55  ;;  %v2886_v55 = vld [vmem:[%s3180_s26 + $0x8] sm:$0xff]  }
 0x84d   : > { %v1644_v57 = vpop.f32.mrf.mxu0 }
 0x84e   : > { %v1651_v58 = vmul.f32 0.25, %v1644_v57  ;;  %v1668_v59 = vsel %vm998_vm4, %v1660_v56, -inf }
 0x84f   : > { %1669 = vmax.xlane.f32.xlu0 %v1668_v59  ;;  %v2743_v61 = vpop.f32.mrf.mxu0 }
 0x850   : > { %v1661_v62 = vadd.f32 %v2586_v54, %v1651_v58  ;;  %v2887_v58 = vld [vmem:[%s3180_s26] sm:$0xff]  }
 0x852   : > { %v1671_v63 = vsel %vm998_vm4, %v1661_v62, -inf }
 0x853   : > { %1672 = vmax.xlane.f32.xlu1 %v1671_v63 }
 0x864   : > { %1755 = vrot.lane.b32.xlu1 %v3438_v5, %s3027_s16 }
 0x868   : > { %2870 = vrot.lane.b32.xlu1 %v2869_v32, %s3028_s21 }
 0x86c   : > { %2875 = vrot.lane.b32.xlu1 %v2874_v1, %s3028_s21 }
 0x889   : > { %v3478_v16 = vpop.f32.mrf.mxu1 }
 0x88b   : > { %v2724_v0 = vpop.f32.mrf.mxu1 }
 0x88d   : > { %v3480_v38 = vpop.f32.mrf.mxu1 }
 0x88f   : > { %v2725_v42 = vpop.f32.mrf.mxu1 }
 0x891   : > { %v1591_v24 = vpop.f32.mrf.mxu1 }
 0x892   : > { %v1648_v47 = vmul.f32 0.25, %v1591_v24 }
 0x893   : > { %v2736_v22 = vpop.f32.mrf.mxu1 }
 0x894   : > { %v1658_v26 = vadd.f32 %v2586_v54, %v1648_v47 }
 0x895   : > { %v1594_v28 = vpop.f32.mrf.mxu1 }
 0x896   : > { %v1649_v2 = vmul.f32 0.25, %v1594_v28  ;;  %v1662_v3 = vsel %vm998_vm4, %v1658_v26, -inf }
 0x897   : > { %1663 = vmax.xlane.f32.xlu0 %v1662_v3  ;;  %v2737_v20 = vpop.f32.mrf.mxu1 }
 0x898   : > { %v1659_v31 = vadd.f32 %v2586_v54, %v1649_v2 }
 0x89a   : > { %v1665_v32 = vsel %vm998_vm4, %v1659_v31, -inf }
 0x89b   : > { %1666 = vmax.xlane.f32.xlu0 %v1665_v32 }
 0x8d8   : > { %v1670_v4 = vpop.xlane.xlu0 %1669 }
 0x8d9   : > { %v1676_v12 = vsub.f32 %v1660_v56, %v1670_v4 }
 0x8db   : > { %v1682_v5 = vmul.f32 1.442695, %v1676_v12  ;;  %v2966_v12 = vld [vmem:[#allocation2] sm:$0xff] }
 0x8dc   : > { %v1673_v6 = vpop.xlane.xlu1 %1672 }
 0x8dd   : > { %2938 = vpow2.f32 %v1682_v5  ;;  %v1677_v7 = vsub.f32 %v1661_v62, %v1673_v6 }
 0x8df   : > { %v1684_v8 = vmul.f32 1.442695, %v1677_v7 }
 0x8e0   : > { %v1756_v9 = vpop.permute.xlu1 %1755 }
 0x8e1   : > { %2940 = vpow2.f32 %v1684_v8  ;;  %2751 = vmatpush3.bf16.msra.mxu0 %v1756_v9 }
 0x8e2   : > { %2772 = vmatprep.subr.bf16.mxu0 %v3023_v21 }
 0x8e4   : > { %v2871_v52 = vpop.permute.xlu1 %2870 }
 0x8e5   : > { %v2873_v56 = vunpack.i.h.bf16 %v2871_v52  ;;  %v2872_v57 = vunpack.i.l.bf16 %v2871_v52 }
 0x8e7   : > { %v1259_v59 = vsel %vm998_vm4, %v3426_v49, %v2873_v56  ;;  %v1258_v61 = vsel %vm998_vm4, %v3424_v46, %v2872_v57 }
 0x8e8   : > { %v2876_v62 = vpop.permute.xlu1 %2875  ;;  %v1816_v63 = vpack.c.bf16 %v1259_v59, %v1258_v61 }
 0x8e9   : > { %v2878_v1 = vunpack.i.h.bf16 %v2876_v62  ;;  %v2877_v0 = vunpack.i.l.bf16 %v2876_v62 }
 0x8ea   : > { %v2939_v60 = vpop.eup %2938 }
 0x8eb   : > { %v1692_v10 = vsel %vm998_vm4, %v2939_v60, 0.0  ;;  %v1535_v42 = vsel %vm998_vm4, %v3480_v38, %v2878_v1  ;;  %v1534_v49 = vsel %vm998_vm4, %v3478_v16, %v2877_v0  ;;  %v2589_v16 = vld [vmem:[%s3750_s6] ss:$0 sm:$0xff] }
 0x8ec   : > { %1693 = vadd.xlane.f32.xlu0 %v1692_v10  ;;  %v1817_v46 = vpack.c.bf16 %v1535_v42, %v1534_v49  ;;  %v2970_v42 = vld [vmem:[#allocation2 + $0x28] sm:$0xff] }
 0x8ee   : > { %v2941_v11 = vpop.eup %2940 }
 0x8ef   : > { %v1695_v13 = vsel %vm998_vm4, %v2941_v11, 0.0 }
 0x8f0   : > { %1696 = vadd.xlane.f32.xlu0 %v1695_v13 }
 0x920   : > { %v1664_v14 = vpop.xlane.xlu0 %1663 }
 0x921   : > { %v1674_v15 = vsub.f32 %v1658_v26, %v1664_v14 }
 0x923   : > { %v1678_v18 = vmul.f32 1.442695, %v1674_v15 }
 0x924   : > { %v1667_v19 = vpop.xlane.xlu0 %1666 }
 0x925   : > { %2942 = vpow2.f32 %v1678_v18  ;;  %v1675_v27 = vsub.f32 %v1659_v31, %v1667_v19 }
 0x927   : > { %v1680_v33 = vmul.f32 1.442695, %v1675_v27 }
 0x929   : > { %2944 = vpow2.f32 %v1680_v33 }
 0x932   : > { %v2943_v34 = vpop.eup %2942 }
 0x933   : > { %v1686_v17 = vsel %vm998_vm4, %v2943_v34, 0.0 }
 0x934   : > { %1687 = vadd.xlane.f32.xlu0 %v1686_v17  ;;  %v2968_v17 = vld [vmem:[#allocation2 + $0x18] sm:$0xff] }
 0x936   : > { %v2945_v35 = vpop.eup %2944 }
 0x937   : > { %v1689_v36 = vsel %vm998_vm4, %v2945_v35, 0.0 }
 0x938   : > { %1690 = vadd.xlane.f32.xlu0 %v1689_v36 }
 0x94e   : > { %1708 = vrot.lane.b32.xlu0 %v3376_v30, %s3027_s16 }
 0x975   : > { %v1694_v37 = vpop.xlane.xlu0 %1693 }
 0x976   : > { %2946 = vrcp.f32 %v1694_v37 }
 0x979   : > { %v1697_v39 = vpop.xlane.xlu0 %1696 }
 0x97a   : > { %2948 = vrcp.f32 %v1697_v39 }
 0x983   : > { %v2947_v53 = vpop.eup %2946 }
 0x984   : > { %v1704_v41 = vmul.f32 %v2947_v53, %v2939_v60  ;;  %v2967_v60 = vld [vmem:[#allocation2 + $0x8] sm:$0xff] }
 0x987   : > { %v2949_v40 = vpop.eup %2948 }
 0x988   : > { %v1705_v43 = vmul.f32 %v2949_v40, %v2941_v11 }
 0x98a   : > { %v1707_v44 = vpack.c.bf16 %v1705_v43, %v1704_v41 }
 0x98c   : > { %2753 = vmatmul.mubr.msk.bf16.vlgmr.msra.gmra.mxu0 %vm998_vm4, %v1707_v44 }
 0x98d   : > { %2776 = vmatprep.mubr.msk.bf16.mxu0 %vm3024_vm2, %v3023_v21 }
 0x9bd   : > { %v1688_v45 = vpop.xlane.xlu0 %1687 }
 0x9be   : > { %2950 = vrcp.f32 %v1688_v45 }
 0x9c1   : > { %v1691_v48 = vpop.xlane.xlu0 %1690 }
 0x9c2   : > { %2952 = vrcp.f32 %v1691_v48 }
 0x9c5   : > { %v1709_v30 = vpop.permute.xlu0 %1708 }
 0x9c6   : > { %2745 = vmatpush3.bf16.msra.mxu1 %v1709_v30 }
 0x9c7   : > { %2756 = vmatprep.subr.bf16.mxu1 %v3023_v21 }
 0x9cb   : > { %v2951_v50 = vpop.eup %2950 }
 0x9cc   : > { %v1702_v25 = vmul.f32 %v2951_v50, %v2943_v34 }
 0x9cf   : > { %v2953_v51 = vpop.eup %2952 }
 0x9d0   : > { %v1703_v54 = vmul.f32 %v2953_v51, %v2945_v35 }
 0x9d2   : > { %v1706_v29 = vpack.c.bf16 %v1703_v54, %v1702_v25 }
 0x9d4   : > { %2747 = vmatmul.mubr.msk.bf16.vlgmr.msra.gmra.mxu1 %vm998_vm4, %v1706_v29  ;;  %v2969_v29 = vld [vmem:[#allocation2 + $0x20] sm:$0xff] }
 0x9d5   : > { %2757 = vmatpush3.bf16.msra.mxu1 %v2886_v55  ;;  %2760 = vmatprep.mubr.msk.bf16.mxu1 %vm3024_vm2, %v3023_v21 }
 0x9d6   : > { %2758 = vmatprep.subr.bf16.mxu1 %v3023_v21 }
 0x9d9   : > { %2759 = vmatpush3.bf16.msra.mxu1 %v2887_v58 }
 0x9da   : > { %2788 = vmatprep.subr.bf16.mxu1 %v3023_v21 }
 0x9dc   : > { %2761 = vmatmul.mubr.msk.bf16.vlgmr.msra.gmra.mxu1 %vm779_vm1, %v1816_v63 }
 0x9dd   : > { %2764 = vmatprep.mubr.msk.bf16.mxu1 %vm3024_vm2, %v3023_v21 }
 0x9e4   : > { %2765 = vmatmul.mubr.msk.bf16.gmra.mxu1 %vm779_vm1, %v1817_v46 }
 0x9e5   : > { %2768 = vmatprep.mubr.msk.bf16.mxu1 %vm3024_vm2, %v3023_v21 }
 0xa4c   : > { %v1795_v24 = vpop.f32.mrf.mxu0 }
 0xa4e   : > { %v2754_v47 = vpop.f32.mrf.mxu0 }
 0xa50   : > { %v1798_v22 = vpop.f32.mrf.mxu0 }
 0xa51   : > { %v2879_v26 = vpack.i.bf16 %v1798_v22, %v1795_v24 }
 0xa52   : > { %v2755_v28 = vpop.f32.mrf.mxu0 }
 0xa53   : > { %2880 = vrot.lane.b32.xlu1 %v2879_v26, %s3028_s21 }
 0xa94   : > { %v1748_v2 = vpop.f32.mrf.mxu1 }
 0xa96   : > { %v2748_v3 = vpop.f32.mrf.mxu1 }
 0xa98   : > { %v1751_v20 = vpop.f32.mrf.mxu1 }
 0xa9a   : > { %v2749_v38 = vpop.f32.mrf.mxu1 }
 0xa9b   : > { %v2888_v38 = vld [vmem:[%s3197_s0 + $0x8] sm:$0xff]  }
 0xa9c   : > { %v1881_v31 = vpop.f32.mrf.mxu1  ;;  %2773 = vmatpush3.bf16.msra.mxu0 %v2888_v38 }
 0xa9d   : > { %v1882_v32 = vadd.f32 %v2589_v16, %v1881_v31  ;;  %2774 = vmatprep.subr.bf16.mxu0 %v3023_v21 }
 0xa9e   : > { %v2762_v4 = vpop.f32.mrf.mxu1 }
 0xa9f   : > { %v3522_v5 = vadd.f32 %v2966_v12, %v1882_v32 }
 0xaa0   : > { %v1884_v6 = vpop.f32.mrf.mxu1 }
 0xaa1   : > { %v1885_v7 = vadd.f32 %v2589_v16, %v1884_v6  ;;  %v1912_v8 = vsel %vm779_vm1, %v3522_v5, 0.0 }
 0xaa2   : > { %1913 = vadd.xlane.f32.xlu1 %v1912_v8  ;;  %v2763_v9 = vpop.f32.mrf.mxu1 }
 0xaa3   : > { %v3526_v10 = vadd.f32 %v2967_v60, %v1885_v7 }
 0xaa4   : > { %v1889_v11 = vpop.f32.mrf.mxu1 }
 0xaa5   : > { %v1890_v13 = vadd.f32 %v2589_v16, %v1889_v11  ;;  %v1915_v14 = vsel %vm779_vm1, %v3526_v10, 0.0 }
 0xaa6   : > { %1916 = vadd.xlane.f32.xlu0 %v1915_v14  ;;  %v2766_v15 = vpop.f32.mrf.mxu1 }
 0xaa7   : > { %v3531_v18 = vadd.f32 %v1890_v13, %v3241_v23 }
 0xaa8   : > { %v1892_v19 = vpop.f32.mrf.mxu1 }
 0xaa9   : > { %v1893_v27 = vadd.f32 %v2589_v16, %v1892_v19  ;;  %v1918_v33 = vsel %vm779_vm1, %v3531_v18, 0.0 }
 0xaaa   : > { %1919 = vadd.xlane.f32.xlu0 %v1918_v33  ;;  %v2767_v34 = vpop.f32.mrf.mxu1 }
 0xaab   : > { %v3535_v35 = vadd.f32 %v2968_v17, %v1893_v27 }
 0xaad   : > { %v1921_v36 = vsel %vm779_vm1, %v3535_v35, 0.0 }
 0xaae   : > { %1922 = vadd.xlane.f32.xlu1 %v1921_v36 }
 0xac5   : > { %v2881_v37 = vpop.permute.xlu1 %2880 }
 0xac6   : > { %v2883_v39 = vunpack.i.h.bf16 %v2881_v37  ;;  %v2882_v53 = vunpack.i.l.bf16 %v2881_v37 }
 0xac8   : > { %v1811_v23 = vsel %vm998_vm4, %v1751_v20, %v2883_v39  ;;  %v1810_v40 = vsel %vm998_vm4, %v1748_v2, %v2882_v53 }
 0xac9   : > { %v1818_v41 = vpack.c.bf16 %v1811_v23, %v1810_v40 }
 0xacb   : > { %2769 = vmatmul.mubr.msk.bf16.gmra.mxu1 %vm779_vm1, %v1818_v41  ;;  %v2595_v41 = vld [vmem:[%s3752_s30] ss:$0 sm:$0xff] }
 0xacc   : > { %2796 = vmatprep.mubr.msk.bf16.mxu1 %vm3024_vm2, %v3023_v21 }
 0xb2b   : > { %v1914_v44 = vpop.xlane.xlu1 %1913 }
 0xb2c   : > { %v1930_v45 = vmul.f32 0.03125, %v1914_v44 }
 0xb2e   : > { %v3545_v30 = vsub.f32 %v3522_v5, %v1930_v45 }
 0xb2f   : > { %v1917_v43 = vpop.xlane.xlu0 %1916 }
 0xb30   : > { %v1931_v50 = vmul.f32 0.03125, %v1917_v43  ;;  %v1942_v59 = vmul.f32 %v3545_v30, %v3545_v30 }
 0xb32   : > { %v1937_v57 = vsub.f32 %v3526_v10, %v1931_v50  ;;  %v1948_v46 = vsel %vm779_vm1, %v1942_v59, 0.0  ;;  %v2596_v50 = vld [vmem:[%s3753_s19] ss:$0 sm:$0xff] }
 0xb33   : > { %v1920_v48 = vpop.xlane.xlu0 %1919 }
 0xb34   : > { %v1932_v52 = vmul.f32 0.03125, %v1920_v48  ;;  %v1943_v26 = vmul.f32 %v1937_v57, %v1937_v57 }
 0xb36   : > { %v3553_v61 = vsub.f32 %v3531_v18, %v1932_v52  ;;  %v1951_v2 = vsel %vm779_vm1, %v1943_v26, 0.0 }
 0xb37   : > { %v1923_v54 = vpop.xlane.xlu1 %1922 }
 0xb38   : > { %v1933_v62 = vmul.f32 0.03125, %v1923_v54  ;;  %v1944_v22 = vmul.f32 %v3553_v61, %v3553_v61 }
 0xb3a   : > { %v1939_v24 = vsub.f32 %v3535_v35, %v1933_v62  ;;  %v1954_v28 = vsel %vm779_vm1, %v1944_v22, 0.0 }
 0xb3c   : > { %v1945_v3 = vmul.f32 %v1939_v24, %v1939_v24 }
 0xb3e   : > { %v1957_v20 = vsel %vm779_vm1, %v1945_v3, 0.0 }
 0xb8b   : > { %v1897_v51 = vpop.f32.mrf.mxu1 }
 0xb8c   : > { %v1898_v25 = vadd.f32 %v2589_v16, %v1897_v51 }
 0xb8d   : > { %v2770_v55 = vpop.f32.mrf.mxu1 }
 0xb8e   : > { %v3547_v56 = vadd.f32 %v2969_v29, %v1898_v25 }
 0xb8f   : > { %v1900_v58 = vpop.f32.mrf.mxu1 }
 0xb90   : > { %v1901_v63 = vadd.f32 %v2589_v16, %v1900_v58  ;;  %v1924_v1 = vsel %vm779_vm1, %v3547_v56, 0.0  ;;  %v2889_v16 = vld [vmem:[%s3197_s0] sm:$0xff]  }
 0xb91   : > { %1925 = vadd.xlane.f32.xlu0 %v1924_v1  ;;  %v2771_v0 = vpop.f32.mrf.mxu1  ;;  %2775 = vmatpush3.bf16.msra.mxu0 %v2889_v16  ;;  %v2890_v1 = vld [vmem:[%s3211_s8 + $0x18] sm:$0xff]  }
 0xb92   : > { %v3557_v49 = vadd.f32 %v2970_v42, %v1901_v63  ;;  %2789 = vmatpush3.bf16.msra.mxu1 %v2890_v1  ;;  %v2892_v0 = vld [vmem:[%s3211_s8 + $0x8] sm:$0xff]   ;;  %v2893_v42 = vld [vmem:[%s3211_s8] sm:$0xff]  }
 0xb93   : > { %2790 = vmatprep.subr.bf16.mxu1 %v3023_v21 }
 0xb94   : > { %v1927_v47 = vsel %vm779_vm1, %v3557_v49, 0.0 }
 0xb95   : > { %1949 = vadd.xlane.f32.xlu0 %v1948_v46  ;;  %1928 = vadd.xlane.f32.xlu1 %v1927_v47 }
 0xb99   : > { %1955 = vadd.xlane.f32.xlu0 %v1954_v28  ;;  %1952 = vadd.xlane.f32.xlu1 %v1951_v2 }
 0xb9d   : > { %1958 = vadd.xlane.f32.xlu1 %v1957_v20 }
 0xc1a   : > { %v1926_v31 = vpop.xlane.xlu0 %1925 }
 0xc1b   : > { %v1934_v32 = vmul.f32 0.03125, %v1926_v31 }
 0xc1d   : > { %v3572_v4 = vsub.f32 %v3547_v56, %v1934_v32 }
 0xc1e   : > { %v1950_v12 = vpop.xlane.xlu0 %1949  ;;  %v1929_v6 = vpop.xlane.xlu1 %1928 }
 0xc1f   : > { %v1966_v7 = vmul.f32 0.03125, %v1950_v12  ;;  %v1935_v8 = vmul.f32 0.03125, %v1929_v6  ;;  %v1946_v9 = vmul.f32 %v3572_v4, %v3572_v4 }
 0xc21   : > { %v1972_v60 = vadd.f32 1e-06, %v1966_v7  ;;  %v3577_v11 = vsub.f32 %v3557_v49, %v1935_v8  ;;  %v1960_v13 = vsel %vm779_vm1, %v1946_v9, 0.0  ;;  %v2597_v7 = vld [vmem:[%s737_s18] ss:$0 sm:$0xff] }
 0xc22   : > { %1961 = vadd.xlane.f32.xlu0 %v1960_v13  ;;  %v1956_v14 = vpop.xlane.xlu0 %1955  ;;  %v1953_v15 = vpop.xlane.xlu1 %1952 }
 0xc23   : > { %2954 = vrsqrt.f32 %v1972_v60  ;;  %v1968_v19 = vmul.f32 0.03125, %v1956_v14  ;;  %v1967_v27 = vmul.f32 0.03125, %v1953_v15  ;;  %v1947_v33 = vmul.f32 %v3577_v11, %v3577_v11 }
 0xc25   : > { %v1973_v34 = vadd.f32 1e-06, %v1967_v27  ;;  %v1963_v17 = vsel %vm779_vm1, %v1947_v33, 0.0  ;;  %v1974_v36 = vadd.f32 1e-06, %v1968_v19 }
 0xc26   : > { %1964 = vadd.xlane.f32.xlu1 %v1963_v17  ;;  %v1959_v37 = vpop.xlane.xlu1 %1958 }
 0xc27   : > { %v1969_v39 = vmul.f32 0.03125, %v1959_v37  ;;  %2956 = vrsqrt.f32 %v1973_v34 }
 0xc28   : > { %2958 = vrsqrt.f32 %v1974_v36 }
 0xc29   : > { %v1975_v53 = vadd.f32 1e-06, %v1969_v39 }
 0xc2b   : > { %2960 = vrsqrt.f32 %v1975_v53 }
 0xc30   : > { %v2955_v23 = vpop.eup %2954 }
 0xc31   : > { %v1984_v40 = vmul.f32 %v2955_v23, %v3545_v30 }
 0xc33   : > { %v1996_v45 = vmul.f32 %v2595_v41, %v1984_v40 }
 0xc34   : > { %v2957_v43 = vpop.eup %2956 }
 0xc35   : > { %v1985_v44 = vmul.f32 %v2957_v43, %v1937_v57  ;;  %v2959_v48 = vpop.eup %2958  ;;  %v2008_v54 = vadd.f32 %v2596_v50, %v1996_v45 }
 0xc36   : > { %v1986_v55 = vmul.f32 %v2959_v48, %v3553_v61  ;;  %v2891_v61 = vld [vmem:[%s3211_s8 + $0x10] sm:$0xff]  }
 0xc37   : > { %v1997_v52 = vmul.f32 %v2595_v41, %v1985_v44  ;;  %2791 = vmatpush3.bf16.msra.mxu1 %v2891_v61 }
 0xc38   : > { %v2961_v51 = vpop.eup %2960  ;;  %v1998_v57 = vmul.f32 %v2595_v41, %v1986_v55  ;;  %2792 = vmatprep.subr.bf16.mxu1 %v3023_v21 }
 0xc39   : > { %v1987_v25 = vmul.f32 %v2961_v51, %v1939_v24  ;;  %v2009_v30 = vadd.f32 %v2596_v50, %v1997_v52 }
 0xc3a   : > { %v2010_v62 = vadd.f32 %v2596_v50, %v1998_v57 }
 0xc3b   : > { %v2018_v29 = vpack.c.bf16 %v2009_v30, %v2008_v54  ;;  %v1999_v58 = vmul.f32 %v2595_v41, %v1987_v25  ;;  %2793 = vmatpush3.bf16.msra.mxu1 %v2892_v0  ;;  %v2603_v25 = vld [vmem:[%s745_s23] ss:$0 sm:$0xff] }
 0xc3c   : > { %2794 = vmatprep.subr.bf16.mxu1 %v3023_v21 }
 0xc3d   : > { %2777 = vmatmul.mubr.msk.bf16.vlgmr.msra.gmra.mxu0 %vm779_vm1, %v2018_v29  ;;  %v2011_v59 = vadd.f32 %v2596_v50, %v1999_v58 }
 0xc3e   : > { %2780 = vmatprep.mubr.msk.bf16.mxu0 %vm3024_vm2, %v3023_v21 }
 0xc3f   : > { %v2019_v63 = vpack.c.bf16 %v2011_v59, %v2010_v62  ;;  %2795 = vmatpush3.bf16.msra.mxu1 %v2893_v42 }
 0xc45   : > { %2781 = vmatmul.mubr.msk.bf16.gmra.mxu0 %vm779_vm1, %v2019_v63 }
 0xc46   : > { %2784 = vmatprep.mubr.msk.bf16.mxu0 %vm3024_vm2, %v3023_v21 }
 0xcab   : > { %v1962_v46 = vpop.xlane.xlu0 %1961 }
 0xcac   : > { %v1970_v24 = vmul.f32 0.03125, %v1962_v46 }
 0xcae   : > { %v1976_v47 = vadd.f32 1e-06, %v1970_v24 }
 0xcaf   : > { %v1965_v22 = vpop.xlane.xlu1 %1964 }
 0xcb0   : > { %2962 = vrsqrt.f32 %v1976_v47  ;;  %v1971_v26 = vmul.f32 0.03125, %v1965_v22 }
 0xcb2   : > { %v1977_v28 = vadd.f32 1e-06, %v1971_v26 }
 0xcb4   : > { %2964 = vrsqrt.f32 %v1977_v28 }
 0xcbd   : > { %v2963_v2 = vpop.eup %2962 }
 0xcbe   : > { %v1988_v3 = vmul.f32 %v2963_v2, %v3572_v4 }
 0xcc0   : > { %v2000_v16 = vmul.f32 %v2595_v41, %v1988_v3 }
 0xcc1   : > { %v2965_v20 = vpop.eup %2964 }
 0xcc2   : > { %v1989_v38 = vmul.f32 %v2965_v20, %v3577_v11  ;;  %v2012_v32 = vadd.f32 %v2596_v50, %v2000_v16 }
 0xcc4   : > { %v2001_v31 = vmul.f32 %v2595_v41, %v1989_v38 }
 0xcc6   : > { %v2013_v12 = vadd.f32 %v2596_v50, %v2001_v31 }
 0xcc8   : > { %v2020_v6 = vpack.c.bf16 %v2013_v12, %v2012_v32 }
 0xcca   : > { %2785 = vmatmul.mubr.msk.bf16.gmra.mxu0 %vm779_vm1, %v2020_v6 }
 0xcfd   : > { %v2083_v8 = vpop.f32.mrf.mxu0 }
 0xcfe   : > { %v2084_v60 = vadd.f32 %v2597_v7, %v2083_v8 }
 0xcff   : > { %v2778_v9 = vpop.f32.mrf.mxu0 }
 0xd00   : > { %v2106_v15 = vmax.f32 %v2084_v60, 0.0 }
 0xd01   : > { %v2086_v13 = vpop.f32.mrf.mxu0 }
 0xd02   : > { %v2087_v4 = vadd.f32 %v2597_v7, %v2086_v13 }
 0xd03   : > { %v2779_v14 = vpop.f32.mrf.mxu0 }
 0xd04   : > { %v2107_v11 = vmax.f32 %v2087_v4, 0.0 }
 0xd05   : > { %v2091_v19 = vpop.f32.mrf.mxu0 }
 0xd06   : > { %v2120_v27 = vpack.c.bf16 %v2107_v11, %v2106_v15  ;;  %v2092_v34 = vadd.f32 %v2597_v7, %v2091_v19 }
 0xd07   : > { %v2782_v33 = vpop.f32.mrf.mxu0 }
 0xd08   : > { %2797 = vmatmul.mubr.msk.bf16.vlgmr.msra.gmra.mxu1 %vm2154_vm5, %v2120_v27  ;;  %v2108_v39 = vmax.f32 %v2092_v34, 0.0 }
 0xd09   : > { %v2094_v17 = vpop.f32.mrf.mxu0  ;;  %2800 = vmatprep.mubr.msk.bf16.mxu1 %vm3024_vm2, %v3023_v21 }
 0xd0a   : > { %v2095_v36 = vadd.f32 %v2597_v7, %v2094_v17 }
 0xd0b   : > { %v2783_v37 = vpop.f32.mrf.mxu0 }
 0xd0c   : > { %v2109_v53 = vmax.f32 %v2095_v36, 0.0 }
 0xd0e   : > { %v2121_v23 = vpack.c.bf16 %v2109_v53, %v2108_v39 }
 0xd10   : > { %2801 = vmatmul.mubr.msk.bf16.gmra.mxu1 %vm2154_vm5, %v2121_v23 }
 0xd11   : > { %2804 = vmatprep.mubr.msk.bf16.mxu1 %vm3024_vm2, %v3023_v21 }
 0xd8a   : > { %v2099_v40 = vpop.f32.mrf.mxu0 }
 0xd8b   : > { %v2100_v43 = vadd.f32 %v2597_v7, %v2099_v40 }
 0xd8c   : > { %v2786_v41 = vpop.f32.mrf.mxu0 }
 0xd8d   : > { %v2110_v50 = vmax.f32 %v2100_v43, 0.0 }
 0xd8e   : > { %v2102_v44 = vpop.f32.mrf.mxu0 }
 0xd8f   : > { %v2103_v45 = vadd.f32 %v2597_v7, %v2102_v44 }
 0xd90   : > { %v2787_v48 = vpop.f32.mrf.mxu0 }
 0xd91   : > { %v2111_v51 = vmax.f32 %v2103_v45, 0.0 }
 0xd93   : > { %v2122_v52 = vpack.c.bf16 %v2111_v51, %v2110_v50 }
 0xd95   : > { %2805 = vmatmul.mubr.msk.bf16.gmra.mxu1 %vm2154_vm5, %v2122_v52 }
 0xdc8   : > { %v2198_v54 = vpop.f32.mrf.mxu1 }
 0xdc9   : > { %v2199_v30 = vadd.f32 %v2603_v25, %v2198_v54 }
 0xdca   : > { %v2798_v55 = vpop.f32.mrf.mxu1 }
 0xdcb   : > { %v2221_v21 = vadd.f32 %v2199_v30, %v3522_v5 }
 0xdcc   : > { %v2201_v29 = vpop.f32.mrf.mxu1 }
 0xdcd   : > { %2227 = vst.msk [vmem:[#allocation2] sm:$0xff] %vm779_vm1, %v2221_v21  ;;  %v2202_v58 = vadd.f32 %v2603_v25, %v2201_v29 }
 0xdce   : > { %v2799_v57 = vpop.f32.mrf.mxu1 }
 0xdcf   : > { %v2222_v59 = vadd.f32 %v2202_v58, %v3526_v10 }
 0xdd0   : > { %v2206_v62 = vpop.f32.mrf.mxu1 }
 0xdd1   : > { %2228 = vst.msk [vmem:[#allocation2 + $0x8] sm:$0xff] %vm779_vm1, %v2222_v59  ;;  %v2207_v63 = vadd.f32 %v2603_v25, %v2206_v62 }
 0xdd2   : > { %v2802_v1 = vpop.f32.mrf.mxu1 }
 0xdd3   : > { %v2223_v61 = vadd.f32 %v2207_v63, %v3531_v18 }
 0xdd4   : > { %v2209_v0 = vpop.f32.mrf.mxu1 }
 0xdd5   : > { %2229 = vst.msk [vmem:[#allocation2 + $0x10] sm:$0xff] %vm779_vm1, %v2223_v61  ;;  %v2210_v42 = vadd.f32 %v2603_v25, %v2209_v0 }
 0xdd6   : > { %v2803_v46 = vpop.f32.mrf.mxu1 }
 0xdd7   : > { %v2224_v5 = vadd.f32 %v2210_v42, %v3535_v35 }
 0xdd9   : > { %2230 = vst.msk [vmem:[#allocation2 + $0x18] sm:$0xff] %vm779_vm1, %v2224_v5 }
 0xe55   : > { %v2214_v24 = vpop.f32.mrf.mxu1 }
 0xe56   : > { %v2215_v47 = vadd.f32 %v2603_v25, %v2214_v24 }
 0xe57   : > { %v2806_v22 = vpop.f32.mrf.mxu1 }
 0xe58   : > { %v2225_v10 = vadd.f32 %v2215_v47, %v3547_v56 }
 0xe59   : > { %v2217_v26 = vpop.f32.mrf.mxu1 }
 0xe5a   : > { %2231 = vst.msk [vmem:[#allocation2 + $0x20] sm:$0xff] %vm779_vm1, %v2225_v10  ;;  %v2218_v28 = vadd.f32 %v2603_v25, %v2217_v26  ;;  %2236 = sbr.rel (%p2611_p9) target bundleno = 4000 (0xfa0), region = 92 }
 0xe5b   : > { %v2807_v2 = vpop.f32.mrf.mxu1 }
 0xe5c   : > { %v2226_v18 = vadd.f32 %v2218_v28, %v3557_v49 }
 0xe5e   : > { %2232 = vst.msk [vmem:[#allocation2 + $0x28] sm:$0xff] %vm779_vm1, %v2226_v18 }
 0xe5f   : > { %v2239_v35 = vsel %vm779_vm1, %v2221_v21, 0.0  ;;  %v2245_v3 = vsel %vm779_vm1, %v2223_v61, 0.0  ;;  %v2242_v56 = vsel %vm779_vm1, %v2222_v59, 0.0  ;;  %v2248_v20 = vsel %vm779_vm1, %v2224_v5, 0.0  ;;  %v2613_v47 = vld [vmem:[%s3755_s12] ss:$0 sm:$0xff] }
 0xe60   : > { %2240 = vadd.xlane.f32.xlu0 %v2239_v35  ;;  %2246 = vadd.xlane.f32.xlu1 %v2245_v3  ;;  %v2251_v38 = vsel %vm779_vm1, %v2225_v10, 0.0  ;;  %v2254_v49 = vsel %vm779_vm1, %v2226_v18, 0.0 }
 0xe64   : > { %2243 = vadd.xlane.f32.xlu0 %v2242_v56  ;;  %2249 = vadd.xlane.f32.xlu1 %v2248_v20 }
 0xe68   : > { %2252 = vadd.xlane.f32.xlu0 %v2251_v38  ;;  %2255 = vadd.xlane.f32.xlu1 %v2254_v49 }
 0xee9   : > { %v2241_v16 = vpop.xlane.xlu0 %2240  ;;  %v2247_v31 = vpop.xlane.xlu1 %2246 }
 0xeea   : > { %v2257_v32 = vmul.f32 0.03125, %v2241_v16  ;;  %v2259_v12 = vmul.f32 0.03125, %v2247_v31 }
 0xeec   : > { %v2263_v6 = vsub.f32 %v2221_v21, %v2257_v32  ;;  %v3647_v7 = vsub.f32 %v2223_v61, %v2259_v12 }
 0xeed   : > { %v2244_v8 = vpop.xlane.xlu0 %2243  ;;  %v2250_v9 = vpop.xlane.xlu1 %2249 }
 0xeee   : > { %v2258_v60 = vmul.f32 0.03125, %v2244_v8  ;;  %v2260_v13 = vmul.f32 0.03125, %v2250_v9  ;;  %v2269_v4 = vmul.f32 %v2263_v6, %v2263_v6  ;;  %v2271_v14 = vmul.f32 %v3647_v7, %v3647_v7 }
 0xef0   : > { %v2264_v15 = vsub.f32 %v2222_v59, %v2258_v60  ;;  %v3651_v11 = vsub.f32 %v2224_v5, %v2260_v13  ;;  %v2275_v19 = vsel %vm779_vm1, %v2269_v4, 0.0  ;;  %v2281_v34 = vsel %vm779_vm1, %v2271_v14, 0.0  ;;  %v2612_v5 = vld [vmem:[%s3754_s1] ss:$0 sm:$0xff] }
 0xef1   : > { %2276 = vadd.xlane.f32.xlu0 %v2275_v19  ;;  %v2253_v27 = vpop.xlane.xlu0 %2252  ;;  %v2256_v33 = vpop.xlane.xlu1 %2255 }
 0xef2   : > { %v2261_v17 = vmul.f32 0.03125, %v2253_v27  ;;  %v2262_v36 = vmul.f32 0.03125, %v2256_v33  ;;  %v2270_v37 = vmul.f32 %v2264_v15, %v2264_v15  ;;  %v2272_v39 = vmul.f32 %v3651_v11, %v3651_v11 }
 0xef4   : > { %v2267_v53 = vsub.f32 %v2225_v10, %v2261_v17  ;;  %v2268_v23 = vsub.f32 %v2226_v18, %v2262_v36  ;;  %v2278_v40 = vsel %vm779_vm1, %v2270_v37, 0.0  ;;  %v2284_v41 = vsel %vm779_vm1, %v2272_v39, 0.0 }
 0xef5   : > { %2282 = vadd.xlane.f32.xlu0 %v2281_v34  ;;  %2279 = vadd.xlane.f32.xlu1 %v2278_v40 }
 0xef6   : > { %v2273_v43 = vmul.f32 %v2267_v53, %v2267_v53  ;;  %v2274_v44 = vmul.f32 %v2268_v23, %v2268_v23 }
 0xef8   : > { %v2287_v45 = vsel %vm779_vm1, %v2273_v43, 0.0  ;;  %v2290_v48 = vsel %vm779_vm1, %v2274_v44, 0.0 }
 0xef9   : > { %2285 = vadd.xlane.f32.xlu1 %v2284_v41  ;;  %2288 = vadd.xlane.f32.xlu0 %v2287_v45 }
 0xefd   : > { %2291 = vadd.xlane.f32.xlu1 %v2290_v48 }
 0xf7a   : > { %v2277_v50 = vpop.xlane.xlu0 %2276 }
 0xf7b   : > { %v2293_v51 = vmul.f32 0.03125, %v2277_v50 }
 0xf7d   : > { %v2299_v52 = vadd.f32 1e-06, %v2293_v51 }
 0xf7e   : > { %v2280_v25 = vpop.xlane.xlu1 %2279  ;;  %v2283_v54 = vpop.xlane.xlu0 %2282 }
 0xf7f   : > { %2971 = vrsqrt.f32 %v2299_v52  ;;  %v2294_v30 = vmul.f32 0.03125, %v2280_v25  ;;  %v2295_v55 = vmul.f32 0.03125, %v2283_v54 }
 0xf81   : > { %v2300_v21 = vadd.f32 1e-06, %v2294_v30  ;;  %v2301_v29 = vadd.f32 1e-06, %v2295_v55 }
 0xf82   : > { %v2286_v58 = vpop.xlane.xlu1 %2285  ;;  %v2289_v57 = vpop.xlane.xlu0 %2288 }
 0xf83   : > { %2973 = vrsqrt.f32 %v2300_v21  ;;  %v2296_v59 = vmul.f32 0.03125, %v2286_v58  ;;  %v2297_v62 = vmul.f32 0.03125, %v2289_v57 }
 0xf84   : > { %2975 = vrsqrt.f32 %v2301_v29 }
 0xf85   : > { %v2302_v63 = vadd.f32 1e-06, %v2296_v59  ;;  %v2303_v1 = vadd.f32 1e-06, %v2297_v62 }
 0xf86   : > { %v2292_v61 = vpop.xlane.xlu1 %2291 }
 0xf87   : > { %2977 = vrsqrt.f32 %v2302_v63  ;;  %v2298_v0 = vmul.f32 0.03125, %v2292_v61 }
 0xf88   : > { %2979 = vrsqrt.f32 %v2303_v1 }
 0xf89   : > { %v2304_v42 = vadd.f32 1e-06, %v2298_v0 }
 0xf8b   : > { %2981 = vrsqrt.f32 %v2304_v42 }
 0xf8c   : > { %v2972_v46 = vpop.eup %2971 }
 0xf8d   : > { %v2311_v24 = vmul.f32 %v2972_v46, %v2263_v6 }
 0xf8f   : > { %v2323_v22 = vmul.f32 %v2612_v5, %v2311_v24 }
 0xf90   : > { %v2974_v10 = vpop.eup %2973 }
 0xf91   : > { %v2976_v26 = vpop.eup %2975  ;;  %v2335_v28 = vadd.f32 %v2613_v47, %v2323_v22  ;;  %v2312_v2 = vmul.f32 %v2974_v10, %v2264_v15 }
 0xf92   : > { %v2313_v18 = vmul.f32 %v2976_v26, %v3647_v7 }
 0xf93   : > { %2341 = vst.msk [vmem:[%s3216_s24] sm:$0xff] %vm779_vm1, %v2335_v28  ;;  %v2324_v35 = vmul.f32 %v2612_v5, %v2312_v2 }
 0xf94   : > { %v2978_v3 = vpop.eup %2977  ;;  %v2325_v56 = vmul.f32 %v2612_v5, %v2313_v18 }
 0xf95   : > { %v2980_v20 = vpop.eup %2979  ;;  %v2336_v38 = vadd.f32 %v2613_v47, %v2324_v35  ;;  %v2314_v49 = vmul.f32 %v2978_v3, %v3651_v11 }
 0xf96   : > { %v2337_v16 = vadd.f32 %v2613_v47, %v2325_v56  ;;  %v2315_v31 = vmul.f32 %v2980_v20, %v2267_v53 }
 0xf97   : > { %2342 = vst.msk [vmem:[%s3216_s24 + $0x8] sm:$0xff] %vm779_vm1, %v2336_v38  ;;  %v2326_v32 = vmul.f32 %v2612_v5, %v2314_v49 }
 0xf98   : > { %v2982_v12 = vpop.eup %2981  ;;  %2343 = vst.msk [vmem:[%s3216_s24 + $0x10] sm:$0xff] %vm779_vm1, %v2337_v16  ;;  %v2327_v6 = vmul.f32 %v2612_v5, %v2315_v31 }
 0xf99   : > { %v2338_v7 = vadd.f32 %v2613_v47, %v2326_v32  ;;  %v2316_v8 = vmul.f32 %v2982_v12, %v2268_v23 }
 0xf9a   : > { %v2339_v9 = vadd.f32 %v2613_v47, %v2327_v6 }
 0xf9b   : > { %2344 = vst.msk [vmem:[%s3216_s24 + $0x18] sm:$0xff] %vm779_vm1, %v2338_v7  ;;  %v2328_v60 = vmul.f32 %v2612_v5, %v2316_v8 }
 0xf9c   : > { %2345 = vst.msk [vmem:[%s3216_s24 + $0x20] sm:$0xff] %vm779_vm1, %v2339_v9 }
 0xf9d   : > { %v2340_v13 = vadd.f32 %v2613_v47, %v2328_v60 }
 0xf9f   : > { %2346 = vst.msk [vmem:[%s3216_s24 + $0x28] sm:$0xff] %vm779_vm1, %v2340_v13 }
 0xfa0 PF: > { %s3756_s16 = sld [smem:[#allocation6_spill]] }
 0xfa1   : > { %s3757_s21 = sld [smem:[#allocation4_spill]] }
 0xfa2   : > { %s3758_s22 = sld [smem:[#allocation5_spill]] }
 0xfa3   : > { %s3759_s23 = sld [smem:[#allocation7_spill]] }
 0xfa4   : > { %s3760_s24 = sld [smem:[#allocation8_spill]] }
 0xfa6   : > { %s26_s25 = sadd.s32 1, %s3756_s16  }
 0xfa7   : > { %p23_p10 = scmp.ge.s32.totalorder %s26_s25, 6  }
 0xfa9   :  { %25 = sbr.rel (!%p23_p10) target bundleno = 10 (0xa), region = 163 }

// kernel: model_forward.5
= control target key start
LH: loop header
LB: loop body
LE: loop exit
PB: predicated region body
PF: predicated region fallthrough
CT: control target
= control target key end

     0   :  { %s3075_s27 = smov 0   ;;  %s3081_s28 = smov 0   ;;  %s3454_s0 = inlined_call_operand.vmem [shape: f32[2,7,32], index: 0, kind: input, shape index: {}]   ;;  %s3455_s1 = inlined_call_operand.vmem [shape: f32[2,4,32], index: 1, kind: input, shape index: {}]   ;;  %s3456_s2 = inlined_call_operand.vmem [shape: f32[2,7,7], index: 2, kind: input, shape index: {}]   ;;  %s3457_s3 = inlined_call_operand.vmem [shape: f32[2,1,4], index: 3, kind: input, shape index: {}]   ;;  %s3458_s4 = inlined_call_operand.vmem [shape: f32[2,1,32], index: 4, kind: input, shape index: {}]   ;;  %s3459_s5 = inlined_call_operand.vmem [shape: f32[2,1,32], index: 5, kind: input, shape index: {}]   ;;  %s3460_s6 = inlined_call_operand.vmem [shape: bf16[2,32,96], index: 6, kind: input, shape index: {}]   ;;  %s3461_s7 = inlined_call_operand.vmem [shape: f32[2,1,96], index: 7, kind: input, shape index: {}]   ;;  %s3462_s8 = inlined_call_operand.vmem [shape: bf16[2,32,32], index: 8, kind: input, shape index: {}]   ;;  %s3463_s9 = inlined_call_operand.vmem [shape: f32[2,1,32], index: 9, kind: input, shape index: {}]   ;;  %s3464_s10 = inlined_call_operand.vmem [shape: f32[2,1,32], index: 10, kind: input, shape index: {}]   ;;  %s3465_s11 = inlined_call_operand.vmem [shape: f32[2,1,32], index: 11, kind: input, shape index: {}]   ;;  %s3466_s12 = inlined_call_operand.vmem [shape: bf16[2,32,32], index: 12, kind: input, shape index: {}]   ;;  %s3467_s13 = inlined_call_operand.vmem [shape: f32[2,1,32], index: 13, kind: input, shape index: {}]   ;;  %s3468_s14 = inlined_call_operand.vmem [shape: bf16[2,32,64], index: 14, kind: input, shape index: {}]   ;;  %s3469_s15 = inlined_call_operand.vmem [shape: f32[2,1,64], index: 15, kind: input, shape index: {}]   ;;  %s3470_s16 = inlined_call_operand.vmem [shape: bf16[2,32,32], index: 16, kind: input, shape index: {}]   ;;  %s3471_s17 = inlined_call_operand.vmem [shape: f32[2,1,32], index: 17, kind: input, shape index: {}]   ;;  %s3472_s18 = inlined_call_operand.vmem [shape: f32[2,1,32], index: 18, kind: input, shape index: {}]   ;;  %s3473_s19 = inlined_call_operand.vmem [shape: f32[2,1,32], index: 19, kind: input, shape index: {}]   ;;  %s3474_s20 = inlined_call_operand.vmem [shape: bf16[2,32,64], index: 20, kind: input, shape index: {}]   ;;  %s3475_s21 = inlined_call_operand.vmem [shape: f32[2,1,64], index: 21, kind: input, shape index: {}]   ;;  %s3476_s22 = inlined_call_operand.vmem [shape: bf16[2,64,32], index: 22, kind: input, shape index: {}]   ;;  %s3477_s23 = inlined_call_operand.vmem [shape: f32[2,1,32], index: 23, kind: input, shape index: {}]   ;;  %s3478_s24 = inlined_call_operand.vmem [shape: f32[1,32], index: 24, kind: input, shape index: {}]   ;;  %s3479_s25 = inlined_call_operand.vmem [shape: f32[1,32], index: 25, kind: input, shape index: {}]   ;;  %s3480_s26 = inlined_call_operand.vmem [shape: f32[2,7,32], index: 26, kind: output, shape index: {}]  }
   0x1   :  { %3487 = sst [smem:[#allocation12_spill]] %s3454_s0 }
   0x2   :  { %3488 = sst [smem:[#allocation13_spill]] %s3455_s1 }
   0x3   :  { %3489 = sst [smem:[#allocation14_spill]] %s3456_s2 }
   0x4   :  { %3490 = sst [smem:[#allocation15_spill]] %s3457_s3  ;;  %s3077_s3 = smov 0  }
   0x5   :  { %3491 = sst [smem:[#allocation16_spill]] %s3458_s4 }
   0x6   :  { %3492 = sst [smem:[#allocation17_spill]] %s3459_s5 }
   0x7   :  { %3493 = sst [smem:[#allocation18_spill]] %s3460_s6 }
   0x8   :  { %3494 = sst [smem:[#allocation19_spill]] %s3461_s7  ;;  %s3079_s7 = smov 0  }
   0x9   :  { %3495 = sst [smem:[#allocation20_spill]] %s3462_s8  ;;  %s3083_s8 = smov 0  }
   0xa   :  { %3496 = sst [smem:[#allocation21_spill]] %s3463_s9 }
   0xb   :  { %3497 = sst [smem:[#allocation22_spill]] %s3464_s10 }
   0xc   :  { %3498 = sst [smem:[#allocation23_spill]] %s3466_s12 }
   0xd   :  { %3499 = sst [smem:[#allocation24_spill]] %s3467_s13 }
   0xe   :  { %3500 = sst [smem:[#allocation25_spill]] %s3468_s14 }
   0xf   :  { %3501 = sst [smem:[#allocation26_spill]] %s3470_s16 }
  0x10   :  { %3502 = sst [smem:[#allocation27_spill]] %s3471_s17 }
  0x11   :  { %3503 = sst [smem:[#allocation28_spill]] %s3473_s19 }
  0x12   :  { %3504 = sst [smem:[#allocation29_spill]] %s3474_s20 }
  0x13   :  { %3505 = sst [smem:[#allocation30_spill]] %s3475_s21 }
  0x14   :  { %3506 = sst [smem:[#allocation31_spill]] %s3476_s22 }
  0x15   :  { %3507 = sst [smem:[#allocation32_spill]] %s3477_s23 }
  0x16   :  { %3508 = sst [smem:[#allocation33_spill]] %s3478_s24 }
  0x17   :  { %3509 = sst [smem:[#allocation34_spill]] %s3479_s25 }
  0x18   :  { %3510 = sst [smem:[#allocation35_spill]] %s3480_s26 }
  0x19 LB: > { %3511 = sst [smem:[#allocation3_spill]] %s2915_s27  ;;  %s45_s4 = sadd.s32 1, %s2923_s7  ;;  %s2931_s8 = sphi %s3083_s8, %s36_s8   ;;  %s2927_s28 = sphi %s3081_s28, %s3579_s28   ;;  %s2923_s7 = sphi %s3079_s7, %s3578_s7   ;;  %s2919_s3 = sphi %s3077_s3, %s3577_s3   ;;  %s2915_s27 = sphi %s3075_s27, %s3576_s27  }
  0x1a   : > { %3512 = sst [smem:[#allocation4_spill]] %s2923_s7  ;;  %s48_s29 = sadd.s32 1, %s2927_s28 }
  0x1b   : > { %3513 = sst [smem:[#allocation5_spill]] %s2927_s28  ;;  %p46_p0 = scmp.ge.s32.totalorder %s45_s4, 2 }
  0x1c   : > { %3514 = sst [smem:[#allocation6_spill]] %s2931_s8  ;;  %p2582_p1 = scmp.ge.s32.totalorder %s2931_s8, 1 }
  0x1d   : > { %p923_p2 = scmp.lt.s32.totalorder %s2931_s8, 5  ;;  %s3581_s4 = smov (%p46_p0, %s45_s4), 0 }
  0x1e   : > { %3515 = sst [smem:[#allocation7_spill]] %s3581_s4  ;;  %s3583_s29 = smov (!%p46_p0, %s48_s29), %s2927_s28 }
  0x1f   : > { %p924_p3 = pnand %p2582_p1, %p923_p2  ;;  %p50_p4 = scmp.ge.s32.totalorder %s3583_s29, 2 }
  0x21   : > { %s3585_s29 = smov (%p50_p4, %s3583_s29), 0  ;;  %927 = sbr.rel (%p924_p3) target bundleno = 4501 (0x1195), region = 124 }
  0x22   : > { %3516 = sst [smem:[#allocation8_spill]] %s3585_s29 }
  0x26   : > { %p1076_p5 = scmp.lt.s32.totalorder %s2919_s3, 1  ;;  %p1091_p6 = scmp.lt.s32.totalorder %s2915_s27, 1 }
  0x27   : > { %s3518_s10 = sld [smem:[#allocation12_spill]] }
  0x28   : > { %s3587_s3 = smov (!%p1076_p5, %s2919_s3), 1  ;;  %s3519_s4 = sld [smem:[#allocation13_spill]] }
  0x29   : > { %3517 = sst [smem:[#allocation9_spill]] %s3587_s3  ;;  %s3114_s9 = sshll.u32 %s3587_s3, 3 }
  0x2a   : > { %s3111_s0 = scalar_select %p1091_p6, %s2915_s27, 1 }
  0x2b   : > { %s2584_s30 = sshll.u32 %s3587_s3, 2  ;;  %s3526_s27 = sld [smem:[#allocation18_spill]] }
  0x2c   : > { %s3527_s19 = sld [smem:[#allocation20_spill]]  ;;  %s2658_s13 = sshll.u32 %s3111_s0, 5 }
  0x2d   : > { %s1079_s6 = scalar_lea.vmem %s3518_s10, %s3114_s9  ;;  %s3530_s12 = sld [smem:[#allocation23_spill]] }
  0x2e   : > { %s3124_s28 = scalar_lea.vmem %s3519_s4, %s2584_s30  ;;  %s2652_s30 = sshll.u32 %s3111_s0, 4 }
  0x2f   : > { %3520 = sst [smem:[#allocation10_spill]] %s3124_s28 }
  0x30   : > { %s3532_s14 = sld [smem:[#allocation25_spill]] }
  0x31   : > { %s3150_s23 = scalar_lea.vmem %s3526_s27, %s2652_s30  ;;  %s3533_s16 = sld [smem:[#allocation26_spill]] }
  0x32   : > { %s3155_s22 = scalar_lea.vmem %s3527_s19, %s2652_s30  ;;  %s3537_s28 = sld [smem:[#allocation29_spill]] }
  0x33   : > { %s3172_s20 = scalar_lea.vmem %s3530_s12, %s2652_s30  ;;  %s3539_s7 = sld [smem:[#allocation31_spill]] }
  0x34   : > { %s3540_s5 = sld [smem:[#allocation32_spill]] }
  0x36   : > { %s3181_s24 = scalar_lea.vmem %s3532_s14, %s2652_s30  ;;  %s3541_s14 = sld [smem:[#allocation35_spill]] }
  0x37   : > { %s3190_s26 = scalar_lea.vmem %s3533_s16, %s2652_s30  ;;  %s3538_s16 = sld [smem:[#allocation30_spill]] }
  0x38   : > { %3534 = sst [smem:[#allocation11_spill]] %s3190_s26  ;;  %s3207_s1 = scalar_lea.vmem %s3537_s28, %s2652_s30 }
  0x39   : > { %s3217_s17 = scalar_lea.vmem %s3539_s7, %s2658_s13  ;;  %s3542_s30 = sld [smem:[#allocation3_spill]] }
  0x3a   : > { %s1164_s10 = scalar_lea.vmem %s3540_s5, %s3111_s0 }
  0x3c   : > { %s1168_s3 = scalar_lea.vmem %s3541_s14, %s3114_s9 }
  0x3d   : > { %s1156_s26 = scalar_lea.vmem %s3538_s16, %s3111_s0 }
  0x3f   : > { %p2601_p7 = scmp.ne.s32.totalorder %s3542_s30, 0 }
  0x41   : > { %1173 = sbr.rel (%p2601_p7) target bundleno = 72 (0x48), region = 128 }
  0x46   : > { %v1174_v0 = vld [vmem:[%s1079_s6] sm:$0x7f]  ;;  %vm1175_vm0 = vcmask 260096  }
  0x47   : > { %1176 = vst.msk [vmem:[#allocation2] sm:$0x7f] %vm1175_vm0, %v1174_v0 }
  0x48 PF: > { %vm1181_vm1 = vcmask 260096   ;;  %v2853_v8 = vld [vmem:[%s3150_s23 + $0x8] sm:$0xff]   ;;  %v2933_v9 = vmov 0.0   ;;  %vm2934_vm2 = vmmov 0   ;;  %v2854_v10 = vld [vmem:[%s3150_s23] sm:$0xff]   ;;  %s3543_s16 = sld [smem:[#allocation16_spill]]  ;;  %s3557_s12 = scalar_lea.vmem %s3469_s15, %s3111_s0 }
  0x49   : > { %2698 = vmatprep.subr.bf16.mxu1 %v2933_v9  ;;  %2702 = vmatprep.mubr.msk.bf16.mxu1 %vm2934_vm2, %v2933_v9  ;;  %s3545_s5 = sld [smem:[#allocation17_spill]]  ;;  %vm1234_vm3 = vcmask 261120   ;;  %s2935_s27 = smov 112   ;;  %vm1288_vm4 = vcmask 130048   ;;  %vm1388_vm5 = vcmask 55296   ;;  %vm1419_vm6 = vcmask 1042432  }
  0x4a   : > { %2699 = vmatpush3.bf16.msra.mxu1 %v2853_v8  ;;  %2712 = vmatprep.subr.bf16.mxu0 %v2933_v9  ;;  %s3547_s8 = sld [smem:[#allocation19_spill]]  ;;  %s2936_s21 = smov 96   ;;  %vm1420_vm7 = vcmask 1043456   ;;  %v2938_v59 = vmov 65535   ;;  %vm1415_vm8 = vcmask 56320   ;;  %vm1865_vm9 = vcmask 30720  }
  0x4b   : > { %2700 = vmatprep.subr.bf16.mxu1 %v2933_v9  ;;  %2714 = vmatprep.mubr.msk.bf16.mxu0 %vm2934_vm2, %v2933_v9  ;;  %s3549_s29 = sld [smem:[#allocation14_spill]]  ;;  %s2937_s13 = smov 64   ;;  %v1421_v60 = vsel %vm1419_vm6, 4294967295, %v2938_v59  ;;  %vm1897_vm10 = vcmask 1041408   ;;  %vm1893_vm11 = vcmask 31744   ;;  %vm2200_vm12 = vcmask 523264  }
  0x4c   : > { %v1422_v62 = vsel %vm1420_vm7, %v1421_v60, 0  ;;  %s2939_s14 = smov 16   ;;  %s3553_s7 = sld [smem:[#allocation10_spill]] }
  0x4d   : > { %s3566_s25 = scalar_lea.vmem %s3472_s18, %s3111_s0 }
  0x4e   : > { %v3228_v1 = vld [vmem:[#allocation2] sm:$0x7f]  ;;  %2701 = vmatpush3.bf16.msra.mxu1 %v2854_v10  ;;  %s3544_s6 = scalar_lea.vmem %s3543_s16, %s3111_s0  ;;  %s3560_s16 = sld [smem:[#allocation9_spill]] }
  0x4f   : > { %v1182_v2 = vsel %vm1181_vm1, %v3228_v1, 0.0  ;;  %2706 = vmatprep.subr.bf16.mxu1 %v2933_v9  ;;  %v2602_v15 = vld [vmem:[%s3544_s6] ss:$0 sm:$0xff]  ;;  %s3546_s4 = scalar_lea.vmem %s3545_s5, %s3111_s0  ;;  %s3551_s6 = sld [smem:[#allocation21_spill]] }
  0x50   : > { %1183 = vadd.xlane.f32.xlu0 %v1182_v2  ;;  %v2603_v17 = vld [vmem:[%s3546_s4] ss:$0 sm:$0xff]  ;;  %s3548_s2 = scalar_lea.vmem %s3547_s8, %s3111_s0  ;;  %s3554_s4 = sld [smem:[#allocation22_spill]] }
  0x51   : > { %v2604_v21 = vld [vmem:[%s3548_s2] ss:$0 sm:$0xff]  ;;  %s3550_s30 = scalar_lea.vmem %s3549_s29, %s3114_s9  ;;  %s3567_s2 = sld [smem:[#allocation28_spill]] }
  0x52   : > { %v1278_v35 = vld [vmem:[%s3550_s30] sm:$0x7f] }
  0x55   : > { %s3552_s23 = scalar_lea.vmem %s3551_s6, %s3111_s0 }
  0x56   : > { %s3555_s28 = scalar_lea.vmem %s3554_s4, %s3111_s0  ;;  %s3564_s4 = sld [smem:[#allocation27_spill]] }
  0x57   : > { %s3568_s19 = scalar_lea.vmem %s3567_s2, %s3111_s0 }
  0xd9   : > { %v1184_v3 = vpop.xlane.xlu0 %1183 }
  0xda   : > { %v1186_v4 = vmul.f32 0.03125, %v1184_v3 }
  0xdc   : > { %v1187_v5 = vsub.f32 %v3228_v1, %v1186_v4 }
  0xde   : > { %v1188_v6 = vmul.f32 %v1187_v5, %v1187_v5 }
  0xe0   : > { %v1189_v7 = vsel %vm1181_vm1, %v1188_v6, 0.0 }
  0xe1   : > { %1190 = vadd.xlane.f32.xlu0 %v1189_v7 }
 0x16a   : > { %v1191_v11 = vpop.xlane.xlu0 %1190 }
 0x16b   : > { %v1192_v12 = vmul.f32 0.03125, %v1191_v11 }
 0x16d   : > { %v1193_v13 = vadd.f32 1e-06, %v1192_v12  ;;  %v2855_v12 = vld [vmem:[%s3155_s22 + $0x8] sm:$0xff]  }
 0x16f   : > { %2869 = vrsqrt.f32 %v1193_v13 }
 0x17c   : > { %v2870_v14 = vpop.eup %2869 }
 0x17d   : > { %v1195_v16 = vmul.f32 %v2870_v14, %v1187_v5 }
 0x17f   : > { %v1202_v18 = vmul.f32 %v2602_v15, %v1195_v16 }
 0x181   : > { %v1209_v19 = vadd.f32 %v2603_v17, %v1202_v18  ;;  %v2856_v17 = vld [vmem:[%s3155_s22] sm:$0xff]  }
 0x183   : > { %v1214_v20 = vpack.c.bf16 %v1209_v19, %v1209_v19 }
 0x185   : > { %2703 = vmatmul.mubr.msk.bf16.vlgmr.msra.gmra.mxu1 %vm1234_vm3, %v1214_v20 }
 0x186   : > { %2708 = vmatprep.mubr.msk.bf16.mxu1 %vm2934_vm2, %v2933_v9 }
 0x245   : > { %v1272_v22 = vpop.f32.mrf.mxu1 }
 0x246   : > { %v1273_v23 = vadd.f32 %v2604_v21, %v1272_v22 }
 0x247   : > { %v2704_v24 = vpop.f32.mrf.mxu1 }
 0x248   : > { %v1283_v25 = vpack.c.bf16 %v1273_v23, %v1273_v23  ;;  %1280 = vrot.lane.b32.xlu1 %v1273_v23, %s2935_s27 }
 0x249   : > { %v1275_v26 = vpop.f32.mrf.mxu1 }
 0x24a   : > { %1286 = vrot.lane.b32.xlu0 %v1283_v25, %s2936_s21 }
 0x24b   : > { %v2705_v27 = vpop.f32.mrf.mxu1 }
 0x2ba   : > { %v1281_v28 = vpop.permute.xlu1 %1280 }
 0x2bb   : > { %v1284_v29 = vpack.c.bf16 %v1281_v28, %v1281_v28 }
 0x2bc   : > { %v1287_v30 = vpop.permute.xlu0 %1286 }
 0x2bd   : > { %v1293_v31 = vsel %vm1288_vm4, %v1287_v30, 0  ;;  %1336 = vrot.lane.b32.xlu1 %v1284_v29, %s2936_s21 }
 0x2be   : > { %2707 = vmatpush3.bf16.xpose.msra.mxu1 %v1293_v31 }
 0x2bf   : > { %2718 = vmatprep.subr.bf16.mxu1 %v2933_v9 }
 0x2c5   : > { %2709 = vmatmul.mubr.msk.bf16.vlgmr.msra.gmra.mxu1 %vm1288_vm4, %v1283_v25 }
 0x2c6   : > { %2720 = vmatprep.mubr.msk.bf16.mxu1 %vm2934_vm2, %v2933_v9 }
 0x32f   : > { %v1337_v32 = vpop.permute.xlu1 %1336 }
 0x330   : > { %v1342_v33 = vsel %vm1288_vm4, %v1337_v32, 0 }
 0x331   : > { %2713 = vmatpush3.bf16.xpose.msra.mxu0 %v1342_v33 }
 0x332   : > { %2724 = vmatprep.subr.bf16.mxu0 %v2933_v9 }
 0x338   : > { %2715 = vmatmul.mubr.msk.bf16.vlgmr.msra.gmra.mxu0 %vm1288_vm4, %v1284_v29 }
 0x339   : > { %2726 = vmatprep.mubr.msk.bf16.mxu0 %vm2934_vm2, %v2933_v9 }
 0x385   : > { %v1329_v34 = vpop.f32.mrf.mxu1 }
 0x386   : > { %v1384_v36 = vmul.f32 0.25, %v1329_v34 }
 0x387   : > { %v2710_v37 = vpop.f32.mrf.mxu1 }
 0x388   : > { %v1386_v38 = vadd.f32 %v1384_v36, %v1278_v35 }
 0x389   : > { %v1332_v39 = vpop.f32.mrf.mxu1 }
 0x38a   : > { %v1389_v40 = vsel %vm1388_vm5, %v1386_v38, -inf  ;;  %v1178_v39 = vld [vmem:[%s3553_s7] sm:$0xf]  ;;  %s3561_s7 = sld [smem:[#allocation15_spill]] }
 0x38b   : > { %1390 = vmax.xlane.f32.xlu0 %v1389_v40  ;;  %v2711_v41 = vpop.f32.mrf.mxu1  ;;  %v1687_v40 = vpack.c.bf16 %v1178_v39, %v1178_v39 }
 0x38c   : > { %v2859_v41 = vld [vmem:[%s3172_s20 + $0x8] sm:$0xff]  }
 0x3f8   : > { %v1378_v42 = vpop.f32.mrf.mxu0 }
 0x3f9   : > { %v1385_v43 = vmul.f32 0.25, %v1378_v42  ;;  %v2860_v42 = vld [vmem:[%s3172_s20] sm:$0xff]   ;;  %s3556_s20 = scalar_lea.vmem %s3465_s11, %s3111_s0 }
 0x3fa   : > { %v2716_v44 = vpop.f32.mrf.mxu0 }
 0x3fb   : > { %v1387_v45 = vadd.f32 %v1385_v43, %v1278_v35 }
 0x3fc   : > { %v1381_v46 = vpop.f32.mrf.mxu0 }
 0x3fd   : > { %v1392_v47 = vsel %vm1388_vm5, %v1387_v45, -inf }
 0x3fe   : > { %1393 = vmax.xlane.f32.xlu1 %v1392_v47  ;;  %v2717_v48 = vpop.f32.mrf.mxu0  ;;  %v2616_v47 = vld [vmem:[%s3555_s28] ss:$0 sm:$0xff]  ;;  %s3565_s28 = scalar_lea.vmem %s3564_s4, %s3111_s0 }
 0x414   : > { %v1391_v49 = vpop.xlane.xlu0 %1390 }
 0x415   : > { %v1395_v50 = vsub.f32 %v1386_v38, %v1391_v49  ;;  %v2857_v38 = vld [vmem:[%s3181_s24 + $0x8] sm:$0xff]   ;;  %v2617_v49 = vld [vmem:[%s3556_s20] ss:$0 sm:$0xff] }
 0x417   : > { %v1397_v51 = vmul.f32 1.442695, %v1395_v50 }
 0x419   : > { %2871 = vpow2.f32 %v1397_v51 }
 0x426   : > { %v2872_v52 = vpop.eup %2871 }
 0x427   : > { %v1401_v53 = vsel %vm1388_vm5, %v2872_v52, 0.0 }
 0x428   : > { %1402 = vadd.xlane.f32.xlu0 %v1401_v53  ;;  %v2622_v53 = vld [vmem:[%s3557_s12] ss:$0 sm:$0xff] }
 0x43e   : > { %1413 = vrot.lane.b32.xlu0 %v1283_v25, %s2937_s13  ;;  %v2612_v25 = vld [vmem:[%s3552_s23] ss:$0 sm:$0xff] }
 0x487   : > { %v1394_v54 = vpop.xlane.xlu1 %1393 }
 0x488   : > { %v1396_v55 = vsub.f32 %v1387_v45, %v1394_v54 }
 0x48a   : > { %v1399_v56 = vmul.f32 1.442695, %v1396_v55 }
 0x48c   : > { %2873 = vpow2.f32 %v1399_v56 }
 0x499   : > { %v2874_v57 = vpop.eup %2873 }
 0x49a   : > { %v1404_v58 = vsel %vm1388_vm5, %v2874_v57, 0.0 }
 0x49b   : > { %1405 = vadd.xlane.f32.xlu1 %v1404_v58 }
 0x4ac   : > { %1466 = vrot.lane.b32.xlu1 %v1284_v29, %s2937_s13  ;;  %s3558_s13 = sld [smem:[#allocation24_spill]] }
 0x4b1   : > { %v1403_v61 = vpop.xlane.xlu0 %1402 }
 0x4b2   : > { %2875 = vrcp.f32 %v1403_v61  ;;  %s3559_s22 = scalar_lea.vmem %s3558_s13, %s3111_s0 }
 0x4b5   : > { %v1414_v63 = vpop.permute.xlu0 %1413 }
 0x4b6   : > { %v1424_v0 = vand.u32 %v1422_v62, %v1414_v63 }
 0x4b8   : > { %2719 = vmatpush3.bf16.msra.mxu1 %v1424_v0  ;;  %v2618_v0 = vld [vmem:[%s3559_s22] ss:$0 sm:$0xff] }
 0x4b9   : > { %2730 = vmatprep.subr.bf16.mxu1 %v2933_v9 }
 0x4bf   : > { %v2876_v2 = vpop.eup %2875 }
 0x4c0   : > { %v1409_v3 = vmul.f32 %v2876_v2, %v2872_v52 }
 0x4c2   : > { %v1411_v4 = vpack.c.bf16 %v1409_v3, %v1409_v3 }
 0x4c4   : > { %2721 = vmatmul.mubr.msk.bf16.vlgmr.msra.gmra.mxu1 %vm1415_vm8, %v1411_v4 }
 0x4c5   : > { %2734 = vmatprep.mubr.msk.bf16.mxu1 %vm2934_vm2, %v2933_v9  ;;  %2731 = vmatpush3.bf16.msra.mxu1 %v2855_v12 }
 0x4c6   : > { %2732 = vmatprep.subr.bf16.mxu1 %v2933_v9 }
 0x4c9   : > { %2733 = vmatpush3.bf16.msra.mxu1 %v2856_v17 }
 0x4ca   : > { %2746 = vmatprep.subr.bf16.mxu1 %v2933_v9 }
 0x524   : > { %v1406_v5 = vpop.xlane.xlu1 %1405 }
 0x525   : > { %2877 = vrcp.f32 %v1406_v5 }
 0x528   : > { %v1467_v6 = vpop.permute.xlu1 %1466 }
 0x529   : > { %v1472_v7 = vand.u32 %v1467_v6, %v1422_v62 }
 0x52b   : > { %2725 = vmatpush3.bf16.msra.mxu0 %v1472_v7 }
 0x52c   : > { %2738 = vmatprep.subr.bf16.mxu0 %v2933_v9 }
 0x532   : > { %v2878_v8 = vpop.eup %2877 }
 0x533   : > { %v1410_v10 = vmul.f32 %v2878_v8, %v2874_v57 }
 0x535   : > { %v1412_v11 = vpack.c.bf16 %v1410_v10, %v1410_v10 }
 0x537   : > { %2727 = vmatmul.mubr.msk.bf16.vlgmr.msra.gmra.mxu0 %vm1415_vm8, %v1412_v11 }
 0x538   : > { %2742 = vmatprep.mubr.msk.bf16.mxu0 %vm2934_vm2, %v2933_v9  ;;  %2739 = vmatpush3.bf16.msra.mxu0 %v2859_v41 }
 0x539   : > { %2740 = vmatprep.subr.bf16.mxu0 %v2933_v9 }
 0x53c   : > { %2741 = vmatpush3.bf16.msra.mxu0 %v2860_v42 }
 0x53d   : > { %2754 = vmatprep.subr.bf16.mxu0 %v2933_v9 }
 0x584   : > { %v1460_v13 = vpop.f32.mrf.mxu1 }
 0x586   : > { %v2722_v14 = vpop.f32.mrf.mxu1 }
 0x588   : > { %v1463_v15 = vpop.f32.mrf.mxu1 }
 0x58a   : > { %v2723_v16 = vpop.f32.mrf.mxu1 }
 0x5f7   : > { %v1508_v18 = vpop.f32.mrf.mxu0 }
 0x5f8   : > { %1515 = vrot.lane.b32.xlu1 %v1508_v18, %s2939_s14 }
 0x5f9   : > { %v2728_v19 = vpop.f32.mrf.mxu0 }
 0x5fb   : > { %v1511_v20 = vpop.f32.mrf.mxu0 }
 0x5fd   : > { %v2729_v21 = vpop.f32.mrf.mxu0 }
 0x66a   : > { %v1516_v22 = vpop.permute.xlu1 %1515 }
 0x66b   : > { %v1518_v23 = vsel %vm1288_vm4, %v1460_v13, %v1516_v22 }
 0x66c   : > { %v1523_v24 = vpack.c.bf16 %v1518_v23, %v1518_v23 }
 0x66e   : > { %2735 = vmatmul.mubr.msk.bf16.vlgmr.msra.gmra.mxu1 %vm1234_vm3, %v1523_v24 }
 0x66f   : > { %2750 = vmatprep.mubr.msk.bf16.mxu1 %vm2934_vm2, %v2933_v9  ;;  %2747 = vmatpush3.bf16.msra.mxu1 %v2857_v38 }
 0x670   : > { %2748 = vmatprep.subr.bf16.mxu1 %v2933_v9 }
 0x72e   : > { %v1580_v26 = vpop.f32.mrf.mxu1 }
 0x72f   : > { %v1581_v27 = vadd.f32 %v2612_v25, %v1580_v26 }
 0x730   : > { %v2736_v28 = vpop.f32.mrf.mxu1 }
 0x731   : > { %v3305_v29 = vadd.f32 %v1581_v27, %v3228_v1  ;;  %v2858_v1 = vld [vmem:[%s3181_s24] sm:$0xff]   ;;  %s3562_s24 = scalar_lea.vmem %s3561_s7, %s3560_s16 }
 0x732   : > { %v1583_v30 = vpop.f32.mrf.mxu1  ;;  %2749 = vmatpush3.bf16.msra.mxu1 %v2858_v1  ;;  %v2628_v12 = vld [vmem:[%s3562_s24] ss:$0 sm:$0xff] }
 0x733   : > { %v1589_v31 = vsel %vm1181_vm1, %v3305_v29, 0.0  ;;  %2760 = vmatprep.subr.bf16.mxu1 %v2933_v9 }
 0x734   : > { %1590 = vadd.xlane.f32.xlu1 %v1589_v31  ;;  %v2737_v32 = vpop.f32.mrf.mxu1 }
 0x735   : > { %2751 = vmatmul.mubr.msk.bf16.vlgmr.msra.gmra.mxu1 %vm1234_vm3, %v1687_v40 }
 0x736   : > { %2762 = vmatprep.mubr.msk.bf16.mxu1 %vm2934_vm2, %v2933_v9 }
 0x7bd   : > { %v1591_v33 = vpop.xlane.xlu1 %1590 }
 0x7be   : > { %v1592_v34 = vmul.f32 0.03125, %v1591_v33 }
 0x7c0   : > { %v1593_v35 = vsub.f32 %v3305_v29, %v1592_v34 }
 0x7c2   : > { %v1594_v36 = vmul.f32 %v1593_v35, %v1593_v35 }
 0x7c4   : > { %v1595_v37 = vsel %vm1181_vm1, %v1594_v36, 0.0 }
 0x7c5   : > { %1596 = vadd.xlane.f32.xlu0 %v1595_v37 }
 0x7f5   : > { %v1744_v54 = vpop.f32.mrf.mxu1 }
 0x7f6   : > { %v1745_v55 = vadd.f32 %v2622_v53, %v1744_v54 }
 0x7f7   : > { %v2752_v56 = vpop.f32.mrf.mxu1 }
 0x7f8   : > { %v1761_v57 = vpack.c.bf16 %v1745_v55, %v1745_v55  ;;  %1758 = vrot.lane.b32.xlu1 %v1745_v55, %s2935_s27 }
 0x7f9   : > { %v1747_v58 = vpop.f32.mrf.mxu1 }
 0x7fa   : > { %v1767_v59 = vsel %vm1288_vm4, %v1761_v57, 0 }
 0x7fb   : > { %v2753_v60 = vpop.f32.mrf.mxu1 }
 0x84e   : > { %v1597_v43 = vpop.xlane.xlu0 %1596 }
 0x84f   : > { %v1598_v44 = vmul.f32 0.03125, %v1597_v43 }
 0x851   : > { %v1599_v45 = vadd.f32 1e-06, %v1598_v44 }
 0x853   : > { %2879 = vrsqrt.f32 %v1599_v45 }
 0x860   : > { %v2880_v46 = vpop.eup %2879 }
 0x861   : > { %v1601_v48 = vmul.f32 %v2880_v46, %v1593_v35 }
 0x863   : > { %v1608_v50 = vmul.f32 %v2616_v47, %v1601_v48 }
 0x865   : > { %v1615_v51 = vadd.f32 %v2617_v49, %v1608_v50 }
 0x867   : > { %v1620_v52 = vpack.c.bf16 %v1615_v51, %v1615_v51 }
 0x869   : > { %2743 = vmatmul.mubr.msk.bf16.vlgmr.msra.gmra.mxu0 %vm1234_vm3, %v1620_v52 }
 0x86a   : > { %2756 = vmatprep.mubr.msk.bf16.mxu0 %vm2934_vm2, %v2933_v9  ;;  %2755 = vmatpush3.bf16.xpose.msra.mxu0 %v1767_v59  ;;  %v1759_v61 = vpop.permute.xlu1 %1758 }
 0x86b   : > { %2766 = vmatprep.subr.bf16.mxu0 %v2933_v9  ;;  %v1762_v62 = vpack.c.bf16 %v1759_v61, %v1759_v61  ;;  %v2631_v61 = vld [vmem:[%s3565_s28] ss:$0 sm:$0xff] }
 0x86d   : > { %v1813_v63 = vsel %vm1288_vm4, %v1762_v62, 0 }
 0x86e   : > { %2761 = vmatpush3.bf16.xpose.msra.mxu1 %v1813_v63 }
 0x86f   : > { %2772 = vmatprep.subr.bf16.mxu1 %v2933_v9 }
 0x929   : > { %v1677_v2 = vpop.f32.mrf.mxu0 }
 0x92a   : > { %v1678_v3 = vadd.f32 %v2618_v0, %v1677_v2 }
 0x92b   : > { %v2744_v4 = vpop.f32.mrf.mxu0 }
 0x92c   : > { %v1755_v5 = vpack.c.bf16 %v1678_v3, %v1678_v3  ;;  %1752 = vrot.lane.b32.xlu0 %v1678_v3, %s2935_s27  ;;  %s3563_s27 = sld [smem:[#allocation11_spill]] }
 0x92d   : > { %v1680_v6 = vpop.f32.mrf.mxu0 }
 0x92e   : > { %2757 = vmatmul.mubr.msk.bf16.vlgmr.msra.gmra.mxu0 %vm1288_vm4, %v1755_v5 }
 0x92f   : > { %v2745_v7 = vpop.f32.mrf.mxu0  ;;  %2768 = vmatprep.mubr.msk.bf16.mxu0 %vm2934_vm2, %v2933_v9 }
 0x932   : > { %v2861_v48 = vld [vmem:[%s3563_s27 + $0x8] sm:$0xff]   ;;  %v2862_v49 = vld [vmem:[%s3563_s27] sm:$0xff]  }
 0x99e   : > { %v1753_v8 = vpop.permute.xlu0 %1752 }
 0x99f   : > { %v1756_v10 = vpack.c.bf16 %v1753_v8, %v1753_v8 }
 0x9a1   : > { %2763 = vmatmul.mubr.msk.bf16.vlgmr.msra.gmra.mxu1 %vm1288_vm4, %v1756_v10 }
 0x9a2   : > { %2774 = vmatprep.mubr.msk.bf16.mxu1 %vm2934_vm2, %v2933_v9 }
 0x9ee   : > { %v1803_v11 = vpop.f32.mrf.mxu0 }
 0x9ef   : > { %v1855_v13 = vmul.f32 0.25, %v1803_v11 }
 0x9f0   : > { %v2758_v14 = vpop.f32.mrf.mxu0 }
 0x9f1   : > { %v1863_v15 = vadd.f32 %v2628_v12, %v1855_v13  ;;  %v2864_v13 = vld [vmem:[%s3207_s1] sm:$0xff]   ;;  %v2866_v14 = vld [vmem:[%s3217_s17 + $0x10] sm:$0xff]  }
 0x9f2   : > { %v1806_v16 = vpop.f32.mrf.mxu0 }
 0x9f3   : > { %v1866_v17 = vsel %vm1865_vm9, %v1863_v15, -inf }
 0x9f4   : > { %1867 = vmax.xlane.f32.xlu0 %v1866_v17  ;;  %v2759_v18 = vpop.f32.mrf.mxu0 }
 0xa61   : > { %v1849_v19 = vpop.f32.mrf.mxu1 }
 0xa62   : > { %v1856_v20 = vmul.f32 0.25, %v1849_v19  ;;  %v2635_v19 = vld [vmem:[%s3566_s25] ss:$0 sm:$0xff] }
 0xa63   : > { %v2764_v21 = vpop.f32.mrf.mxu1 }
 0xa64   : > { %v1864_v22 = vadd.f32 %v2628_v12, %v1856_v20  ;;  %v2863_v12 = vld [vmem:[%s3207_s1 + $0x8] sm:$0xff]   ;;  %v2636_v21 = vld [vmem:[%s3568_s19] ss:$0 sm:$0xff] }
 0xa65   : > { %v1852_v23 = vpop.f32.mrf.mxu1 }
 0xa66   : > { %v1869_v24 = vsel %vm1865_vm9, %v1864_v22, -inf }
 0xa67   : > { %1870 = vmax.xlane.f32.xlu1 %v1869_v24  ;;  %v2765_v25 = vpop.f32.mrf.mxu1 }
 0xa68   : > { %v2867_v25 = vld [vmem:[%s3217_s17 + $0x8] sm:$0xff]  }
 0xa7d   : > { %v1868_v26 = vpop.xlane.xlu0 %1867 }
 0xa7e   : > { %v1872_v27 = vsub.f32 %v1863_v15, %v1868_v26  ;;  %v2868_v26 = vld [vmem:[%s3217_s17] sm:$0xff]  }
 0xa80   : > { %v1874_v28 = vmul.f32 1.442695, %v1872_v27  ;;  %v2637_v27 = vld [vmem:[%s1156_s26] ss:$0 sm:$0xff] }
 0xa82   : > { %2881 = vpow2.f32 %v1874_v28 }
 0xa8f   : > { %v2882_v30 = vpop.eup %2881 }
 0xa90   : > { %v1878_v31 = vsel %vm1865_vm9, %v2882_v30, 0.0 }
 0xa91   : > { %1879 = vadd.xlane.f32.xlu0 %v1878_v31 }
 0xaa7   : > { %1891 = vrot.lane.b32.xlu0 %v1761_v57, %s2936_s21 }
 0xaf0   : > { %v1871_v32 = vpop.xlane.xlu1 %1870 }
 0xaf1   : > { %v1873_v33 = vsub.f32 %v1864_v22, %v1871_v32 }
 0xaf3   : > { %v1876_v34 = vmul.f32 1.442695, %v1873_v33 }
 0xaf5   : > { %2883 = vpow2.f32 %v1876_v34 }
 0xb02   : > { %v2884_v35 = vpop.eup %2883 }
 0xb03   : > { %v1881_v36 = vsel %vm1865_vm9, %v2884_v35, 0.0 }
 0xb04   : > { %1882 = vadd.xlane.f32.xlu1 %v1881_v36 }
 0xb15   : > { %1942 = vrot.lane.b32.xlu1 %v1762_v62, %s2936_s21 }
 0xb1a   : > { %v1880_v37 = vpop.xlane.xlu0 %1879 }
 0xb1b   : > { %2885 = vrcp.f32 %v1880_v37 }
 0xb1e   : > { %v1892_v38 = vpop.permute.xlu0 %1891 }
 0xb1f   : > { %v1899_v1 = vsel %vm1897_vm10, %v1892_v38, 0 }
 0xb20   : > { %2767 = vmatpush3.bf16.msra.mxu0 %v1899_v1 }
 0xb21   : > { %2778 = vmatprep.subr.bf16.mxu0 %v2933_v9 }
 0xb28   : > { %v2886_v39 = vpop.eup %2885 }
 0xb29   : > { %v1886_v40 = vmul.f32 %v2886_v39, %v2882_v30 }
 0xb2b   : > { %v1888_v41 = vpack.c.bf16 %v1886_v40, %v1886_v40 }
 0xb2d   : > { %2769 = vmatmul.mubr.msk.bf16.vlgmr.msra.gmra.mxu0 %vm1893_vm11, %v1888_v41 }
 0xb2e   : > { %2782 = vmatprep.mubr.msk.bf16.mxu0 %vm2934_vm2, %v2933_v9  ;;  %2779 = vmatpush3.bf16.msra.mxu0 %v2861_v48 }
 0xb2f   : > { %2780 = vmatprep.subr.bf16.mxu0 %v2933_v9 }
 0xb32   : > { %2781 = vmatpush3.bf16.msra.mxu0 %v2862_v49 }
 0xb33   : > { %2794 = vmatprep.subr.bf16.mxu0 %v2933_v9 }
 0xb8d   : > { %v1883_v42 = vpop.xlane.xlu1 %1882 }
 0xb8e   : > { %2887 = vrcp.f32 %v1883_v42 }
 0xb91   : > { %v1943_v43 = vpop.permute.xlu1 %1942 }
 0xb92   : > { %v1948_v44 = vsel %vm1897_vm10, %v1943_v43, 0 }
 0xb93   : > { %2773 = vmatpush3.bf16.msra.mxu1 %v1948_v44 }
 0xb94   : > { %2786 = vmatprep.subr.bf16.mxu1 %v2933_v9 }
 0xb9b   : > { %v2888_v45 = vpop.eup %2887 }
 0xb9c   : > { %v1887_v46 = vmul.f32 %v2888_v45, %v2884_v35 }
 0xb9e   : > { %v1889_v47 = vpack.c.bf16 %v1887_v46, %v1887_v46 }
 0xba0   : > { %2775 = vmatmul.mubr.msk.bf16.vlgmr.msra.gmra.mxu1 %vm1893_vm11, %v1889_v47 }
 0xba1   : > { %2790 = vmatprep.mubr.msk.bf16.mxu1 %vm2934_vm2, %v2933_v9  ;;  %2787 = vmatpush3.bf16.msra.mxu1 %v2863_v12 }
 0xba2   : > { %2788 = vmatprep.subr.bf16.mxu1 %v2933_v9 }
 0xba5   : > { %2789 = vmatpush3.bf16.msra.mxu1 %v2864_v13 }
 0xbed   : > { %v1935_v50 = vpop.f32.mrf.mxu0 }
 0xbef   : > { %v2770_v51 = vpop.f32.mrf.mxu0 }
 0xbf1   : > { %v1938_v52 = vpop.f32.mrf.mxu0 }
 0xbf3   : > { %v2771_v53 = vpop.f32.mrf.mxu0 }
 0xc60   : > { %v1984_v54 = vpop.f32.mrf.mxu1 }
 0xc61   : > { %1991 = vrot.lane.b32.xlu1 %v1984_v54, %s2939_s14 }
 0xc62   : > { %v2776_v55 = vpop.f32.mrf.mxu1 }
 0xc64   : > { %v1987_v56 = vpop.f32.mrf.mxu1 }
 0xc66   : > { %v2777_v57 = vpop.f32.mrf.mxu1 }
 0xcd3   : > { %v1992_v58 = vpop.permute.xlu1 %1991 }
 0xcd4   : > { %v1994_v59 = vsel %vm1288_vm4, %v1935_v50, %v1992_v58 }
 0xcd5   : > { %v1999_v60 = vpack.c.bf16 %v1994_v59, %v1994_v59 }
 0xcd7   : > { %2783 = vmatmul.mubr.msk.bf16.vlgmr.msra.gmra.mxu0 %vm1234_vm3, %v1999_v60 }
 0xcd8   : > { %2802 = vmatprep.mubr.msk.bf16.mxu0 %vm2934_vm2, %v2933_v9 }
 0xd97   : > { %v2056_v62 = vpop.f32.mrf.mxu0 }
 0xd98   : > { %v2057_v63 = vadd.f32 %v2631_v61, %v2056_v62 }
 0xd99   : > { %v2784_v0 = vpop.f32.mrf.mxu0 }
 0xd9a   : > { %v2062_v2 = vadd.f32 %v2057_v63, %v3305_v29  ;;  %v2865_v29 = vld [vmem:[%s3217_s17 + $0x18] sm:$0xff]   ;;  %s3571_s17 = sld [smem:[#allocation3_spill]] }
 0xd9b   : > { %v2059_v3 = vpop.f32.mrf.mxu0  ;;  %2795 = vmatpush3.bf16.msra.mxu0 %v2865_v29 }
 0xd9c   : > { %v2065_v4 = vsel %vm1181_vm1, %v2062_v2, 0.0  ;;  %2796 = vmatprep.subr.bf16.mxu0 %v2933_v9 }
 0xd9d   : > { %2066 = vadd.xlane.f32.xlu1 %v2065_v4  ;;  %v2785_v5 = vpop.f32.mrf.mxu0 }
 0xd9f   : > { %2797 = vmatpush3.bf16.msra.mxu0 %v2866_v14 }
 0xda0   : > { %2798 = vmatprep.subr.bf16.mxu0 %v2933_v9  ;;  %p2647_p8 = scmp.ne.s32.totalorder %s3571_s17, 1 }
 0xda1   : > { %s3573_s7 = sld [smem:[#allocation34_spill]] (!%p2647_p8) }
 0xda3   : > { %2799 = vmatpush3.bf16.msra.mxu0 %v2867_v25 }
 0xda4   : > { %2800 = vmatprep.subr.bf16.mxu0 %v2933_v9  ;;  %v2641_v9 = vld [vmem:[%s1164_s10] ss:$0 sm:$0xff]  ;;  %s3572_s10 = sld [smem:[#allocation33_spill]] (!%p2647_p8) }
 0xda7   : > { %2801 = vmatpush3.bf16.msra.mxu0 %v2868_v26 }
 0xe26   : > { %v2067_v6 = vpop.xlane.xlu1 %2066 }
 0xe27   : > { %v2068_v7 = vmul.f32 0.03125, %v2067_v6 }
 0xe29   : > { %v2069_v8 = vsub.f32 %v2062_v2, %v2068_v7 }
 0xe2b   : > { %v2070_v10 = vmul.f32 %v2069_v8, %v2069_v8 }
 0xe2d   : > { %v2071_v11 = vsel %vm1181_vm1, %v2070_v10, 0.0 }
 0xe2e   : > { %2072 = vadd.xlane.f32.xlu0 %v2071_v11 }
 0xeb7   : > { %v2073_v15 = vpop.xlane.xlu0 %2072 }
 0xeb8   : > { %v2074_v16 = vmul.f32 0.03125, %v2073_v15 }
 0xeba   : > { %v2075_v17 = vadd.f32 1e-06, %v2074_v16 }
 0xebc   : > { %2889 = vrsqrt.f32 %v2075_v17 }
 0xec9   : > { %v2890_v18 = vpop.eup %2889 }
 0xeca   : > { %v2077_v20 = vmul.f32 %v2890_v18, %v2069_v8 }
 0xecc   : > { %v2084_v22 = vmul.f32 %v2635_v19, %v2077_v20 }
 0xece   : > { %v2091_v23 = vadd.f32 %v2636_v21, %v2084_v22 }
 0xed0   : > { %v2096_v24 = vpack.c.bf16 %v2091_v23, %v2091_v23 }
 0xed2   : > { %2791 = vmatmul.mubr.msk.bf16.vlgmr.msra.gmra.mxu1 %vm1234_vm3, %v2096_v24 }
 0xf92   : > { %v2153_v28 = vpop.f32.mrf.mxu1 }
 0xf93   : > { %v2154_v30 = vadd.f32 %v2637_v27, %v2153_v28 }
 0xf94   : > { %v2792_v31 = vpop.f32.mrf.mxu1 }
 0xf95   : > { %v2159_v32 = vmax.f32 %v2154_v30, 0.0 }
 0xf96   : > { %v2156_v33 = vpop.f32.mrf.mxu1 }
 0xf97   : > { %v2168_v34 = vpack.c.bf16 %v2159_v32, %v2159_v32 }
 0xf98   : > { %v2793_v35 = vpop.f32.mrf.mxu1 }
 0xf99   : > { %2803 = vmatmul.mubr.msk.bf16.vlgmr.msra.gmra.mxu0 %vm2200_vm12, %v2168_v34 }
0x1059   : > { %v2238_v36 = vpop.f32.mrf.mxu0 }
0x105a   : > { %v2239_v37 = vadd.f32 %v2641_v9, %v2238_v36 }
0x105b   : > { %v2804_v38 = vpop.f32.mrf.mxu0  ;;  %2249 = sbr.rel (%p2647_p8) target bundleno = 4501 (0x1195), region = 132 }
0x105c   : > { %v2244_v1 = vadd.f32 %v2239_v37, %v2062_v2 }
0x105d   : > { %v2241_v39 = vpop.f32.mrf.mxu0 }
0x105e   : > { %2245 = vst.msk [vmem:[#allocation2] sm:$0x7f] %vm1181_vm1, %v2244_v1 }
0x105f   : > { %v2805_v40 = vpop.f32.mrf.mxu0 }
0x1060   : > { %v2252_v41 = vsel %vm1181_vm1, %v2244_v1, 0.0  ;;  %v2648_v51 = vld [vmem:[%s3572_s10] ss:$0 sm:$0xff] }
0x1061   : > { %2253 = vadd.xlane.f32.xlu0 %v2252_v41  ;;  %v2649_v53 = vld [vmem:[%s3573_s7] ss:$0 sm:$0xff] }
0x10ea   : > { %v2254_v42 = vpop.xlane.xlu0 %2253 }
0x10eb   : > { %v2255_v43 = vmul.f32 0.03125, %v2254_v42 }
0x10ed   : > { %v2256_v44 = vsub.f32 %v2244_v1, %v2255_v43 }
0x10ef   : > { %v2257_v45 = vmul.f32 %v2256_v44, %v2256_v44 }
0x10f1   : > { %v2258_v46 = vsel %vm1181_vm1, %v2257_v45, 0.0 }
0x10f2   : > { %2259 = vadd.xlane.f32.xlu0 %v2258_v46 }
0x117b   : > { %v2260_v47 = vpop.xlane.xlu0 %2259 }
0x117c   : > { %v2261_v48 = vmul.f32 0.03125, %v2260_v47 }
0x117e   : > { %v2262_v49 = vadd.f32 1e-06, %v2261_v48 }
0x1180   : > { %2891 = vrsqrt.f32 %v2262_v49 }
0x118d   : > { %v2892_v50 = vpop.eup %2891 }
0x118e   : > { %v2264_v52 = vmul.f32 %v2892_v50, %v2256_v44 }
0x1190   : > { %v2271_v54 = vmul.f32 %v2648_v51, %v2264_v52 }
0x1192   : > { %v2278_v55 = vadd.f32 %v2649_v53, %v2271_v54 }
0x1194   : > { %2279 = vst.msk [vmem:[%s1168_s3] sm:$0x7f] %vm1181_vm1, %v2278_v55 }
0x1195 PF: > { %s3575_s5 = sld [smem:[#allocation6_spill]] }
0x1196   : > { %s3576_s27 = sld [smem:[#allocation4_spill]] }
0x1197   : > { %s3577_s3 = sld [smem:[#allocation5_spill]] }
0x1198   : > { %s3578_s7 = sld [smem:[#allocation7_spill]] }
0x1199   : > { %s3579_s28 = sld [smem:[#allocation8_spill]] }
0x119b   : > { %s36_s8 = sadd.s32 1, %s3575_s5  }
0x119c   : > { %p33_p9 = scmp.ge.s32.totalorder %s36_s8, 6  }
0x119e   :  { %35 = sbr.rel (!%p33_p9) target bundleno = 25 (0x19), region = 231 }

</bundles_post_ra>
